<compile_context>
chip_gen: v7x
topology: tpu7x:2x2x1
jax: 0.10.0
libtpu: 0.0.40
codegen_flags: <defaults>
</compile_context>

<pallas_src>
import jax
import jax.numpy as jnp
from jax.experimental import pallas as pl
from jax.experimental.pallas import tpu as pltpu


def _round_up(x, m):
    return (x + m - 1) // m * m


_TAPS = tuple((ky, kx) for ky in range(3) for kx in range(3))
_PAD_TOP = 8   # zero band above the intermediate buffer (>=1 row required)
_PAD_BOT = 8   # zero band below (covers garbage-column tap overreach)


def _make_resblock_kernel(W, Wr, Cp, hT, n_tiles, S_IN):
    TILE = hT * Wr              # anchored output rows per tile
    M1 = (hT + 2) * Wr          # conv1/intermediate rows per tile (1-row halo)

    def kernel(xf_hbm, w1_ref, b1_ref, w2_ref, b2_ref, o_ref,
               xbuf, m1_ref, acc_ref, sem):
        # xf_hbm : (N, Mtot, Cp) bf16 HBM   flattened zero-padded input
        # w*_ref : (9, Cp, Cp)   bf16 VMEM  tap index t = ky*3 + kx
        # b*_ref : (1, Cp)       f32  VMEM
        # o_ref  : (TILE, Cp)    out  VMEM  anchored output block
        # xbuf   : (2, S_IN, Cp) bf16 VMEM  double-buffered input window
        # m1_ref : (PAD_TOP + M1 + PAD_BOT, Cp) bf16  masked conv1 output
        # acc_ref: (M1, Cp)      f32  VMEM  matmul accumulator
        n = pl.program_id(0)
        t = pl.program_id(1)
        slot = t % 2

        def window_copy(tile_idx, s):
            start = tile_idx * TILE
            return pltpu.make_async_copy(
                xf_hbm.at[n, pl.ds(start, S_IN), :], xbuf.at[s], sem.at[s])

        # ---- manual double-buffered window DMA ----------------------------
        @pl.when(t == 0)
        def _():
            window_copy(0, slot).start()       # prologue (once per image)

        window_copy(t, slot).wait()

        @pl.when(t + 1 < n_tiles)
        def _():
            window_copy(t + 1, 1 - slot).start()   # prefetch next tile

        # Zero the small halo bands of the intermediate buffer (cheap; done
        # every step so it is correct on whichever core runs this step).
        m1_ref[0:_PAD_TOP, :] = jnp.zeros((_PAD_TOP, Cp), m1_ref.dtype)
        m1_ref[_PAD_TOP + M1:_PAD_TOP + M1 + _PAD_BOT, :] = jnp.zeros(
            (_PAD_BOT, Cp), m1_ref.dtype)

        # ---- conv1 (3x3, pad 1) + bias + ReLU + border mask ---------------
        # Weight-stationary tap ordering: one big matmul per tap, accumulated
        # in an f32 VMEM scratch (bias fused into the accumulator init).
        acc_ref[...] = jnp.broadcast_to(b1_ref[...], (M1, Cp))
        for ti, (ky, kx) in enumerate(_TAPS):
            d = ky * Wr + kx                              # uniform row shift
            acc_ref[...] += jnp.dot(xbuf[slot, d:d + M1, :], w1_ref[ti],
                                    preferred_element_type=jnp.float32)

        # ReLU + zero the w >= W garbage columns, cast to bf16 intermediate.
        col = jax.lax.broadcasted_iota(jnp.int32, (M1, 1), 0) % Wr
        keep = (col < W).astype(jnp.float32)
        m1_ref[_PAD_TOP:_PAD_TOP + M1, :] = (
            jnp.maximum(acc_ref[...], 0.0) * keep).astype(m1_ref.dtype)

        # conv2's vertical zero padding at the image top / bottom.
        @pl.when(t == 0)
        def _():
            m1_ref[_PAD_TOP:_PAD_TOP + Wr, :] = jnp.zeros((Wr, Cp),
                                                          m1_ref.dtype)

        @pl.when(t == n_tiles - 1)
        def _():
            m1_ref[_PAD_TOP + (hT + 1) * Wr:_PAD_TOP + M1, :] = jnp.zeros(
                (Wr, Cp), m1_ref.dtype)

        # ---- conv2 (3x3, pad 1) + bias + identity shortcut -----------------
        # Shortcut x[h, w] is a uniform-shift slice of the same input window
        # (no separate shortcut array); cast bf16 -> f32 for the add.
        sc = xbuf[slot, 2 * Wr + 1:2 * Wr + 1 + TILE, :].astype(jnp.float32)
        acc_ref[0:TILE, :] = jnp.broadcast_to(b2_ref[...], (TILE, Cp)) + sc
        for ti, (ky, kx) in enumerate(_TAPS):
            d = _PAD_TOP + ky * Wr + (kx - 1)
            acc_ref[0:TILE, :] += jnp.dot(m1_ref[d:d + TILE, :], w2_ref[ti],
                                          preferred_element_type=jnp.float32)
        o_ref[...] = acc_ref[0:TILE, :].astype(o_ref.dtype)

    return kernel


def resblock_forward(x_nchw, w1, b1, w2, b2, *, out_dtype=jnp.float32,
                     max_tile_rows=4096, interpret=False):
    """Fused ResBlock forward, identity-shortcut path.

    x_nchw: (N, C, H, W) f32; w*: (Cout, Cin, 3, 3) OIHW; b*: (Cout,).
    Returns (N, C, H, W) in out_dtype (bf16 halves HBM writeback).
    """
    N, C, H, W = x_nchw.shape
    Cout = w1.shape[0]
    assert Cout == C and w2.shape[0] == C, \
        "identity-shortcut path only (default ResBlock config)"

    Wr = _round_up(W + 2, 8)          # 8-aligned anchored row stride
    Cp = _round_up(C, 128)            # lane-dense channels
    out_bytes = jnp.dtype(out_dtype).itemsize

    # VMEM limit with headroom (never the full physical per-TC VMEM).
    try:
        cap = pltpu.get_tpu_info().vmem_capacity_bytes
        vmem_limit = max(32 << 20, min(int(cap * 0.75), 100 << 20))
    except Exception:
        vmem_limit = 48 << 20
    budget = int(vmem_limit * 0.6)

    # Pick the largest hT | H whose per-tile VMEM footprint fits the budget.
    hT = 1
    for cand in range(1, H + 1):
        if H % cand:
            continue
        tile = cand * Wr
        if cand > 1 and tile > max_tile_rows:
            continue
        s_in = (cand + 4) * Wr + 8
        est = (2 * s_in * Cp * 2                       # input window (x2 slots)
               + (_PAD_TOP + (cand + 2) * Wr + _PAD_BOT) * Cp * 2   # bf16 m1
               + (cand + 2) * Wr * Cp * 4              # f32 accumulator
               + 2 * tile * Cp * out_bytes             # pipelined output block
               + 2 * 2 * 9 * Cp * Cp * 2               # w1, w2 double-buffered
               + 8 * Cp * 4)                           # biases etc.
        if cand == 1 or est <= budget:
            hT = cand
    n_tiles = H // hT
    TILE = hT * Wr
    S_IN = (hT + 4) * Wr + 8
    Hp = H + 2
    Mtot = (H + 4) * Wr + 8

    # ---- glue: NCHW -> zero-padded, 8-aligned-stride, lane-dense flat NHWC --
    x_nhwc = jnp.transpose(x_nchw, (0, 2, 3, 1))                    # (N,H,W,C)
    xpad = jnp.pad(x_nhwc, ((0, 0), (1, 1), (1, Wr - W - 1), (0, Cp - C)))
    xflat = xpad.reshape(N, Hp * Wr, Cp)
    xflat = jnp.pad(xflat, ((0, 0), (Wr, Wr + 8), (0, 0)))   # top halo + tail
    xf = xflat.astype(jnp.bfloat16)                                 # (N,Mtot,Cp)
    assert xf.shape[1] == Mtot

    def prep_w(w):  # OIHW -> (9, Cin_p, Cout_p) bf16, tap index = ky*3 + kx
        wm = jnp.transpose(w, (2, 3, 1, 0)).reshape(9, C, C)
        wm = jnp.pad(wm, ((0, 0), (0, Cp - C), (0, Cp - C)))
        return wm.astype(jnp.bfloat16)

    w1m, w2m = prep_w(w1), prep_w(w2)
    b1m = jnp.pad(b1, (0, Cp - C)).reshape(1, Cp).astype(jnp.float32)
    b2m = jnp.pad(b2, (0, Cp - C)).reshape(1, Cp).astype(jnp.float32)

    kernel = _make_resblock_kernel(W, Wr, Cp, hT, n_tiles, S_IN)

    out_flat = pl.pallas_call(
        kernel,
        out_shape=jax.ShapeDtypeStruct((N * H * Wr, Cp), out_dtype),
        grid_spec=pltpu.PrefetchScalarGridSpec(
            num_scalar_prefetch=0,
            grid=(N, n_tiles),
            in_specs=[
                pl.BlockSpec(memory_space=pl.ANY),                    # xf (HBM)
                pl.BlockSpec((9, Cp, Cp), lambda n, t: (0, 0, 0)),    # w1
                pl.BlockSpec((1, Cp), lambda n, t: (0, 0)),           # b1
                pl.BlockSpec((9, Cp, Cp), lambda n, t: (0, 0, 0)),    # w2
                pl.BlockSpec((1, Cp), lambda n, t: (0, 0)),           # b2
            ],
            out_specs=pl.BlockSpec((TILE, Cp),
                                   lambda n, t: (n * n_tiles + t, 0)),
            scratch_shapes=[
                pltpu.VMEM((2, S_IN, Cp), jnp.bfloat16),              # window
                pltpu.VMEM((_PAD_TOP + (hT + 2) * Wr + _PAD_BOT, Cp),
                           jnp.bfloat16),                             # m1
                pltpu.VMEM(((hT + 2) * Wr, Cp), jnp.float32),         # f32 acc
                pltpu.SemaphoreType.DMA((2,)),
            ],
        ),
        compiler_params=pltpu.CompilerParams(
            dimension_semantics=("parallel", "arbitrary"),
            vmem_limit_bytes=int(vmem_limit),
        ),
        interpret=interpret,
    )(xf, w1m, b1m, w2m, b2m)

    # anchored -> NCHW: drop w >= W garbage columns and channel padding.
    out = out_flat.reshape(N, H, Wr, Cp)[:, :, :W, :C]
    return jnp.transpose(out, (0, 3, 1, 2))


def _reference(x, w1, b1, w2, b2):
    def conv3x3(h, w, b):
        y = jax.lax.conv_general_dilated(
            h, w, window_strides=(1, 1), padding=((1, 1), (1, 1)),
            dimension_numbers=("NCHW", "OIHW", "NCHW"))
        return y + b[None, :, None, None]

    h = jnp.maximum(conv3x3(x, w1, b1), 0.0)
    return conv3x3(h, w2, b2) + x


if __name__ == "__main__":
    N, C, H, W = 2, 4, 16, 16   # small stand-in for (B, 192, H, W)
    key = jax.random.PRNGKey(0)
    k1, k2, k3, k4, k5 = jax.random.split(key, 5)

    x = jax.random.normal(k1, (N, C, H, W), jnp.float32)
    w1 = jax.random.normal(k2, (C, C, 3, 3), jnp.float32) * 0.1
    b1 = jax.random.normal(k3, (C,), jnp.float32) * 0.1
    w2 = jax.random.normal(k4, (C, C, 3, 3), jnp.float32) * 0.1
    b2 = jax.random.normal(k5, (C,), jnp.float32) * 0.1

    # max_tile_rows=96 -> hT=4, n_tiles=4: exercises first / interior / last
    # tiles, the recompute halo and the double-buffered window prefetch.
    out = jax.block_until_ready(
        resblock_forward(x, w1, b1, w2, b2, max_tile_rows=96))

    ref = _reference(x, w1, b1, w2, b2)
    assert out.shape == (N, C, H, W) and out.dtype == jnp.float32
    # bf16 MXU operands / bf16 intermediate & shortcut (f32 accumulation)
    assert jnp.allclose(out, ref, atol=3e-2, rtol=3e-2), "mismatch vs reference"

    print("KERNEL_OK")
</pallas_src>

<mosaic_0001>
module attributes {stable_mosaic.version = 11 : i64} {
  func.func @kernel(%arg0: i32, %arg1: i32, %arg2: memref<2x488x128xbf16, #tpu.memory_space<any>>, %arg3: memref<9x128x128xbf16, #tpu.memory_space<vmem>>, %arg4: memref<1x128xf32, #tpu.memory_space<vmem>>, %arg5: memref<9x128x128xbf16, #tpu.memory_space<vmem>>, %arg6: memref<1x128xf32, #tpu.memory_space<vmem>>, %arg7: memref<96x128xf32, #tpu.memory_space<vmem>>, %arg8: memref<2x200x128xbf16, #tpu.memory_space<vmem>>, %arg9: memref<160x128xbf16, #tpu.memory_space<vmem>>, %arg10: memref<144x128xf32, #tpu.memory_space<vmem>>, %arg11: memref<2x!tpu.dma_semaphore, #tpu.memory_space<semaphore_mem>>) attributes {dimension_semantics = [#tpu.dimension_semantics<parallel>, #tpu.dimension_semantics<arbitrary>], iteration_bounds = array<i64: 2, 4>, scalar_prefetch = 0 : i64, scratch_operands = 4 : i64, tpu.core_type = #tpu.core_type<tc>, window_params = [{}, {pipeline_mode = #tpu.pipeline_mode<synchronous>, transform_indices = @transform_1, window_bounds = array<i64: 9, 128, 128>}, {pipeline_mode = #tpu.pipeline_mode<synchronous>, transform_indices = @transform_2, window_bounds = array<i64: 1, 128>}, {pipeline_mode = #tpu.pipeline_mode<synchronous>, transform_indices = @transform_3, window_bounds = array<i64: 9, 128, 128>}, {pipeline_mode = #tpu.pipeline_mode<synchronous>, transform_indices = @transform_4, window_bounds = array<i64: 1, 128>}, {transform_indices = @transform_5, window_bounds = array<i64: 96, 128>}]} {
    %c2_i32 = arith.constant 2 : i32
    %c0_i32 = arith.constant 0 : i32
    %0 = arith.cmpi eq, %c2_i32, %c0_i32 : i32
    %c1_i32 = arith.constant 1 : i32
    %1 = arith.select %0, %c1_i32, %c2_i32 : i32
    %2 = arith.remsi %arg1, %1 : i32
    %c0_i32_0 = arith.constant 0 : i32
    %3 = arith.cmpi ne, %2, %c0_i32_0 : i32
    %c0_i32_1 = arith.constant 0 : i32
    %4 = arith.cmpi slt, %2, %c0_i32_1 : i32
    %c0_i32_2 = arith.constant 0 : i32
    %5 = arith.cmpi slt, %1, %c0_i32_2 : i32
    %6 = arith.xori %4, %5 : i1
    %7 = arith.andi %6, %3 : i1
    %8 = arith.addi %2, %1 : i32
    %9 = arith.select %7, %8, %2 : i32
    %c0_i32_3 = arith.constant 0 : i32
    %10 = arith.cmpi eq, %arg1, %c0_i32_3 : i32
    %11 = arith.extui %10 : i1 to i32
    %c0_i32_4 = arith.constant 0 : i32
    %12 = arith.cmpi ne, %11, %c0_i32_4 : i32
    scf.if %12 {
      %c0_i32_199 = arith.constant 0 : i32
      %c0_i32_200 = arith.constant 0 : i32
      %221 = tpu.memref_slice %arg2[%arg0, %c0_i32_199, %c0_i32_200] : memref<2x488x128xbf16, #tpu.memory_space<any>> -> memref<1x200x128xbf16, #tpu.memory_space<any>>
      %222 = tpu.memref_squeeze %221 : memref<1x200x128xbf16, #tpu.memory_space<any>> -> memref<200x128xbf16, #tpu.memory_space<any>>
      %c0_i32_201 = arith.constant 0 : i32
      %c0_i32_202 = arith.constant 0 : i32
      %223 = tpu.memref_slice %arg8[%9, %c0_i32_201, %c0_i32_202] : memref<2x200x128xbf16, #tpu.memory_space<vmem>> -> memref<1x200x128xbf16, #tpu.memory_space<vmem>>
      %224 = tpu.memref_squeeze %223 : memref<1x200x128xbf16, #tpu.memory_space<vmem>> -> memref<200x128xbf16, #tpu.memory_space<vmem>>
      %225 = tpu.memref_slice %arg11[%9] : memref<2x!tpu.dma_semaphore, #tpu.memory_space<semaphore_mem>> -> memref<1x!tpu.dma_semaphore, #tpu.memory_space<semaphore_mem>>
      %226 = tpu.memref_squeeze %225 : memref<1x!tpu.dma_semaphore, #tpu.memory_space<semaphore_mem>> -> memref<!tpu.dma_semaphore, #tpu.memory_space<semaphore_mem>>
      tpu.enqueue_dma source(%222 : memref<200x128xbf16, #tpu.memory_space<any>>) target(%224 : memref<200x128xbf16, #tpu.memory_space<vmem>>) target_semaphore(%226 : memref<!tpu.dma_semaphore, #tpu.memory_space<semaphore_mem>>)
    } else {
    }
    %c96_i32 = arith.constant 96 : i32
    %13 = arith.muli %arg1, %c96_i32 : i32
    %c0_i32_5 = arith.constant 0 : i32
    %14 = tpu.memref_slice %arg2[%arg0, %13, %c0_i32_5] : memref<2x488x128xbf16, #tpu.memory_space<any>> -> memref<1x200x128xbf16, #tpu.memory_space<any>>
    %15 = tpu.memref_squeeze %14 : memref<1x200x128xbf16, #tpu.memory_space<any>> -> memref<200x128xbf16, #tpu.memory_space<any>>
    %c0_i32_6 = arith.constant 0 : i32
    %c0_i32_7 = arith.constant 0 : i32
    %16 = tpu.memref_slice %arg8[%9, %c0_i32_6, %c0_i32_7] : memref<2x200x128xbf16, #tpu.memory_space<vmem>> -> memref<1x200x128xbf16, #tpu.memory_space<vmem>>
    %17 = tpu.memref_squeeze %16 : memref<1x200x128xbf16, #tpu.memory_space<vmem>> -> memref<200x128xbf16, #tpu.memory_space<vmem>>
    %18 = tpu.memref_slice %arg11[%9] : memref<2x!tpu.dma_semaphore, #tpu.memory_space<semaphore_mem>> -> memref<1x!tpu.dma_semaphore, #tpu.memory_space<semaphore_mem>>
    %19 = tpu.memref_squeeze %18 : memref<1x!tpu.dma_semaphore, #tpu.memory_space<semaphore_mem>> -> memref<!tpu.dma_semaphore, #tpu.memory_space<semaphore_mem>>
    tpu.wait_dma2 semaphore(%19 : memref<!tpu.dma_semaphore, #tpu.memory_space<semaphore_mem>>) src(%15 : memref<200x128xbf16, #tpu.memory_space<any>>) dst(%17 : memref<200x128xbf16, #tpu.memory_space<vmem>>)
    %c1_i32_8 = arith.constant 1 : i32
    %20 = arith.addi %arg1, %c1_i32_8 : i32
    %c4_i32 = arith.constant 4 : i32
    %21 = arith.cmpi slt, %20, %c4_i32 : i32
    %22 = arith.extui %21 : i1 to i32
    %c0_i32_9 = arith.constant 0 : i32
    %23 = arith.cmpi ne, %22, %c0_i32_9 : i32
    scf.if %23 {
      %c1_i32_199 = arith.constant 1 : i32
      %221 = arith.addi %arg1, %c1_i32_199 : i32
      %c1_i32_200 = arith.constant 1 : i32
      %222 = arith.subi %c1_i32_200, %9 : i32
      %c96_i32_201 = arith.constant 96 : i32
      %223 = arith.muli %221, %c96_i32_201 : i32
      %c0_i32_202 = arith.constant 0 : i32
      %224 = tpu.memref_slice %arg2[%arg0, %223, %c0_i32_202] : memref<2x488x128xbf16, #tpu.memory_space<any>> -> memref<1x200x128xbf16, #tpu.memory_space<any>>
      %225 = tpu.memref_squeeze %224 : memref<1x200x128xbf16, #tpu.memory_space<any>> -> memref<200x128xbf16, #tpu.memory_space<any>>
      %c0_i32_203 = arith.constant 0 : i32
      %c0_i32_204 = arith.constant 0 : i32
      %226 = tpu.memref_slice %arg8[%222, %c0_i32_203, %c0_i32_204] : memref<2x200x128xbf16, #tpu.memory_space<vmem>> -> memref<1x200x128xbf16, #tpu.memory_space<vmem>>
      %227 = tpu.memref_squeeze %226 : memref<1x200x128xbf16, #tpu.memory_space<vmem>> -> memref<200x128xbf16, #tpu.memory_space<vmem>>
      %228 = tpu.memref_slice %arg11[%222] : memref<2x!tpu.dma_semaphore, #tpu.memory_space<semaphore_mem>> -> memref<1x!tpu.dma_semaphore, #tpu.memory_space<semaphore_mem>>
      %229 = tpu.memref_squeeze %228 : memref<1x!tpu.dma_semaphore, #tpu.memory_space<semaphore_mem>> -> memref<!tpu.dma_semaphore, #tpu.memory_space<semaphore_mem>>
      tpu.enqueue_dma source(%225 : memref<200x128xbf16, #tpu.memory_space<any>>) target(%227 : memref<200x128xbf16, #tpu.memory_space<vmem>>) target_semaphore(%229 : memref<!tpu.dma_semaphore, #tpu.memory_space<semaphore_mem>>)
    } else {
    }
    %cst = arith.constant 0.000000e+00 : bf16
    %24 = vector.broadcast %cst : bf16 to vector<8x128xbf16>
    %c0 = arith.constant 0 : index
    %c0_10 = arith.constant 0 : index
    %25 = vector.load %arg9[%c0, %c0_10] : memref<160x128xbf16, #tpu.memory_space<vmem>>, vector<8x128xbf16>
    tpu.vector_store %arg9[%c0, %c0_10], %24 {strides = array<i32>} : memref<160x128xbf16, #tpu.memory_space<vmem>>, vector<8x128xbf16>,
    %cst_11 = arith.constant 0.000000e+00 : bf16
    %26 = vector.broadcast %cst_11 : bf16 to vector<8x128xbf16>
    %c152 = arith.constant 152 : index
    %c0_12 = arith.constant 0 : index
    %27 = vector.load %arg9[%c152, %c0_12] : memref<160x128xbf16, #tpu.memory_space<vmem>>, vector<8x128xbf16>
    tpu.vector_store %arg9[%c152, %c0_12], %26 {strides = array<i32>} : memref<160x128xbf16, #tpu.memory_space<vmem>>, vector<8x128xbf16>,
    %c0_13 = arith.constant 0 : index
    %c0_14 = arith.constant 0 : index
    %28 = vector.load %arg4[%c0_13, %c0_14] : memref<1x128xf32, #tpu.memory_space<vmem>>, vector<1x128xf32>
    %29 = vector.shape_cast %28 : vector<1x128xf32> to vector<1x128xf32>
    %30 = vector.broadcast %29 : vector<1x128xf32> to vector<144x128xf32>
    %c0_15 = arith.constant 0 : index
    %c0_16 = arith.constant 0 : index
    %31 = vector.load %arg10[%c0_15, %c0_16] : memref<144x128xf32, #tpu.memory_space<vmem>>, vector<144x128xf32>
    tpu.vector_store %arg10[%c0_15, %c0_16], %30 {strides = array<i32>} : memref<144x128xf32, #tpu.memory_space<vmem>>, vector<144x128xf32>,
    %c0_17 = arith.constant 0 : index
    %c0_18 = arith.constant 0 : index
    %32 = vector.load %arg10[%c0_17, %c0_18] : memref<144x128xf32, #tpu.memory_space<vmem>>, vector<144x128xf32>
    %33 = arith.index_cast %9 : i32 to index
    %c0_19 = arith.constant 0 : index
    %c0_20 = arith.constant 0 : index
    %34 = vector.load %arg8[%33, %c0_19, %c0_20] : memref<2x200x128xbf16, #tpu.memory_space<vmem>>, vector<1x144x128xbf16>
    %35 = vector.shape_cast %34 : vector<1x144x128xbf16> to vector<144x128xbf16>
    %c0_21 = arith.constant 0 : index
    %c0_22 = arith.constant 0 : index
    %c0_23 = arith.constant 0 : index
    %36 = vector.load %arg3[%c0_21, %c0_22, %c0_23] : memref<9x128x128xbf16, #tpu.memory_space<vmem>>, vector<1x128x128xbf16>
    %37 = vector.shape_cast %36 : vector<1x128x128xbf16> to vector<128x128xbf16>
    %cst_24 = arith.constant dense<0.000000e+00> : vector<144x128xf32>
    %38 = tpu.matmul %35, %37, %cst_24 {dimension_numbers = #tpu.dot_dimension_numbers<[1], [0], [0], [1], [0, 0, 1, 1], [], []>} : vector<144x128xbf16>, vector<128x128xbf16>, vector<144x128xf32> -> vector<144x128xf32>
    %39 = arith.addf %32, %38 : vector<144x128xf32>
    %c0_25 = arith.constant 0 : index
    %c0_26 = arith.constant 0 : index
    %40 = vector.load %arg10[%c0_25, %c0_26] : memref<144x128xf32, #tpu.memory_space<vmem>>, vector<144x128xf32>
    tpu.vector_store %arg10[%c0_25, %c0_26], %39 {strides = array<i32>} : memref<144x128xf32, #tpu.memory_space<vmem>>, vector<144x128xf32>,
    %c0_27 = arith.constant 0 : index
    %c0_28 = arith.constant 0 : index
    %41 = vector.load %arg10[%c0_27, %c0_28] : memref<144x128xf32, #tpu.memory_space<vmem>>, vector<144x128xf32>
    %42 = arith.index_cast %9 : i32 to index
    %c1 = arith.constant 1 : index
    %c0_29 = arith.constant 0 : index
    %43 = vector.load %arg8[%42, %c1, %c0_29] : memref<2x200x128xbf16, #tpu.memory_space<vmem>>, vector<1x144x128xbf16>
    %44 = vector.shape_cast %43 : vector<1x144x128xbf16> to vector<144x128xbf16>
    %c1_30 = arith.constant 1 : index
    %c0_31 = arith.constant 0 : index
    %c0_32 = arith.constant 0 : index
    %45 = vector.load %arg3[%c1_30, %c0_31, %c0_32] : memref<9x128x128xbf16, #tpu.memory_space<vmem>>, vector<1x128x128xbf16>
    %46 = vector.shape_cast %45 : vector<1x128x128xbf16> to vector<128x128xbf16>
    %cst_33 = arith.constant dense<0.000000e+00> : vector<144x128xf32>
    %47 = tpu.matmul %44, %46, %cst_33 {dimension_numbers = #tpu.dot_dimension_numbers<[1], [0], [0], [1], [0, 0, 1, 1], [], []>} : vector<144x128xbf16>, vector<128x128xbf16>, vector<144x128xf32> -> vector<144x128xf32>
    %48 = arith.addf %41, %47 : vector<144x128xf32>
    %c0_34 = arith.constant 0 : index
    %c0_35 = arith.constant 0 : index
    %49 = vector.load %arg10[%c0_34, %c0_35] : memref<144x128xf32, #tpu.memory_space<vmem>>, vector<144x128xf32>
    tpu.vector_store %arg10[%c0_34, %c0_35], %48 {strides = array<i32>} : memref<144x128xf32, #tpu.memory_space<vmem>>, vector<144x128xf32>,
    %c0_36 = arith.constant 0 : index
    %c0_37 = arith.constant 0 : index
    %50 = vector.load %arg10[%c0_36, %c0_37] : memref<144x128xf32, #tpu.memory_space<vmem>>, vector<144x128xf32>
    %51 = arith.index_cast %9 : i32 to index
    %c2 = arith.constant 2 : index
    %c0_38 = arith.constant 0 : index
    %52 = vector.load %arg8[%51, %c2, %c0_38] : memref<2x200x128xbf16, #tpu.memory_space<vmem>>, vector<1x144x128xbf16>
    %53 = vector.shape_cast %52 : vector<1x144x128xbf16> to vector<144x128xbf16>
    %c2_39 = arith.constant 2 : index
    %c0_40 = arith.constant 0 : index
    %c0_41 = arith.constant 0 : index
    %54 = vector.load %arg3[%c2_39, %c0_40, %c0_41] : memref<9x128x128xbf16, #tpu.memory_space<vmem>>, vector<1x128x128xbf16>
    %55 = vector.shape_cast %54 : vector<1x128x128xbf16> to vector<128x128xbf16>
    %cst_42 = arith.constant dense<0.000000e+00> : vector<144x128xf32>
    %56 = tpu.matmul %53, %55, %cst_42 {dimension_numbers = #tpu.dot_dimension_numbers<[1], [0], [0], [1], [0, 0, 1, 1], [], []>} : vector<144x128xbf16>, vector<128x128xbf16>, vector<144x128xf32> -> vector<144x128xf32>
    %57 = arith.addf %50, %56 : vector<144x128xf32>
    %c0_43 = arith.constant 0 : index
    %c0_44 = arith.constant 0 : index
    %58 = vector.load %arg10[%c0_43, %c0_44] : memref<144x128xf32, #tpu.memory_space<vmem>>, vector<144x128xf32>
    tpu.vector_store %arg10[%c0_43, %c0_44], %57 {strides = array<i32>} : memref<144x128xf32, #tpu.memory_space<vmem>>, vector<144x128xf32>,
    %c0_45 = arith.constant 0 : index
    %c0_46 = arith.constant 0 : index
    %59 = vector.load %arg10[%c0_45, %c0_46] : memref<144x128xf32, #tpu.memory_space<vmem>>, vector<144x128xf32>
    %60 = arith.index_cast %9 : i32 to index
    %c24 = arith.constant 24 : index
    %c0_47 = arith.constant 0 : index
    %61 = vector.load %arg8[%60, %c24, %c0_47] : memref<2x200x128xbf16, #tpu.memory_space<vmem>>, vector<1x144x128xbf16>
    %62 = vector.shape_cast %61 : vector<1x144x128xbf16> to vector<144x128xbf16>
    %c3 = arith.constant 3 : index
    %c0_48 = arith.constant 0 : index
    %c0_49 = arith.constant 0 : index
    %63 = vector.load %arg3[%c3, %c0_48, %c0_49] : memref<9x128x128xbf16, #tpu.memory_space<vmem>>, vector<1x128x128xbf16>
    %64 = vector.shape_cast %63 : vector<1x128x128xbf16> to vector<128x128xbf16>
    %cst_50 = arith.constant dense<0.000000e+00> : vector<144x128xf32>
    %65 = tpu.matmul %62, %64, %cst_50 {dimension_numbers = #tpu.dot_dimension_numbers<[1], [0], [0], [1], [0, 0, 1, 1], [], []>} : vector<144x128xbf16>, vector<128x128xbf16>, vector<144x128xf32> -> vector<144x128xf32>
    %66 = arith.addf %59, %65 : vector<144x128xf32>
    %c0_51 = arith.constant 0 : index
    %c0_52 = arith.constant 0 : index
    %67 = vector.load %arg10[%c0_51, %c0_52] : memref<144x128xf32, #tpu.memory_space<vmem>>, vector<144x128xf32>
    tpu.vector_store %arg10[%c0_51, %c0_52], %66 {strides = array<i32>} : memref<144x128xf32, #tpu.memory_space<vmem>>, vector<144x128xf32>,
    %c0_53 = arith.constant 0 : index
    %c0_54 = arith.constant 0 : index
    %68 = vector.load %arg10[%c0_53, %c0_54] : memref<144x128xf32, #tpu.memory_space<vmem>>, vector<144x128xf32>
    %69 = arith.index_cast %9 : i32 to index
    %c25 = arith.constant 25 : index
    %c0_55 = arith.constant 0 : index
    %70 = vector.load %arg8[%69, %c25, %c0_55] : memref<2x200x128xbf16, #tpu.memory_space<vmem>>, vector<1x144x128xbf16>
    %71 = vector.shape_cast %70 : vector<1x144x128xbf16> to vector<144x128xbf16>
    %c4 = arith.constant 4 : index
    %c0_56 = arith.constant 0 : index
    %c0_57 = arith.constant 0 : index
    %72 = vector.load %arg3[%c4, %c0_56, %c0_57] : memref<9x128x128xbf16, #tpu.memory_space<vmem>>, vector<1x128x128xbf16>
    %73 = vector.shape_cast %72 : vector<1x128x128xbf16> to vector<128x128xbf16>
    %cst_58 = arith.constant dense<0.000000e+00> : vector<144x128xf32>
    %74 = tpu.matmul %71, %73, %cst_58 {dimension_numbers = #tpu.dot_dimension_numbers<[1], [0], [0], [1], [0, 0, 1, 1], [], []>} : vector<144x128xbf16>, vector<128x128xbf16>, vector<144x128xf32> -> vector<144x128xf32>
    %75 = arith.addf %68, %74 : vector<144x128xf32>
    %c0_59 = arith.constant 0 : index
    %c0_60 = arith.constant 0 : index
    %76 = vector.load %arg10[%c0_59, %c0_60] : memref<144x128xf32, #tpu.memory_space<vmem>>, vector<144x128xf32>
    tpu.vector_store %arg10[%c0_59, %c0_60], %75 {strides = array<i32>} : memref<144x128xf32, #tpu.memory_space<vmem>>, vector<144x128xf32>,
    %c0_61 = arith.constant 0 : index
    %c0_62 = arith.constant 0 : index
    %77 = vector.load %arg10[%c0_61, %c0_62] : memref<144x128xf32, #tpu.memory_space<vmem>>, vector<144x128xf32>
    %78 = arith.index_cast %9 : i32 to index
    %c26 = arith.constant 26 : index
    %c0_63 = arith.constant 0 : index
    %79 = vector.load %arg8[%78, %c26, %c0_63] : memref<2x200x128xbf16, #tpu.memory_space<vmem>>, vector<1x144x128xbf16>
    %80 = vector.shape_cast %79 : vector<1x144x128xbf16> to vector<144x128xbf16>
    %c5 = arith.constant 5 : index
    %c0_64 = arith.constant 0 : index
    %c0_65 = arith.constant 0 : index
    %81 = vector.load %arg3[%c5, %c0_64, %c0_65] : memref<9x128x128xbf16, #tpu.memory_space<vmem>>, vector<1x128x128xbf16>
    %82 = vector.shape_cast %81 : vector<1x128x128xbf16> to vector<128x128xbf16>
    %cst_66 = arith.constant dense<0.000000e+00> : vector<144x128xf32>
    %83 = tpu.matmul %80, %82, %cst_66 {dimension_numbers = #tpu.dot_dimension_numbers<[1], [0], [0], [1], [0, 0, 1, 1], [], []>} : vector<144x128xbf16>, vector<128x128xbf16>, vector<144x128xf32> -> vector<144x128xf32>
    %84 = arith.addf %77, %83 : vector<144x128xf32>
    %c0_67 = arith.constant 0 : index
    %c0_68 = arith.constant 0 : index
    %85 = vector.load %arg10[%c0_67, %c0_68] : memref<144x128xf32, #tpu.memory_space<vmem>>, vector<144x128xf32>
    tpu.vector_store %arg10[%c0_67, %c0_68], %84 {strides = array<i32>} : memref<144x128xf32, #tpu.memory_space<vmem>>, vector<144x128xf32>,
    %c0_69 = arith.constant 0 : index
    %c0_70 = arith.constant 0 : index
    %86 = vector.load %arg10[%c0_69, %c0_70] : memref<144x128xf32, #tpu.memory_space<vmem>>, vector<144x128xf32>
    %87 = arith.index_cast %9 : i32 to index
    %c48 = arith.constant 48 : index
    %c0_71 = arith.constant 0 : index
    %88 = vector.load %arg8[%87, %c48, %c0_71] : memref<2x200x128xbf16, #tpu.memory_space<vmem>>, vector<1x144x128xbf16>
    %89 = vector.shape_cast %88 : vector<1x144x128xbf16> to vector<144x128xbf16>
    %c6 = arith.constant 6 : index
    %c0_72 = arith.constant 0 : index
    %c0_73 = arith.constant 0 : index
    %90 = vector.load %arg3[%c6, %c0_72, %c0_73] : memref<9x128x128xbf16, #tpu.memory_space<vmem>>, vector<1x128x128xbf16>
    %91 = vector.shape_cast %90 : vector<1x128x128xbf16> to vector<128x128xbf16>
    %cst_74 = arith.constant dense<0.000000e+00> : vector<144x128xf32>
    %92 = tpu.matmul %89, %91, %cst_74 {dimension_numbers = #tpu.dot_dimension_numbers<[1], [0], [0], [1], [0, 0, 1, 1], [], []>} : vector<144x128xbf16>, vector<128x128xbf16>, vector<144x128xf32> -> vector<144x128xf32>
    %93 = arith.addf %86, %92 : vector<144x128xf32>
    %c0_75 = arith.constant 0 : index
    %c0_76 = arith.constant 0 : index
    %94 = vector.load %arg10[%c0_75, %c0_76] : memref<144x128xf32, #tpu.memory_space<vmem>>, vector<144x128xf32>
    tpu.vector_store %arg10[%c0_75, %c0_76], %93 {strides = array<i32>} : memref<144x128xf32, #tpu.memory_space<vmem>>, vector<144x128xf32>,
    %c0_77 = arith.constant 0 : index
    %c0_78 = arith.constant 0 : index
    %95 = vector.load %arg10[%c0_77, %c0_78] : memref<144x128xf32, #tpu.memory_space<vmem>>, vector<144x128xf32>
    %96 = arith.index_cast %9 : i32 to index
    %c49 = arith.constant 49 : index
    %c0_79 = arith.constant 0 : index
    %97 = vector.load %arg8[%96, %c49, %c0_79] : memref<2x200x128xbf16, #tpu.memory_space<vmem>>, vector<1x144x128xbf16>
    %98 = vector.shape_cast %97 : vector<1x144x128xbf16> to vector<144x128xbf16>
    %c7 = arith.constant 7 : index
    %c0_80 = arith.constant 0 : index
    %c0_81 = arith.constant 0 : index
    %99 = vector.load %arg3[%c7, %c0_80, %c0_81] : memref<9x128x128xbf16, #tpu.memory_space<vmem>>, vector<1x128x128xbf16>
    %100 = vector.shape_cast %99 : vector<1x128x128xbf16> to vector<128x128xbf16>
    %cst_82 = arith.constant dense<0.000000e+00> : vector<144x128xf32>
    %101 = tpu.matmul %98, %100, %cst_82 {dimension_numbers = #tpu.dot_dimension_numbers<[1], [0], [0], [1], [0, 0, 1, 1], [], []>} : vector<144x128xbf16>, vector<128x128xbf16>, vector<144x128xf32> -> vector<144x128xf32>
    %102 = arith.addf %95, %101 : vector<144x128xf32>
    %c0_83 = arith.constant 0 : index
    %c0_84 = arith.constant 0 : index
    %103 = vector.load %arg10[%c0_83, %c0_84] : memref<144x128xf32, #tpu.memory_space<vmem>>, vector<144x128xf32>
    tpu.vector_store %arg10[%c0_83, %c0_84], %102 {strides = array<i32>} : memref<144x128xf32, #tpu.memory_space<vmem>>, vector<144x128xf32>,
    %c0_85 = arith.constant 0 : index
    %c0_86 = arith.constant 0 : index
    %104 = vector.load %arg10[%c0_85, %c0_86] : memref<144x128xf32, #tpu.memory_space<vmem>>, vector<144x128xf32>
    %105 = arith.index_cast %9 : i32 to index
    %c50 = arith.constant 50 : index
    %c0_87 = arith.constant 0 : index
    %106 = vector.load %arg8[%105, %c50, %c0_87] : memref<2x200x128xbf16, #tpu.memory_space<vmem>>, vector<1x144x128xbf16>
    %107 = vector.shape_cast %106 : vector<1x144x128xbf16> to vector<144x128xbf16>
    %c8 = arith.constant 8 : index
    %c0_88 = arith.constant 0 : index
    %c0_89 = arith.constant 0 : index
    %108 = vector.load %arg3[%c8, %c0_88, %c0_89] : memref<9x128x128xbf16, #tpu.memory_space<vmem>>, vector<1x128x128xbf16>
    %109 = vector.shape_cast %108 : vector<1x128x128xbf16> to vector<128x128xbf16>
    %cst_90 = arith.constant dense<0.000000e+00> : vector<144x128xf32>
    %110 = tpu.matmul %107, %109, %cst_90 {dimension_numbers = #tpu.dot_dimension_numbers<[1], [0], [0], [1], [0, 0, 1, 1], [], []>} : vector<144x128xbf16>, vector<128x128xbf16>, vector<144x128xf32> -> vector<144x128xf32>
    %111 = arith.addf %104, %110 : vector<144x128xf32>
    %c0_91 = arith.constant 0 : index
    %c0_92 = arith.constant 0 : index
    %112 = vector.load %arg10[%c0_91, %c0_92] : memref<144x128xf32, #tpu.memory_space<vmem>>, vector<144x128xf32>
    tpu.vector_store %arg10[%c0_91, %c0_92], %111 {strides = array<i32>} : memref<144x128xf32, #tpu.memory_space<vmem>>, vector<144x128xf32>,
    %113 = tpu.iota {dimensions = array<i32: 0>} : vector<144x1xi32>
    %c24_i32 = arith.constant 24 : i32
    %c0_i32_93 = arith.constant 0 : i32
    %114 = arith.cmpi eq, %c24_i32, %c0_i32_93 : i32
    %c1_i32_94 = arith.constant 1 : i32
    %115 = arith.select %114, %c1_i32_94, %c24_i32 : i32
    %116 = vector.broadcast %115 : i32 to vector<144x1xi32>
    %117 = arith.remsi %113, %116 : vector<144x1xi32>
    %c0_i32_95 = arith.constant 0 : i32
    %118 = vector.broadcast %c0_i32_95 : i32 to vector<144x1xi32>
    %119 = arith.cmpi ne, %117, %118 : vector<144x1xi32>
    %c0_i32_96 = arith.constant 0 : i32
    %120 = vector.broadcast %c0_i32_96 : i32 to vector<144x1xi32>
    %121 = arith.cmpi slt, %117, %120 : vector<144x1xi32>
    %c0_i32_97 = arith.constant 0 : i32
    %122 = arith.cmpi slt, %115, %c0_i32_97 : i32
    %123 = vector.broadcast %122 : i1 to vector<144x1xi1>
    %124 = vector.broadcast %123 : vector<144x1xi1> to vector<144x1xi1>
    %125 = arith.xori %121, %124 : vector<144x1xi1>
    %126 = arith.andi %125, %119 : vector<144x1xi1>
    %127 = vector.broadcast %115 : i32 to vector<144x1xi32>
    %128 = arith.addi %117, %127 : vector<144x1xi32>
    %129 = arith.select %126, %128, %117 : vector<144x1xi1>, vector<144x1xi32>
    %c16_i32 = arith.constant 16 : i32
    %130 = vector.broadcast %c16_i32 : i32 to vector<144x1xi32>
    %131 = arith.cmpi slt, %129, %130 : vector<144x1xi32>
    %132 = arith.extui %131 : vector<144x1xi1> to vector<144x1xi32>
    %133 = arith.sitofp %132 : vector<144x1xi32> to vector<144x1xf32>
    %c0_98 = arith.constant 0 : index
    %c0_99 = arith.constant 0 : index
    %134 = vector.load %arg10[%c0_98, %c0_99] : memref<144x128xf32, #tpu.memory_space<vmem>>, vector<144x128xf32>
    %cst_100 = arith.constant 0.000000e+00 : f32
    %135 = vector.broadcast %cst_100 : f32 to vector<144x128xf32>
    %136 = arith.maximumf %134, %135 : vector<144x128xf32>
    %137 = vector.broadcast %133 : vector<144x1xf32> to vector<144x128xf32>
    %138 = arith.mulf %136, %137 : vector<144x128xf32>
    %139 = arith.truncf %138 : vector<144x128xf32> to vector<144x128xbf16>
    %c8_101 = arith.constant 8 : index
    %c0_102 = arith.constant 0 : index
    %140 = vector.load %arg9[%c8_101, %c0_102] : memref<160x128xbf16, #tpu.memory_space<vmem>>, vector<144x128xbf16>
    tpu.vector_store %arg9[%c8_101, %c0_102], %139 {strides = array<i32>} : memref<160x128xbf16, #tpu.memory_space<vmem>>, vector<144x128xbf16>,
    %c0_i32_103 = arith.constant 0 : i32
    %141 = arith.cmpi eq, %arg1, %c0_i32_103 : i32
    %142 = arith.extui %141 : i1 to i32
    %c0_i32_104 = arith.constant 0 : i32
    %143 = arith.cmpi ne, %142, %c0_i32_104 : i32
    scf.if %143 {
      %cst_199 = arith.constant 0.000000e+00 : bf16
      %221 = vector.broadcast %cst_199 : bf16 to vector<24x128xbf16>
      %c8_200 = arith.constant 8 : index
      %c0_201 = arith.constant 0 : index
      %222 = vector.load %arg9[%c8_200, %c0_201] : memref<160x128xbf16, #tpu.memory_space<vmem>>, vector<24x128xbf16>
      tpu.vector_store %arg9[%c8_200, %c0_201], %221 {strides = array<i32>} : memref<160x128xbf16, #tpu.memory_space<vmem>>, vector<24x128xbf16>,
    } else {
    }
    %c3_i32 = arith.constant 3 : i32
    %144 = arith.cmpi eq, %arg1, %c3_i32 : i32
    %145 = arith.extui %144 : i1 to i32
    %c0_i32_105 = arith.constant 0 : i32
    %146 = arith.cmpi ne, %145, %c0_i32_105 : i32
    scf.if %146 {
      %cst_199 = arith.constant 0.000000e+00 : bf16
      %221 = vector.broadcast %cst_199 : bf16 to vector<24x128xbf16>
      %c128 = arith.constant 128 : index
      %c0_200 = arith.constant 0 : index
      %222 = vector.load %arg9[%c128, %c0_200] : memref<160x128xbf16, #tpu.memory_space<vmem>>, vector<24x128xbf16>
      tpu.vector_store %arg9[%c128, %c0_200], %221 {strides = array<i32>} : memref<160x128xbf16, #tpu.memory_space<vmem>>, vector<24x128xbf16>,
    } else {
    }
    %147 = arith.index_cast %9 : i32 to index
    %c49_106 = arith.constant 49 : index
    %c0_107 = arith.constant 0 : index
    %148 = vector.load %arg8[%147, %c49_106, %c0_107] : memref<2x200x128xbf16, #tpu.memory_space<vmem>>, vector<1x96x128xbf16>
    %149 = vector.shape_cast %148 : vector<1x96x128xbf16> to vector<96x128xbf16>
    %150 = arith.extf %149 : vector<96x128xbf16> to vector<96x128xf32>
    %c0_108 = arith.constant 0 : index
    %c0_109 = arith.constant 0 : index
    %151 = vector.load %arg6[%c0_108, %c0_109] : memref<1x128xf32, #tpu.memory_space<vmem>>, vector<1x128xf32>
    %152 = vector.shape_cast %151 : vector<1x128xf32> to vector<1x128xf32>
    %153 = vector.broadcast %152 : vector<1x128xf32> to vector<96x128xf32>
    %154 = arith.addf %153, %150 : vector<96x128xf32>
    %c0_110 = arith.constant 0 : index
    %c0_111 = arith.constant 0 : index
    %155 = vector.load %arg10[%c0_110, %c0_111] : memref<144x128xf32, #tpu.memory_space<vmem>>, vector<96x128xf32>
    tpu.vector_store %arg10[%c0_110, %c0_111], %154 {strides = array<i32>} : memref<144x128xf32, #tpu.memory_space<vmem>>, vector<96x128xf32>,
    %c0_112 = arith.constant 0 : index
    %c0_113 = arith.constant 0 : index
    %156 = vector.load %arg10[%c0_112, %c0_113] : memref<144x128xf32, #tpu.memory_space<vmem>>, vector<96x128xf32>
    %c7_114 = arith.constant 7 : index
    %c0_115 = arith.constant 0 : index
    %157 = vector.load %arg9[%c7_114, %c0_115] : memref<160x128xbf16, #tpu.memory_space<vmem>>, vector<96x128xbf16>
    %c0_116 = arith.constant 0 : index
    %c0_117 = arith.constant 0 : index
    %c0_118 = arith.constant 0 : index
    %158 = vector.load %arg5[%c0_116, %c0_117, %c0_118] : memref<9x128x128xbf16, #tpu.memory_space<vmem>>, vector<1x128x128xbf16>
    %159 = vector.shape_cast %158 : vector<1x128x128xbf16> to vector<128x128xbf16>
    %cst_119 = arith.constant dense<0.000000e+00> : vector<96x128xf32>
    %160 = tpu.matmul %157, %159, %cst_119 {dimension_numbers = #tpu.dot_dimension_numbers<[1], [0], [0], [1], [0, 0, 1, 1], [], []>} : vector<96x128xbf16>, vector<128x128xbf16>, vector<96x128xf32> -> vector<96x128xf32>
    %161 = arith.addf %156, %160 : vector<96x128xf32>
    %c0_120 = arith.constant 0 : index
    %c0_121 = arith.constant 0 : index
    %162 = vector.load %arg10[%c0_120, %c0_121] : memref<144x128xf32, #tpu.memory_space<vmem>>, vector<96x128xf32>
    tpu.vector_store %arg10[%c0_120, %c0_121], %161 {strides = array<i32>} : memref<144x128xf32, #tpu.memory_space<vmem>>, vector<96x128xf32>,
    %c0_122 = arith.constant 0 : index
    %c0_123 = arith.constant 0 : index
    %163 = vector.load %arg10[%c0_122, %c0_123] : memref<144x128xf32, #tpu.memory_space<vmem>>, vector<96x128xf32>
    %c8_124 = arith.constant 8 : index
    %c0_125 = arith.constant 0 : index
    %164 = vector.load %arg9[%c8_124, %c0_125] : memref<160x128xbf16, #tpu.memory_space<vmem>>, vector<96x128xbf16>
    %c1_126 = arith.constant 1 : index
    %c0_127 = arith.constant 0 : index
    %c0_128 = arith.constant 0 : index
    %165 = vector.load %arg5[%c1_126, %c0_127, %c0_128] : memref<9x128x128xbf16, #tpu.memory_space<vmem>>, vector<1x128x128xbf16>
    %166 = vector.shape_cast %165 : vector<1x128x128xbf16> to vector<128x128xbf16>
    %cst_129 = arith.constant dense<0.000000e+00> : vector<96x128xf32>
    %167 = tpu.matmul %164, %166, %cst_129 {dimension_numbers = #tpu.dot_dimension_numbers<[1], [0], [0], [1], [0, 0, 1, 1], [], []>} : vector<96x128xbf16>, vector<128x128xbf16>, vector<96x128xf32> -> vector<96x128xf32>
    %168 = arith.addf %163, %167 : vector<96x128xf32>
    %c0_130 = arith.constant 0 : index
    %c0_131 = arith.constant 0 : index
    %169 = vector.load %arg10[%c0_130, %c0_131] : memref<144x128xf32, #tpu.memory_space<vmem>>, vector<96x128xf32>
    tpu.vector_store %arg10[%c0_130, %c0_131], %168 {strides = array<i32>} : memref<144x128xf32, #tpu.memory_space<vmem>>, vector<96x128xf32>,
    %c0_132 = arith.constant 0 : index
    %c0_133 = arith.constant 0 : index
    %170 = vector.load %arg10[%c0_132, %c0_133] : memref<144x128xf32, #tpu.memory_space<vmem>>, vector<96x128xf32>
    %c9 = arith.constant 9 : index
    %c0_134 = arith.constant 0 : index
    %171 = vector.load %arg9[%c9, %c0_134] : memref<160x128xbf16, #tpu.memory_space<vmem>>, vector<96x128xbf16>
    %c2_135 = arith.constant 2 : index
    %c0_136 = arith.constant 0 : index
    %c0_137 = arith.constant 0 : index
    %172 = vector.load %arg5[%c2_135, %c0_136, %c0_137] : memref<9x128x128xbf16, #tpu.memory_space<vmem>>, vector<1x128x128xbf16>
    %173 = vector.shape_cast %172 : vector<1x128x128xbf16> to vector<128x128xbf16>
    %cst_138 = arith.constant dense<0.000000e+00> : vector<96x128xf32>
    %174 = tpu.matmul %171, %173, %cst_138 {dimension_numbers = #tpu.dot_dimension_numbers<[1], [0], [0], [1], [0, 0, 1, 1], [], []>} : vector<96x128xbf16>, vector<128x128xbf16>, vector<96x128xf32> -> vector<96x128xf32>
    %175 = arith.addf %170, %174 : vector<96x128xf32>
    %c0_139 = arith.constant 0 : index
    %c0_140 = arith.constant 0 : index
    %176 = vector.load %arg10[%c0_139, %c0_140] : memref<144x128xf32, #tpu.memory_space<vmem>>, vector<96x128xf32>
    tpu.vector_store %arg10[%c0_139, %c0_140], %175 {strides = array<i32>} : memref<144x128xf32, #tpu.memory_space<vmem>>, vector<96x128xf32>,
    %c0_141 = arith.constant 0 : index
    %c0_142 = arith.constant 0 : index
    %177 = vector.load %arg10[%c0_141, %c0_142] : memref<144x128xf32, #tpu.memory_space<vmem>>, vector<96x128xf32>
    %c31 = arith.constant 31 : index
    %c0_143 = arith.constant 0 : index
    %178 = vector.load %arg9[%c31, %c0_143] : memref<160x128xbf16, #tpu.memory_space<vmem>>, vector<96x128xbf16>
    %c3_144 = arith.constant 3 : index
    %c0_145 = arith.constant 0 : index
    %c0_146 = arith.constant 0 : index
    %179 = vector.load %arg5[%c3_144, %c0_145, %c0_146] : memref<9x128x128xbf16, #tpu.memory_space<vmem>>, vector<1x128x128xbf16>
    %180 = vector.shape_cast %179 : vector<1x128x128xbf16> to vector<128x128xbf16>
    %cst_147 = arith.constant dense<0.000000e+00> : vector<96x128xf32>
    %181 = tpu.matmul %178, %180, %cst_147 {dimension_numbers = #tpu.dot_dimension_numbers<[1], [0], [0], [1], [0, 0, 1, 1], [], []>} : vector<96x128xbf16>, vector<128x128xbf16>, vector<96x128xf32> -> vector<96x128xf32>
    %182 = arith.addf %177, %181 : vector<96x128xf32>
    %c0_148 = arith.constant 0 : index
    %c0_149 = arith.constant 0 : index
    %183 = vector.load %arg10[%c0_148, %c0_149] : memref<144x128xf32, #tpu.memory_space<vmem>>, vector<96x128xf32>
    tpu.vector_store %arg10[%c0_148, %c0_149], %182 {strides = array<i32>} : memref<144x128xf32, #tpu.memory_space<vmem>>, vector<96x128xf32>,
    %c0_150 = arith.constant 0 : index
    %c0_151 = arith.constant 0 : index
    %184 = vector.load %arg10[%c0_150, %c0_151] : memref<144x128xf32, #tpu.memory_space<vmem>>, vector<96x128xf32>
    %c32 = arith.constant 32 : index
    %c0_152 = arith.constant 0 : index
    %185 = vector.load %arg9[%c32, %c0_152] : memref<160x128xbf16, #tpu.memory_space<vmem>>, vector<96x128xbf16>
    %c4_153 = arith.constant 4 : index
    %c0_154 = arith.constant 0 : index
    %c0_155 = arith.constant 0 : index
    %186 = vector.load %arg5[%c4_153, %c0_154, %c0_155] : memref<9x128x128xbf16, #tpu.memory_space<vmem>>, vector<1x128x128xbf16>
    %187 = vector.shape_cast %186 : vector<1x128x128xbf16> to vector<128x128xbf16>
    %cst_156 = arith.constant dense<0.000000e+00> : vector<96x128xf32>
    %188 = tpu.matmul %185, %187, %cst_156 {dimension_numbers = #tpu.dot_dimension_numbers<[1], [0], [0], [1], [0, 0, 1, 1], [], []>} : vector<96x128xbf16>, vector<128x128xbf16>, vector<96x128xf32> -> vector<96x128xf32>
    %189 = arith.addf %184, %188 : vector<96x128xf32>
    %c0_157 = arith.constant 0 : index
    %c0_158 = arith.constant 0 : index
    %190 = vector.load %arg10[%c0_157, %c0_158] : memref<144x128xf32, #tpu.memory_space<vmem>>, vector<96x128xf32>
    tpu.vector_store %arg10[%c0_157, %c0_158], %189 {strides = array<i32>} : memref<144x128xf32, #tpu.memory_space<vmem>>, vector<96x128xf32>,
    %c0_159 = arith.constant 0 : index
    %c0_160 = arith.constant 0 : index
    %191 = vector.load %arg10[%c0_159, %c0_160] : memref<144x128xf32, #tpu.memory_space<vmem>>, vector<96x128xf32>
    %c33 = arith.constant 33 : index
    %c0_161 = arith.constant 0 : index
    %192 = vector.load %arg9[%c33, %c0_161] : memref<160x128xbf16, #tpu.memory_space<vmem>>, vector<96x128xbf16>
    %c5_162 = arith.constant 5 : index
    %c0_163 = arith.constant 0 : index
    %c0_164 = arith.constant 0 : index
    %193 = vector.load %arg5[%c5_162, %c0_163, %c0_164] : memref<9x128x128xbf16, #tpu.memory_space<vmem>>, vector<1x128x128xbf16>
    %194 = vector.shape_cast %193 : vector<1x128x128xbf16> to vector<128x128xbf16>
    %cst_165 = arith.constant dense<0.000000e+00> : vector<96x128xf32>
    %195 = tpu.matmul %192, %194, %cst_165 {dimension_numbers = #tpu.dot_dimension_numbers<[1], [0], [0], [1], [0, 0, 1, 1], [], []>} : vector<96x128xbf16>, vector<128x128xbf16>, vector<96x128xf32> -> vector<96x128xf32>
    %196 = arith.addf %191, %195 : vector<96x128xf32>
    %c0_166 = arith.constant 0 : index
    %c0_167 = arith.constant 0 : index
    %197 = vector.load %arg10[%c0_166, %c0_167] : memref<144x128xf32, #tpu.memory_space<vmem>>, vector<96x128xf32>
    tpu.vector_store %arg10[%c0_166, %c0_167], %196 {strides = array<i32>} : memref<144x128xf32, #tpu.memory_space<vmem>>, vector<96x128xf32>,
    %c0_168 = arith.constant 0 : index
    %c0_169 = arith.constant 0 : index
    %198 = vector.load %arg10[%c0_168, %c0_169] : memref<144x128xf32, #tpu.memory_space<vmem>>, vector<96x128xf32>
    %c55 = arith.constant 55 : index
    %c0_170 = arith.constant 0 : index
    %199 = vector.load %arg9[%c55, %c0_170] : memref<160x128xbf16, #tpu.memory_space<vmem>>, vector<96x128xbf16>
    %c6_171 = arith.constant 6 : index
    %c0_172 = arith.constant 0 : index
    %c0_173 = arith.constant 0 : index
    %200 = vector.load %arg5[%c6_171, %c0_172, %c0_173] : memref<9x128x128xbf16, #tpu.memory_space<vmem>>, vector<1x128x128xbf16>
    %201 = vector.shape_cast %200 : vector<1x128x128xbf16> to vector<128x128xbf16>
    %cst_174 = arith.constant dense<0.000000e+00> : vector<96x128xf32>
    %202 = tpu.matmul %199, %201, %cst_174 {dimension_numbers = #tpu.dot_dimension_numbers<[1], [0], [0], [1], [0, 0, 1, 1], [], []>} : vector<96x128xbf16>, vector<128x128xbf16>, vector<96x128xf32> -> vector<96x128xf32>
    %203 = arith.addf %198, %202 : vector<96x128xf32>
    %c0_175 = arith.constant 0 : index
    %c0_176 = arith.constant 0 : index
    %204 = vector.load %arg10[%c0_175, %c0_176] : memref<144x128xf32, #tpu.memory_space<vmem>>, vector<96x128xf32>
    tpu.vector_store %arg10[%c0_175, %c0_176], %203 {strides = array<i32>} : memref<144x128xf32, #tpu.memory_space<vmem>>, vector<96x128xf32>,
    %c0_177 = arith.constant 0 : index
    %c0_178 = arith.constant 0 : index
    %205 = vector.load %arg10[%c0_177, %c0_178] : memref<144x128xf32, #tpu.memory_space<vmem>>, vector<96x128xf32>
    %c56 = arith.constant 56 : index
    %c0_179 = arith.constant 0 : index
    %206 = vector.load %arg9[%c56, %c0_179] : memref<160x128xbf16, #tpu.memory_space<vmem>>, vector<96x128xbf16>
    %c7_180 = arith.constant 7 : index
    %c0_181 = arith.constant 0 : index
    %c0_182 = arith.constant 0 : index
    %207 = vector.load %arg5[%c7_180, %c0_181, %c0_182] : memref<9x128x128xbf16, #tpu.memory_space<vmem>>, vector<1x128x128xbf16>
    %208 = vector.shape_cast %207 : vector<1x128x128xbf16> to vector<128x128xbf16>
    %cst_183 = arith.constant dense<0.000000e+00> : vector<96x128xf32>
    %209 = tpu.matmul %206, %208, %cst_183 {dimension_numbers = #tpu.dot_dimension_numbers<[1], [0], [0], [1], [0, 0, 1, 1], [], []>} : vector<96x128xbf16>, vector<128x128xbf16>, vector<96x128xf32> -> vector<96x128xf32>
    %210 = arith.addf %205, %209 : vector<96x128xf32>
    %c0_184 = arith.constant 0 : index
    %c0_185 = arith.constant 0 : index
    %211 = vector.load %arg10[%c0_184, %c0_185] : memref<144x128xf32, #tpu.memory_space<vmem>>, vector<96x128xf32>
    tpu.vector_store %arg10[%c0_184, %c0_185], %210 {strides = array<i32>} : memref<144x128xf32, #tpu.memory_space<vmem>>, vector<96x128xf32>,
    %c0_186 = arith.constant 0 : index
    %c0_187 = arith.constant 0 : index
    %212 = vector.load %arg10[%c0_186, %c0_187] : memref<144x128xf32, #tpu.memory_space<vmem>>, vector<96x128xf32>
    %c57 = arith.constant 57 : index
    %c0_188 = arith.constant 0 : index
    %213 = vector.load %arg9[%c57, %c0_188] : memref<160x128xbf16, #tpu.memory_space<vmem>>, vector<96x128xbf16>
    %c8_189 = arith.constant 8 : index
    %c0_190 = arith.constant 0 : index
    %c0_191 = arith.constant 0 : index
    %214 = vector.load %arg5[%c8_189, %c0_190, %c0_191] : memref<9x128x128xbf16, #tpu.memory_space<vmem>>, vector<1x128x128xbf16>
    %215 = vector.shape_cast %214 : vector<1x128x128xbf16> to vector<128x128xbf16>
    %cst_192 = arith.constant dense<0.000000e+00> : vector<96x128xf32>
    %216 = tpu.matmul %213, %215, %cst_192 {dimension_numbers = #tpu.dot_dimension_numbers<[1], [0], [0], [1], [0, 0, 1, 1], [], []>} : vector<96x128xbf16>, vector<128x128xbf16>, vector<96x128xf32> -> vector<96x128xf32>
    %217 = arith.addf %212, %216 : vector<96x128xf32>
    %c0_193 = arith.constant 0 : index
    %c0_194 = arith.constant 0 : index
    %218 = vector.load %arg10[%c0_193, %c0_194] : memref<144x128xf32, #tpu.memory_space<vmem>>, vector<96x128xf32>
    tpu.vector_store %arg10[%c0_193, %c0_194], %217 {strides = array<i32>} : memref<144x128xf32, #tpu.memory_space<vmem>>, vector<96x128xf32>,
    %c0_195 = arith.constant 0 : index
    %c0_196 = arith.constant 0 : index
    %219 = vector.load %arg10[%c0_195, %c0_196] : memref<144x128xf32, #tpu.memory_space<vmem>>, vector<96x128xf32>
    %c0_197 = arith.constant 0 : index
    %c0_198 = arith.constant 0 : index
    %220 = vector.load %arg7[%c0_197, %c0_198] : memref<96x128xf32, #tpu.memory_space<vmem>>, vector<96x128xf32>
    tpu.vector_store %arg7[%c0_197, %c0_198], %219 {strides = array<i32>} : memref<96x128xf32, #tpu.memory_space<vmem>>, vector<96x128xf32>,
    return
  }
  func.func @transform_1(%arg0: i32, %arg1: i32) -> (i32, i32, i32) {
    %c0_i32 = arith.constant 0 : i32
    %c0_i32_0 = arith.constant 0 : i32
    %c0_i32_1 = arith.constant 0 : i32
    %c0_i32_2 = arith.constant 0 : i32
    return %c0_i32, %c0_i32_0, %c0_i32_1 : i32, i32, i32
  }
  func.func @transform_2(%arg0: i32, %arg1: i32) -> (i32, i32) {
    %c0_i32 = arith.constant 0 : i32
    %c0_i32_0 = arith.constant 0 : i32
    %c0_i32_1 = arith.constant 0 : i32
    return %c0_i32, %c0_i32_0 : i32, i32
  }
  func.func @transform_3(%arg0: i32, %arg1: i32) -> (i32, i32, i32) {
    %c0_i32 = arith.constant 0 : i32
    %c0_i32_0 = arith.constant 0 : i32
    %c0_i32_1 = arith.constant 0 : i32
    %c0_i32_2 = arith.constant 0 : i32
    return %c0_i32, %c0_i32_0, %c0_i32_1 : i32, i32, i32
  }
  func.func @transform_4(%arg0: i32, %arg1: i32) -> (i32, i32) {
    %c0_i32 = arith.constant 0 : i32
    %c0_i32_0 = arith.constant 0 : i32
    %c0_i32_1 = arith.constant 0 : i32
    return %c0_i32, %c0_i32_0 : i32, i32
  }
  func.func @transform_5(%arg0: i32, %arg1: i32) -> (i32, i32) {
    %c4_i32 = arith.constant 4 : i32
    %0 = arith.muli %arg0, %c4_i32 : i32
    %1 = arith.addi %0, %arg1 : i32
    %c0_i32 = arith.constant 0 : i32
    %c0_i32_0 = arith.constant 0 : i32
    return %1, %c0_i32 : i32, i32
  }
}

</mosaic_0001>

<bundles_post_ra>
// kernel: tpu_custom_call.1
= control target key start
LH: loop header
LB: loop body
LE: loop exit
PB: predicated region body
PF: predicated region fallthrough
CT: control target
= control target key end

     0   :  { %s10041_s0 = inlined_call_operand.hbm [shape: bf16[2,488,128], index: 0, kind: input, shape index: {}]   ;;  %s10042_s1 = inlined_call_operand.hbm [shape: bf16[9,128,128], index: 1, kind: input, shape index: {}]   ;;  %s10043_s2 = inlined_call_operand.vmem [shape: f32[1,128], index: 2, kind: input, shape index: {}]   ;;  %s10044_s3 = inlined_call_operand.hbm [shape: bf16[9,128,128], index: 3, kind: input, shape index: {}]   ;;  %s10045_s4 = inlined_call_operand.vmem [shape: f32[1,128], index: 4, kind: input, shape index: {}]   ;;  %s10046_s5 = inlined_call_operand.hbm [shape: f32[768,128], index: 5, kind: output, shape index: {}]  }
   0x1   :  { %10058 = sst [smem:[#allocation27_spill]] %s10042_s1 }
   0x2   :  { %10059 = sst [smem:[#allocation28_spill]] %s10044_s3 }
   0x3   :  { %10 = vsyncpa [#allocation7], 0 }
   0x4   :  { %11 = vsyncpa [#allocation10], 0 }
   0x5   :  { %12 = vsyncpa [#allocation8], 0 }
   0x6   :  { %14 = vsyncpa [#allocation8 + $0x1], 0  ;;  %s8599_s18 = smov 0   ;;  %s8601_s19 = smov 0  }
   0x7   :  { %s8603_s20 = smov 0   ;;  %s8605_s21 = smov 0  }
   0x8   :  { %s8607_s22 = smov 0   ;;  %s8609_s23 = smov 0  }
   0x9   :  { %s8611_s24 = smov 0   ;;  %s8613_s25 = smov 0  }
   0xa LB: > { %10060 = sst [smem:[#allocation22_spill]] %s8546_s23  ;;  %s6134_s26 = sadd.s32 4294967295, %s8554_s25   ;;  %s8554_s25 = sphi %s8613_s25, %s20_s25   ;;  %s8550_s24 = sphi %s8611_s24, %s10135_s24   ;;  %s8546_s23 = sphi %s8609_s23, %s10134_s23   ;;  %s8542_s22 = sphi %s8607_s22, %s10133_s22   ;;  %s8538_s21 = sphi %s8605_s21, %s10132_s21   ;;  %s8534_s20 = sphi %s8603_s20, %s10138_s20   ;;  %s8530_s19 = sphi %s8601_s19, %s10137_s19   ;;  %s8526_s18 = sphi %s8599_s18, %s10136_s18  }
   0xb   : > { %10061 = sst [smem:[#allocation23_spill]] %s8550_s24  ;;  %s6135_s27 = sadd.s32 4294967294, %s8554_s25  }
   0xc   : > { %s29_s28 = sadd.s32 1, %s8546_s23  ;;  %s32_s29 = sadd.s32 1, %s8550_s24 }
   0xd   : > { %p30_p0 = scmp.ge.s32.totalorder %s29_s28, 4  ;;  %s6136_s30 = sshll.u32 %s8550_s24, 2 }
   0xe   : > { %s121_s6 = sadd.s32 %s8546_s23, %s6136_s30  ;;  %s127_s7 = sadd.s32 1, %s8534_s20 }
   0xf   : > { %s10140_s28 = smov (%p30_p0, %s29_s28), 0  ;;  %s10142_s29 = smov (!%p30_p0, %s32_s29), %s8550_s24 }
  0x10   : > { %10062 = sst [smem:[#allocation24_spill]] %s10140_s28  ;;  %p137_p1 = scmp.ne.s32.totalorder %s8534_s20, %s8530_s19 }
  0x11   : > { %p138_p2 = scmp.eq.s32.totalorder %s6134_s26, 7  ;;  %p34_p3 = scmp.ge.s32.totalorder %s10142_s29, 2 }
  0x12   : > { %p143_p4 = scmp.ne.s32.totalorder %s8530_s19, %s8526_s18  ;;  %p144_p6 = scmp.eq.s32.totalorder %s6135_s27, 7 }
  0x13   : > { %p8653_p5 = por %p138_p2, %p137_p1  ;;  %s10144_s29 = smov (%p34_p3, %s10142_s29), 0 }
  0x14   : > { %10064 = sst [smem:[#allocation25_spill]] %s10144_s29  ;;  %p8659_p7 = por %p144_p6, %p143_p4 }
  0x15   : > { %s10063_s8 = scalar_select %p8653_p5, 1, 0 }
  0x16   : > { %s10065_s9 = scalar_select %p8659_p7, 1, 0 }
  0x17   : > { %p6138_p8 = scmp.ge.s32.totalorder %s8554_s25, 1  ;;  %s6137_s10 = sshll.u32 %s10144_s29, 2 }
  0x18   : > { %p151_p9 = scmp.lt.s32.totalorder %s8554_s25, 9  ;;  %s123_s11 = sadd.s32 %s6137_s10, %s10140_s28 }
  0x19   : > { %s124_s12 = ssub.s32 %s121_s6, %s123_s11  ;;  %p8671_p12 = scmp.eq.s32.totalorder %s6134_s26, 0 }
  0x1a   : > { %p8667_p10 = pnand %p6138_p8, %p151_p9  ;;  %p125_p11 = scmp.eq.s32.totalorder %s124_s12, 0 }
  0x1b   : > { %s10067_s14 = scalar_select %p8671_p12, 1, 0 }
  0x1c   : > { %s10066_s13 = scalar_select %p8667_p10, 1, 0 }
  0x1d   : > { %p8006_p13 = pneg %p8667_p10  ;;  %s8556_s16 = smov [#allocation6]  }
  0x1e   : > { %s8678_s15 = scalar_select %p125_p11, %s8534_s20, %s127_s7  }
  0x1f   : > { %s163_s17 = sshll.u32 %s8556_s16, 4  ;;  %p8682_p0 = pnand %p8671_p12, %p8006_p13  ;;  %s164_s17 = int_to_ptr.vmem [resolvable:$true] %s163_s17 }
  0x20   : > { %10068 = sst [smem:[#allocation26_spill]] %s8678_s15  ;;  %s10070_s1 = sld [smem:[#allocation27_spill]] }
  0x21   : > { %p8340_p2 = pneg %p8682_p0 }
  0x26   : > { %s8338_s6 = scalar_lea.hbm %s10070_s1, 9216 }
  0x27   : > { %p8339_p1 = scmp.ne.s32.totalorder %s10070_s1, %s8338_s6  ;;  %p8345_p6 = scmp.lt.u32.totalorder %s8338_s6, %s10070_s1 }
  0x29   : > { %p8341_p3 = pnand %p8340_p2, %p8339_p1 }
  0x2b   : > { %p8342_p4 = pneg %p8341_p3 }
  0x2d   : > { %p8347_p8 = pnand %p8345_p6, %p8342_p4 }
  0x2f   : > { %8350 = shalt.err (!%p8347_p8)
}
  0x30   : > { %s8351_s16 = scalar_lea.vmem %s164_s17, 9216  ;;  %p8359_p7 = scmp.lt.s32.totalorder %s164_s17, %s164_s17 }
  0x31   : > { %p8352_p9 = scmp.ne.s32.totalorder %s164_s17, %s8351_s16  ;;  %p8360_p5 = scmp.lt.s32.totalorder %s8351_s16, %s8351_s16 }
  0x33   : > { %p8354_p11 = pnand %p8352_p9, %p8340_p2  ;;  %p8361_p12 = por %p8360_p5, %p8359_p7 }
  0x35   : > { %p8355_p13 = pneg %p8354_p11 }
  0x37   : > { %p8362_p10 = pnand %p8361_p12, %p8355_p13 }
  0x39   : > { %8365 = shalt.err (!%p8362_p10)
}
  0x3a   : > { %s8557_s30 = smov 64   ;;  %s8558_s26 = smov 4  }
  0x3b   : > { %8009 = dma.hbm_to_vmem [thread:$0]  (!%p8682_p0), %s10070_s1, 9216, %s164_s17, [#allocation7], %s8557_s30, %s8557_s30, %s8558_s26  }
  0x3c   : > { %s8559_s11 = smov [#allocation9]   ;;  %s10071_s3 = sld [smem:[#allocation28_spill]] }
  0x3d   : > { %s179_s7 = sshll.u32 %s8559_s11, 4  ;;  %s180_s7 = int_to_ptr.vmem [resolvable:$true] %s179_s7 }
  0x42   : > { %s8366_s28 = scalar_lea.hbm %s10071_s3, 9216 }
  0x43   : > { %p8367_p5 = scmp.ne.s32.totalorder %s10071_s3, %s8366_s28  ;;  %p8373_p12 = scmp.lt.u32.totalorder %s8366_s28, %s10071_s3 }
  0x45   : > { %p8369_p7 = pnand %p8367_p5, %p8340_p2 }
  0x47   : > { %p8370_p10 = pneg %p8369_p7 }
  0x49   : > { %p8375_p1 = pnand %p8373_p12, %p8370_p10 }
  0x4b   : > { %8378 = shalt.err (!%p8375_p1)
}
  0x4c   : > { %s8379_s17 = scalar_lea.vmem %s180_s7, 9216  ;;  %p8387_p8 = scmp.lt.s32.totalorder %s180_s7, %s180_s7 }
  0x4d   : > { %p8380_p3 = scmp.ne.s32.totalorder %s180_s7, %s8379_s17  ;;  %p8388_p9 = scmp.lt.s32.totalorder %s8379_s17, %s8379_s17 }
  0x4f   : > { %p8382_p4 = pnand %p8380_p3, %p8340_p2  ;;  %p8389_p11 = por %p8388_p9, %p8387_p8 }
  0x51   : > { %p8383_p6 = pneg %p8382_p4 }
  0x53   : > { %p8390_p13 = pnand %p8389_p11, %p8383_p6 }
  0x55   : > { %8393 = shalt.err (!%p8390_p13)
}
  0x56   : > { %8012 = dma.hbm_to_vmem [thread:$0]  (!%p8682_p0), %s10071_s3, 9216, %s180_s7, [#allocation10], %s8557_s30, %s8557_s30, %s8558_s26  }
  0x57   : > { %p10072_p5 = scmp.ne.s32.totalorder %s10066_s13, 0 }
  0x58   : > { %p10073_p7 = scmp.ne.s32.totalorder (!%p10072_p5), %s10067_s14, 0 }
  0x59   : > { %198 = sbr.rel (%p10072_p5) target bundleno = 1416 (0x588), region = 36 }
  0x60   : > { %8511 = dma.done.wait (%p10073_p7), [#allocation7], 9216  }
  0x61   : > { %8513 = vsyncadd (%p10073_p7), [#allocation7], 4294958080 }
  0x62   : > { %8515 = dma.done.wait (%p10073_p7), [#allocation10], 9216  }
  0x63   : > { %8517 = vsyncadd (%p10073_p7), [#allocation10], 4294958080  ;;  %s10055_s23 = sand.u32 1, %s8530_s19   ;;  %p227_p0 = scmp.lt.s32.totalorder %s8538_s21, 0 }
  0x64   : > { %s8742_s28 = smul.u32 96, %s10055_s23  ;;  %s228_s13 = ssub.s32 0, %s8538_s21 }
  0x65   : > { %s6144_s15 = smin.u32 %s8538_s21, %s228_s13  ;;  %s6413_s26 = smul.u32 3904, %s8542_s22 }
  0x66   : > { %s230_s27 = sand.u32 1, %s6144_s15   ;;  %p8021_p12 = scmp.eq.s32.totalorder %s8538_s21, 0 }
  0x67   : > { %s231_s14 = ssub.s32 0, %s230_s27  ;;  %s8755_s7 = scalar_lea.hbm %s10041_s0, %s6413_s26 }
  0x68   : > { %s10146_s14 = smov (!%p227_p0, %s231_s14), %s230_s27  ;;  %s8394_s24 = scalar_lea.hbm %s8755_s7, 1600 }
  0x69   : > { %p6146_p10 = scmp.lt.s32.totalorder %s10146_s14, 0  ;;  %s237_s30 = sadd.s32 2, %s10146_s14 }
  0x6a   : > { %p8395_p1 = scmp.ne.s32.totalorder %s8755_s7, %s8394_s24  ;;  %s10057_s15 = scalar_lea.hbm %s10041_s0, 7808 }
  0x6b   : > { %s10148_s30 = smov (!%p6146_p10, %s237_s30), %s10146_s14  ;;  %p8399_p6 = scmp.lt.u32.totalorder %s8755_s7, %s10041_s0 }
  0x6c   : > { %s6414_s6 = smul.u32 100, %s10148_s30  ;;  %s249_s17 = scalar_lea.sflag [#allocation5], %s10148_s30 }
  0x6d   : > { %p8396_p3 = pnand %p8395_p1, %p8021_p12  ;;  %p8400_p8 = scmp.lt.u32.totalorder %s10057_s15, %s8394_s24 }
  0x6e   : > { %s8757_s12 = scalar_lea.vmem [#allocation2], %s6414_s6  ;;  %p8402_p11 = scmp.lt.u32.totalorder %s8394_s24, %s8755_s7 }
  0x6f   : > { %s257_s16 = sshll.u32 %s8757_s12, 4  ;;  %p8397_p4 = pneg %p8396_p3  ;;  %s258_s16 = int_to_ptr.vmem [resolvable:$true] %s257_s16 }
  0x70   : > { %p8401_p9 = por %p8400_p8, %p8399_p6 }
  0x72   : > { %p8403_p13 = por %p8402_p11, %p8401_p9 }
  0x74   : > { %p8404_p5 = pnand %p8403_p13, %p8397_p4 }
  0x76   : > { %8407 = shalt.err (!%p8404_p5)  }
  0x77   : > { %s8408_s10 = scalar_lea.vmem %s258_s16, 1600  ;;  %s8560_s11 = smov [#allocation2]  }
  0x78   : > { %p8409_p7 = scmp.ne.s32.totalorder %s258_s16, %s8408_s10  ;;  %s8412_s29 = sshll.u32 %s8560_s11, 4  ;;  %s8779_s29 = int_to_ptr.vmem [resolvable:$false] %s8412_s29 }
  0x79   : > { %s10056_s13 = scalar_lea.vmem %s8779_s29, 3200  ;;  %p8415_p1 = scmp.lt.s32.totalorder %s258_s16, %s8779_s29 }
  0x7a   : > { %p8410_p0 = pnand %p8409_p7, %p8021_p12  ;;  %p8416_p3 = scmp.lt.s32.totalorder %s10056_s13, %s8408_s10 }
  0x7c   : > { %p8411_p10 = pneg %p8410_p0  ;;  %p8417_p6 = por %p8416_p3, %p8415_p1 }
  0x7e   : > { %p8418_p4 = pnand %p8417_p6, %p8411_p10 }
  0x80   : > { %8421 = shalt.err (!%p8418_p4)  }
  0x81   : > { %8001 = dma.hbm_to_vmem [thread:$0]  (%p8021_p12), %s8755_s7, 1600, %s258_s16, %s249_s17 }
  0x82   : > { %s8789_s24 = scalar_lea.vmem [#allocation11], %s8742_s28 }
  0x83   : > { %8518 = dma.done.wait %s249_s17, 1600 }
  0x84   : > { %8519 = vsyncadd %s249_s17, 4294965696  ;;  %s269_s27 = sadd.s32 1, %s8538_s21  ;;  %v8561_v0 = vmov 0   ;;  %v8562_v1 = vmov 0.0   ;;  %s274_s14 = ssub.s32 1, %s10148_s30  ;;  %vm8563_vm0 = vmmov 0  }
  0x85   : > { %297 = vst [vmem:[#allocation3] sm:$0xf] %v8561_v0  ;;  %298 = vst [vmem:[#allocation3 + $0x48] sm:$0xf0] %v8561_v0  ;;  %6831 = vmatprep.subr.bf16.mxu0 %v8562_v1  ;;  %6847 = vmatprep.mubr.msk.bf16.mxu0 %vm8563_vm0, %v8562_v1  ;;  %s275_s7 = smul.u32 96, %s269_s27  ;;  %p8799_p12 = scmp.lt.s32.totalorder %s269_s27, 4 }
  0x86   : > { %6727 = vmatprep.subr.bf16.mxu1 %v8562_v1  ;;  %6743 = vmatprep.mubr.msk.bf16.mxu1 %vm8563_vm0, %v8562_v1  ;;  %s278_s16 = smul.u32 61, %s8542_s22  ;;  %v8099_v2 = vld [vmem:[#allocation6 + $0x80] sm:$0xff]   ;;  %v8100_v3 = vld [vmem:[#allocation6 + $0x88] sm:$0xff]   ;;  %s285_s27 = scalar_lea.sflag [#allocation5], %s274_s14 }
  0x87   : > { %s276_s17 = sshra.s32 %s275_s7, 3  ;;  %s6416_s26 = smul.u32 100, %s274_s14  ;;  %6832 = vmatpush3.bf16.msra.mxu0 %v8099_v2 }
  0x88   : > { %s279_s6 = sadd.s32 %s278_s16, %s276_s17 }
  0x89   : > { %s6152_s30 = sshll.u32 %s279_s6, 6  ;;  %s284_s13 = scalar_lea.vmem [#allocation2], %s6416_s26 }
  0x8a   : > { %s281_s23 = scalar_lea.hbm %s10041_s0, %s6152_s30  ;;  %s293_s15 = sshll.u32 %s284_s13, 4  ;;  %s294_s15 = int_to_ptr.vmem [resolvable:$true] %s293_s15 }
  0x8b   : > { %s8422_s1 = scalar_lea.hbm %s281_s23, 1600  ;;  %p8427_p13 = scmp.lt.u32.totalorder %s281_s23, %s10041_s0 }
  0x8c   : > { %p8423_p8 = scmp.ne.s32.totalorder %s281_s23, %s8422_s1  ;;  %s10075_s6 = scalar_lea.hbm %s10041_s0, 7808 }
  0x8d   : > { %p8428_p5 = scmp.lt.u32.totalorder %s10075_s6, %s8422_s1  ;;  %p8430_p0 = scmp.lt.u32.totalorder %s8422_s1, %s281_s23 }
  0x8e   : > { %p8424_p9 = pnand %p8423_p8, %p8799_p12 }
  0x8f   : > { %p8429_p7 = por %p8428_p5, %p8427_p13 }
  0x90   : > { %p8425_p11 = pneg %p8424_p9 }
  0x91   : > { %p8431_p10 = por %p8430_p0, %p8429_p7 }
  0x93   : > { %p8432_p1 = pnand %p8431_p10, %p8425_p11 }
  0x95   : > { %8435 = shalt.err (!%p8432_p1)  }
  0x96   : > { %s8436_s13 = scalar_lea.vmem %s294_s15, 1600  ;;  %p8443_p8 = scmp.lt.s32.totalorder %s294_s15, %s8779_s29 }
  0x97   : > { %p8437_p3 = scmp.ne.s32.totalorder %s294_s15, %s8436_s13  ;;  %s10076_s3 = scalar_lea.vmem %s8779_s29, 3200 }
  0x98   : > { %p8444_p9 = scmp.lt.s32.totalorder %s10076_s3, %s8436_s13 }
  0x99   : > { %p8438_p6 = pnand %p8437_p3, %p8799_p12 }
  0x9a   : > { %p8445_p2 = por %p8444_p9, %p8443_p8 }
  0x9b   : > { %p8439_p4 = pneg %p8438_p6 }
  0x9d   : > { %p8446_p5 = pnand %p8445_p2, %p8439_p4 }
  0x9f   : > { %8449 = shalt.err (!%p8446_p5)  }
  0xa0   : > { %8003 = dma.hbm_to_vmem [thread:$0]  (%p8799_p12), %s281_s23, 1600, %s294_s15, %s285_s27  ;;  %6833 = vmatprep.subr.bf16.mxu0 %v8562_v1  ;;  %v8101_v4 = vld [vmem:[#allocation6 + $0x90] sm:$0xff]   ;;  %v8102_v5 = vld [vmem:[#allocation6 + $0x98] sm:$0xff]   ;;  %v8103_v6 = vld [vmem:[#allocation6 + $0xa0] sm:$0xff]   ;;  %vm1098_vm1 = vcmask 1046528  }
  0xa1   : > { %6834 = vmatpush3.bf16.msra.mxu0 %v8100_v3  ;;  %v8104_v7 = vld [vmem:[#allocation6 + $0xa8] sm:$0xff]   ;;  %v8105_v8 = vld [vmem:[#allocation6 + $0xb0] sm:$0xff]   ;;  %v8107_v9 = vld [vmem:[%s8757_s12] sm:$0xfe]   ;;  %vm721_vm2 = vsmask.f32 7424 }
  0xa2   : > { %6835 = vmatprep.subr.bf16.mxu0 %v8562_v1  ;;  %v8108_v10 = vld [vmem:[%s8757_s12 + $0x8] sm:$0xff]   ;;  %v8106_v11 = vld [vmem:[#allocation6 + $0xb8] sm:$0xff]   ;;  %v1099_v12 = vrot.slane %v8107_v9, 1  ;;  %v8111_v16 = vld [vmem:[%s8757_s12 + $0x10] sm:$0xff]   ;;  %p10127_p2 = scmp.ne.s32.totalorder %s8538_s21, 0 }
  0xa3   : > { %v1100_v13 = vrot.slane %v8108_v10, 1  ;;  %v8109_v14 = vld [vmem:[#allocation6 + $0xc0] sm:$0xff]   ;;  %v8110_v17 = vld [vmem:[#allocation6 + $0xc8] sm:$0xff]   ;;  %v1102_v18 = vrot.slane %v8111_v16, 1  ;;  %v8112_v20 = vld [vmem:[#allocation6 + $0xd0] sm:$0xff]  }
  0xa4   : > { %v8114_v21 = vld [vmem:[%s8757_s12 + $0x18] sm:$0xff]   ;;  %v8115_v24 = vld [vmem:[#allocation6 + $0xe0] sm:$0xff]   ;;  %v8146_v28 = vld [vmem:[#allocation6 + $0x8] sm:$0xff]  }
  0xa5   : > { %6836 = vmatpush3.bf16.msra.mxu0 %v8101_v4  ;;  %v1101_v15 = vsel %vm1098_vm1, %v1099_v12, %v1100_v13  ;;  %v1103_v19 = vsel %vm1098_vm1, %v1100_v13, %v1102_v18  ;;  %v8113_v22 = vld [vmem:[#allocation6 + $0xd8] sm:$0xff]   ;;  %v1104_v23 = vrot.slane %v8114_v21, 1  ;;  %v8144_v27 = vld [vmem:[#allocation6] sm:$0xff]   ;;  %v8116_v29 = vld [vmem:[#allocation6 + $0xe8] sm:$0xff]  }
  0xa6   : > { %6837 = vmatprep.subr.bf16.mxu0 %v8562_v1  ;;  %v8846_v26 = vld [vmem:[%s8757_s12 + $0x20] sm:$0xff]   ;;  %6728 = vmatpush3.bf16.msra.mxu1 %v8144_v27  ;;  %v8148_v31 = vld [vmem:[#allocation6 + $0x10] sm:$0xff]   ;;  %v8120_v36 = vld [vmem:[%s8757_s12 + $0xc] sm:$0xff]  }
  0xa7   : > { %v1105_v25 = vsel %vm1098_vm1, %v1102_v18, %v1104_v23  ;;  %v1106_v30 = vrot.slane %v8846_v26, 1  ;;  %6729 = vmatprep.subr.bf16.mxu1 %v8562_v1  ;;  %v8118_v33 = vld [vmem:[#allocation6 + $0xf0] sm:$0xff]   ;;  %v8150_v34 = vld [vmem:[#allocation6 + $0x18] sm:$0xff]   ;;  %v8151_v37 = vld [vmem:[#allocation6 + $0x20] sm:$0xff]  }
  0xa8   : > { %v8119_v35 = vld [vmem:[#allocation6 + $0xf8] sm:$0xff]   ;;  %v8121_v38 = vld [vmem:[#allocation6 + $0x100] sm:$0xff]   ;;  %v8154_v39 = vld [vmem:[#allocation6 + $0x28] sm:$0xff]  }
  0xa9   : > { %6838 = vmatpush3.bf16.msra.mxu0 %v8102_v5  ;;  %v1107_v32 = vsel %vm1098_vm1, %v1104_v23, %v1106_v30  ;;  %v8123_v40 = vld [vmem:[#allocation6 + $0x108] sm:$0xff]   ;;  %v8155_v42 = vld [vmem:[#allocation6 + $0x30] sm:$0xff]   ;;  %v8158_v44 = vld [vmem:[#allocation6 + $0x38] sm:$0xff]  }
  0xaa   : > { %6839 = vmatprep.subr.bf16.mxu0 %v8562_v1  ;;  %6730 = vmatpush3.bf16.msra.mxu1 %v8146_v28  ;;  %v8122_v41 = vld [vmem:[%s8757_s12 + $0x14] sm:$0xff]   ;;  %v8127_v45 = vld [vmem:[#allocation6 + $0x118] sm:$0xff]   ;;  %v8129_v47 = vld [vmem:[#allocation6 + $0x120] sm:$0xff]  }
  0xab   : > { %6731 = vmatprep.subr.bf16.mxu1 %v8562_v1  ;;  %v8125_v43 = vld [vmem:[#allocation6 + $0x110] sm:$0xff]   ;;  %v8159_v48 = vld [vmem:[%s8757_s12] sm:$0xff]   ;;  %v8131_v49 = vld [vmem:[#allocation6 + $0x128] sm:$0xff]  }
  0xac   : > { %v8124_v46 = vld [vmem:[%s8757_s12 + $0x1c] sm:$0xff]   ;;  %v8126_v50 = vld [vmem:[%s8757_s12 + $0x24] sm:$0xff]   ;;  %v8128_v54 = vld [vmem:[%s8757_s12 + $0x2c] sm:$0xff]  }
  0xad   : > { %6840 = vmatpush3.bf16.msra.mxu0 %v8103_v6  ;;  %v8133_v51 = vld [vmem:[#allocation6 + $0x130] sm:$0xff]   ;;  %v8162_v52 = vld [vmem:[%s8757_s12 + $0x8] sm:$0xff]   ;;  %v8136_v53 = vld [vmem:[#allocation6 + $0x138] sm:$0xff]  }
  0xae   : > { %6841 = vmatprep.subr.bf16.mxu0 %v8562_v1  ;;  %6732 = vmatpush3.bf16.msra.mxu1 %v8148_v31  ;;  %v8165_v55 = vld [vmem:[%s8757_s12 + $0x10] sm:$0xff]   ;;  %v8176_v56 = vld [vmem:[#allocation6 + $0x40] sm:$0xff]   ;;  %v8169_v58 = vld [vmem:[%s8757_s12 + $0x18] sm:$0xff]  }
  0xaf   : > { %6733 = vmatprep.subr.bf16.mxu1 %v8562_v1  ;;  %v8130_v57 = vld [vmem:[%s8757_s12 + $0x34] sm:$0xff]   ;;  %v8132_v61 = vld [vmem:[%s8757_s12 + $0x3c] sm:$0xff]   ;;  %v8137_v63 = vld [vmem:[%s8757_s12 + $0xc] sm:$0xff]  }
  0xb0   : > { %v8178_v59 = vld [vmem:[#allocation6 + $0x48] sm:$0xff]   ;;  %v8181_v60 = vld [vmem:[#allocation6 + $0x50] sm:$0xff]   ;;  %v8172_v62 = vld [vmem:[%s8757_s12 + $0x20] sm:$0xff]   ;;  %v1717_v4 = vshll.u32 %v8137_v63, 16 }
  0xb1   : > { %6842 = vmatpush3.bf16.msra.mxu0 %v8104_v7  ;;  %v8183_v0 = vld [vmem:[#allocation6 + $0x58] sm:$0xff]   ;;  %v8185_v2 = vld [vmem:[#allocation6 + $0x60] sm:$0xff]   ;;  %v8138_v6 = vld [vmem:[%s8757_s12 + $0x14] sm:$0xff]  }
  0xb2   : > { %6843 = vmatprep.subr.bf16.mxu0 %v8562_v1  ;;  %6734 = vmatpush3.bf16.msra.mxu1 %v8150_v34  ;;  %v8134_v3 = vld [vmem:[%s8757_s12 + $0x44] sm:$0xff]   ;;  %v8188_v7 = vld [vmem:[#allocation6 + $0x68] sm:$0xff]   ;;  %v1719_v9 = vrot.slane %v1717_v4, 1  ;;  %v8190_v10 = vld [vmem:[#allocation6 + $0x70] sm:$0xff]   ;;  %v1722_v12 = vshll.u32 %v8138_v6, 16 }
  0xb3   : > { %6735 = vmatprep.subr.bf16.mxu1 %v8562_v1  ;;  %v8175_v5 = vld [vmem:[%s8757_s12 + $0x28] sm:$0xff]   ;;  %v8179_v13 = vld [vmem:[%s8757_s12 + $0x30] sm:$0xff]   ;;  %v8194_v23 = vld [vmem:[%s8757_s12] sm:$0xff]  }
  0xb4   : > { %v8139_v18 = vld [vmem:[#allocation6 + $0x140] sm:$0xff]   ;;  %v725_v27 = vshll.u32 %v8194_v23, 16  ;;  %v8141_v31 = vld [vmem:[#allocation6 + $0x148] sm:$0xff]   ;;  %v8143_v34 = vld [vmem:[#allocation6 + $0x150] sm:$0xff]  }
  0xb5   : > { %6844 = vmatpush3.bf16.msra.mxu0 %v8105_v8  ;;  %v1715_v8 = vshrl.u32 %v8137_v63, 16 }
  0xb6   : > { %6845 = vmatprep.subr.bf16.mxu0 %v8562_v1  ;;  %6736 = vmatpush3.bf16.msra.mxu1 %v8151_v37  ;;  %v727_v37 = vrot.slane %v725_v27, 1 }
  0xb7   : > { %6737 = vmatprep.subr.bf16.mxu1 %v8562_v1  ;;  %v1720_v16 = vor.u32 %v1719_v9, %v1715_v8  ;;  %v8204_v9 = vld [vmem:[%s8757_s12 + $0x20] sm:$0xff]  }
  0xb9   : > { %6846 = vmatpush3.bf16.msra.mxu0 %v8106_v11  ;;  %v8135_v11 = vld [vmem:[%s8757_s12 + $0x4c] sm:$0xff]  }
  0xba   : > { %6883 = vmatprep.subr.bf16.mxu0 %v8562_v1  ;;  %6738 = vmatpush3.bf16.msra.mxu1 %v8154_v39 }
  0xbb   : > { %6739 = vmatprep.subr.bf16.mxu1 %v8562_v1 }
  0xbc   : > { %6848 = vmatmul.mubr.bf16.vlgmr.msra.gmra.mrb[0].mxu0 %v1101_v15  ;;  %v8193_v15 = vld [vmem:[#allocation6 + $0x78] sm:$0xff]  }
  0xbd   : > { %6884 = vmatpush3.bf16.msra.mxu0 %v8109_v14  ;;  %6851 = vmatprep.mubr.msk.bf16.mxu0 %vm8563_vm0, %v8562_v1  ;;  %v8140_v14 = vld [vmem:[%s8757_s12 + $0x1c] sm:$0xff]  }
  0xbe   : > { %6885 = vmatprep.subr.bf16.mxu0 %v8562_v1  ;;  %6740 = vmatpush3.bf16.msra.mxu1 %v8155_v42  ;;  %v1730_v21 = vshll.u32 %v8140_v14, 16  ;;  %v8198_v42 = vld [vmem:[%s8757_s12 + $0x10] sm:$0xff]  }
  0xbf   : > { %6741 = vmatprep.subr.bf16.mxu1 %v8562_v1  ;;  %v742_v63 = vshrl.u32 %v8198_v42, 16 }
  0xc1   : > { %6886 = vmatpush3.bf16.msra.mxu0 %v8110_v17  ;;  %v1724_v17 = vrot.slane %v1722_v12, 1  ;;  %v8153_v12 = vld [vmem:[%s8757_s12 + $0x3c] sm:$0xff]  }
  0xc2   : > { %6887 = vmatprep.subr.bf16.mxu0 %v8562_v1  ;;  %6742 = vmatpush3.bf16.msra.mxu1 %v8158_v44 }
  0xc3   : > { %6779 = vmatprep.subr.bf16.mxu1 %v8562_v1 }
  0xc4   : > { %6852 = vmatmul.mubr.bf16.gmra.mrb[4].mxu0 %v1103_v19  ;;  %v1726_v19 = vshrl.u32 %v8138_v6, 16  ;;  %v8259_v6 = vld [vmem:[#allocation6 + $0x88] sm:$0xff]  }
  0xc5   : > { %6888 = vmatpush3.bf16.msra.mxu0 %v8112_v20  ;;  %6855 = vmatprep.mubr.msk.bf16.mxu0 %vm8563_vm0, %v8562_v1  ;;  %v8184_v20 = vld [vmem:[%s8757_s12 + $0x38] sm:$0xff]  }
  0xc6   : > { %6889 = vmatprep.subr.bf16.mxu0 %v8562_v1  ;;  %6744 = vmatmul.mubr.bf16.vlgmr.msra.gmra.mrb[0].mxu1 %v8159_v48  ;;  %v1728_v28 = vor.u32 %v1726_v19, %v1724_v17 }
  0xc7   : > { %6747 = vmatprep.mubr.msk.bf16.mxu1 %vm8563_vm0, %v8562_v1  ;;  %6780 = vmatpush3.bf16.msra.mxu1 %v8176_v56  ;;  %v8201_v56 = vld [vmem:[%s8757_s12 + $0x18] sm:$0xff]  }
  0xc8   : > { %6781 = vmatprep.subr.bf16.mxu1 %v8562_v1 }
  0xc9   : > { %6890 = vmatpush3.bf16.msra.mxu0 %v8113_v22  ;;  %v8142_v22 = vld [vmem:[%s8757_s12 + $0x24] sm:$0xff]  }
  0xca   : > { %6891 = vmatprep.subr.bf16.mxu0 %v8562_v1 }
  0xcb   : > { %6782 = vmatpush3.bf16.msra.mxu1 %v8178_v59  ;;  %v8149_v59 = vld [vmem:[%s8757_s12 + $0x34] sm:$0xff]  }
  0xcc   : > { %6856 = vmatmul.mubr.bf16.gmra.mrb[8].mxu0 %v1105_v25  ;;  %6783 = vmatprep.subr.bf16.mxu1 %v8562_v1  ;;  %v8195_v25 = vld [vmem:[%s8757_s12 + $0x8] sm:$0xff]   ;;  %v1754_v4 = vshll.u32 %v8149_v59, 16  ;;  %v1758_v19 = vshrl.u32 %v8149_v59, 16 }
  0xcd   : > { %6892 = vmatpush3.bf16.msra.mxu0 %v8115_v24  ;;  %6859 = vmatprep.mubr.msk.bf16.mxu0 %vm8563_vm0, %v8562_v1  ;;  %v1725_v24 = vsel %vm721_vm2, %v1720_v16, %v1724_v17  ;;  %v734_v48 = vshrl.u32 %v8195_v25, 16  ;;  %v750_v16 = vshrl.u32 %v8201_v56, 16  ;;  %v754_v17 = vshll.u32 %v8204_v9, 16 }
  0xce   : > { %6893 = vmatprep.subr.bf16.mxu0 %v8562_v1  ;;  %6748 = vmatmul.mubr.bf16.gmra.mrb[4].mxu1 %v8162_v52 }
  0xcf   : > { %6751 = vmatprep.mubr.msk.bf16.mxu1 %vm8563_vm0, %v8562_v1  ;;  %6784 = vmatpush3.bf16.msra.mxu1 %v8181_v60  ;;  %v8156_v60 = vld [vmem:[#allocation6 + $0x168] sm:$0xff]  }
  0xd0   : > { %6785 = vmatprep.subr.bf16.mxu1 %v8562_v1 }
  0xd1   : > { %6894 = vmatpush3.bf16.msra.mxu0 %v8116_v29  ;;  %v1732_v29 = vrot.slane %v1730_v21, 1  ;;  %v8261_v21 = vld [vmem:[#allocation6 + $0x98] sm:$0xff]  }
  0xd2   : > { %6895 = vmatprep.subr.bf16.mxu0 %v8562_v1 }
  0xd3   : > { %6786 = vmatpush3.bf16.msra.mxu1 %v8183_v0  ;;  %v1733_v39 = vsel %vm721_vm2, %v1728_v28, %v1732_v29  ;;  %v746_v0 = vshll.u32 %v8201_v56, 16  ;;  %v8157_v28 = vld [vmem:[%s8757_s12 + $0x44] sm:$0xff]  }
  0xd4   : > { %6860 = vmatmul.mubr.bf16.gmra.mrb[12].mxu0 %v1107_v32  ;;  %6787 = vmatprep.subr.bf16.mxu1 %v8562_v1  ;;  %v1734_v32 = vshrl.u32 %v8140_v14, 16  ;;  %v8260_v14 = vld [vmem:[#allocation6 + $0x90] sm:$0xff]  }
  0xd5   : > { %6896 = vmatpush3.bf16.msra.mxu0 %v8118_v33  ;;  %6899 = vmatprep.mubr.msk.bf16.mxu0 %vm8563_vm0, %v8562_v1  ;;  %v1738_v33 = vshll.u32 %v8142_v22, 16  ;;  %v748_v8 = vrot.slane %v746_v0, 1 }
  0xd6   : > { %6897 = vmatprep.subr.bf16.mxu0 %v8562_v1  ;;  %6752 = vmatmul.mubr.bf16.gmra.mrb[8].mxu1 %v8165_v55 }
  0xd7   : > { %6755 = vmatprep.mubr.msk.bf16.mxu1 %vm8563_vm0, %v8562_v1  ;;  %6788 = vmatpush3.bf16.msra.mxu1 %v8185_v2  ;;  %v1740_v44 = vrot.slane %v1738_v33, 1 }
  0xd8   : > { %6789 = vmatprep.subr.bf16.mxu1 %v8562_v1 }
  0xd9   : > { %6898 = vmatpush3.bf16.msra.mxu0 %v8119_v35  ;;  %v8189_v35 = vld [vmem:[%s8757_s12 + $0x40] sm:$0xff]  }
  0xda   : > { %6935 = vmatprep.subr.bf16.mxu0 %v8562_v1 }
  0xdb   : > { %6790 = vmatpush3.bf16.msra.mxu1 %v8188_v7 }
  0xdc   : > { %6900 = vmatmul.mubr.bf16.vlgmr.msra.gmra.mrb[0].mxu0 %v8120_v36  ;;  %6791 = vmatprep.subr.bf16.mxu1 %v8562_v1  ;;  %v723_v36 = vshrl.u32 %v8194_v23, 16  ;;  %v756_v23 = vrot.slane %v754_v17, 1 }
  0xdd   : > { %6936 = vmatpush3.bf16.msra.mxu0 %v8121_v38  ;;  %6903 = vmatprep.mubr.msk.bf16.mxu0 %vm8563_vm0, %v8562_v1  ;;  %v730_v38 = vshll.u32 %v8195_v25, 16 }
  0xde   : > { %6937 = vmatprep.subr.bf16.mxu0 %v8562_v1  ;;  %6756 = vmatmul.mubr.bf16.gmra.mrb[12].mxu1 %v8169_v58 }
  0xdf   : > { %6759 = vmatprep.mubr.msk.bf16.mxu1 %vm8563_vm0, %v8562_v1  ;;  %6792 = vmatpush3.bf16.msra.mxu1 %v8190_v10 }
  0xe0   : > { %6793 = vmatprep.subr.bf16.mxu1 %v8562_v1 }
  0xe1   : > { %6938 = vmatpush3.bf16.msra.mxu0 %v8123_v40  ;;  %v728_v40 = vor.u32 %v727_v37, %v723_v36  ;;  %v1770_v36 = vshll.u32 %v8157_v28, 16  ;;  %v8263_v37 = vld [vmem:[#allocation6 + $0xa8] sm:$0xff]  }
  0xe2   : > { %6939 = vmatprep.subr.bf16.mxu0 %v8562_v1 }
  0xe3   : > { %6794 = vmatpush3.bf16.msra.mxu1 %v8193_v15 }
  0xe4   : > { %6904 = vmatmul.mubr.bf16.gmra.mrb[4].mxu0 %v8122_v41  ;;  %7447 = vmatprep.subr.bf16.mxu1 %v8562_v1  ;;  %v732_v41 = vrot.slane %v730_v38, 1 }
  0xe5   : > { %6907 = vmatprep.mubr.msk.bf16.mxu0 %vm8563_vm0, %v8562_v1  ;;  %6940 = vmatpush3.bf16.msra.mxu0 %v8125_v43  ;;  %v1736_v43 = vor.u32 %v1734_v32, %v1732_v29  ;;  %v8262_v29 = vld [vmem:[#allocation6 + $0xa0] sm:$0xff]   ;;  %v758_v32 = vshrl.u32 %v8204_v9, 16 }
  0xe6   : > { %6941 = vmatprep.subr.bf16.mxu0 %v8562_v1  ;;  %6760 = vmatmul.mubr.bf16.gmra.mrb[16].mxu1 %v8172_v62 }
  0xe7   : > { %6763 = vmatprep.mubr.msk.bf16.mxu1 %vm8563_vm0, %v8562_v1  ;;  %v760_v38 = vor.u32 %v758_v32, %v756_v23  ;;  %v8173_v32 = vld [vmem:[%s8757_s12 + $0x24] sm:$0xff]  }
  0xe9   : > { %6942 = vmatpush3.bf16.msra.mxu0 %v8127_v45  ;;  %v8145_v45 = vld [vmem:[%s8757_s12 + $0x2c] sm:$0xff]  }
  0xea   : > { %6943 = vmatprep.subr.bf16.mxu0 %v8562_v1  ;;  %v1746_v52 = vshll.u32 %v8145_v45, 16 }
  0xec   : > { %6908 = vmatmul.mubr.bf16.gmra.mrb[8].mxu0 %v8124_v46  ;;  %v8147_v46 = vld [vmem:[#allocation6 + $0x158] sm:$0xff]   ;;  %v1748_v58 = vrot.slane %v1746_v52, 1 }
  0xed   : > { %6911 = vmatprep.mubr.msk.bf16.mxu0 %vm8563_vm0, %v8562_v1  ;;  %6944 = vmatpush3.bf16.msra.mxu0 %v8129_v47  ;;  %v733_v47 = vsel %vm721_vm2, %v728_v40, %v732_v41  ;;  %v8210_v40 = vld [vmem:[%s8757_s12 + $0x30] sm:$0xff]  }
  0xee   : > { %6945 = vmatprep.subr.bf16.mxu0 %v8562_v1  ;;  %6764 = vmatmul.mubr.bf16.gmra.mrb[20].mxu1 %v8175_v5  ;;  %v8160_v5 = vld [vmem:[#allocation6 + $0x170] sm:$0xff]   ;;  %v774_v59 = vshrl.u32 %v8210_v40, 16 }
  0xef   : > { %6767 = vmatprep.mubr.msk.bf16.mxu1 %vm8563_vm0, %v8562_v1 }
  0xf1   : > { %6946 = vmatpush3.bf16.msra.mxu0 %v8131_v49  ;;  %v738_v49 = vshll.u32 %v8198_v42, 16  ;;  %v1772_v42 = vrot.slane %v1770_v36, 1  ;;  %v8180_v36 = vld [vmem:[#allocation6 + $0x198] sm:$0xff]  }
  0xf2   : > { %6947 = vmatprep.subr.bf16.mxu0 %v8562_v1 }
  0xf3   : > { %v740_v55 = vrot.slane %v738_v49, 1  ;;  %v1774_v49 = vshrl.u32 %v8157_v28, 16 }
  0xf4   : > { %6912 = vmatmul.mubr.bf16.gmra.mrb[12].mxu0 %v8126_v50  ;;  %v1741_v50 = vsel %vm721_vm2, %v1736_v43, %v1740_v44  ;;  %v8161_v43 = vld [vmem:[%s8757_s12 + $0x4c] sm:$0xff]  }
  0xf5   : > { %6915 = vmatprep.mubr.msk.bf16.mxu0 %vm8563_vm0, %v8562_v1  ;;  %6948 = vmatpush3.bf16.msra.mxu0 %v8133_v51  ;;  %v1742_v51 = vshrl.u32 %v8142_v22, 16  ;;  %v744_v7 = vor.u32 %v742_v63, %v740_v55  ;;  %v752_v22 = vor.u32 %v750_v16, %v748_v8 }
  0xf6   : > { %6949 = vmatprep.subr.bf16.mxu0 %v8562_v1  ;;  %6768 = vmatmul.mubr.bf16.gmra.mrb[24].mxu1 %v8179_v13  ;;  %v8164_v13 = vld [vmem:[#allocation6 + $0x178] sm:$0xff]  }
  0xf7   : > { %6771 = vmatprep.mubr.msk.bf16.mxu1 %vm8563_vm0, %v8562_v1  ;;  %v749_v15 = vsel %vm721_vm2, %v744_v7, %v748_v8 }
  0xf9   : > { %6950 = vmatpush3.bf16.msra.mxu0 %v8136_v53  ;;  %v8152_v53 = vld [vmem:[#allocation6 + $0x160] sm:$0xff]  }
  0xfa   : > { %6987 = vmatprep.subr.bf16.mxu0 %v8562_v1 }
  0xfc   : > { %6916 = vmatmul.mubr.bf16.gmra.mrb[16].mxu0 %v8128_v54  ;;  %v736_v54 = vor.u32 %v734_v48, %v732_v41 }
  0xfd   : > { %6919 = vmatprep.mubr.msk.bf16.mxu0 %vm8563_vm0, %v8562_v1 }
  0xfe   : > { %6772 = vmatmul.mubr.bf16.gmra.mrb[28].mxu1 %v8184_v20  ;;  %v741_v62 = vsel %vm721_vm2, %v736_v54, %v740_v55  ;;  %v1762_v20 = vshll.u32 %v8153_v12, 16  ;;  %v8212_v54 = vld [vmem:[%s8757_s12 + $0x38] sm:$0xff]   ;;  %v1776_v55 = vor.u32 %v1774_v49, %v1772_v42 }
  0xff   : > { %6775 = vmatprep.mubr.msk.bf16.mxu1 %vm8563_vm0, %v8562_v1  ;;  %v782_v7 = vshrl.u32 %v8212_v54, 16 }
 0x100   : > { %v1764_v27 = vrot.slane %v1762_v20, 1 }
 0x104   : > { %6920 = vmatmul.mubr.bf16.gmra.mrb[20].mxu0 %v8130_v57  ;;  %v1744_v57 = vor.u32 %v1742_v51, %v1740_v44  ;;  %v8264_v44 = vld [vmem:[#allocation6 + $0xb0] sm:$0xff]   ;;  %v8265_v51 = vld [vmem:[#allocation6 + $0xb8] sm:$0xff]  }
 0x105   : > { %6923 = vmatprep.mubr.msk.bf16.mxu0 %vm8563_vm0, %v8562_v1 }
 0x106   : > { %6776 = vmatmul.mubr.bf16.gmra.mrb[32].mxu1 %v8189_v35  ;;  %v1749_v2 = vsel %vm721_vm2, %v1744_v57, %v1748_v58  ;;  %v1766_v35 = vshrl.u32 %v8153_v12, 16  ;;  %v8163_v57 = vld [vmem:[%s8757_s12 + $0x54] ss:$0 sps:$4 sm:$0x11]  }
 0x107   : > { %6795 = vmatprep.mubr.msk.bf16.mxu1 %vm8563_vm0, %v8562_v1  ;;  %v1786_v63 = vshll.u32 %v8163_v57, 16 }
 0x108   : > { %v1768_v41 = vor.u32 %v1766_v35, %v1764_v27  ;;  %v2095_v35 = vrot.slane %v8173_v32, 1 }
 0x10a   : > { %v1773_v48 = vsel %vm721_vm2, %v1768_v41, %v1772_v42  ;;  %v8186_v41 = vld [vmem:[#allocation6 + $0x1a0] sm:$0xff]  }
 0x10c   : > { %6924 = vmatmul.mubr.bf16.gmra.mrb[24].mxu0 %v8132_v61  ;;  %v8258_v61 = vld [vmem:[#allocation6 + $0x80] sm:$0xff]  }
 0x10d   : > { %6927 = vmatprep.mubr.msk.bf16.mxu0 %vm8563_vm0, %v8562_v1 }
 0x10e   : > { %6796 = vmatmul.mubr.bf16.vlgmr.msra.gmra.mrb[0].mxu1 %v733_v47  ;;  %v770_v47 = vshll.u32 %v8210_v40, 16  ;;  %v8177_v40 = vld [vmem:[%s8757_s12 + $0x2c] sm:$0xff]  }
 0x10f   : > { %6799 = vmatprep.mubr.msk.bf16.mxu1 %vm8563_vm0, %v8562_v1  ;;  %7455 = vmatpush3.bf16.msra.mxu1 %v8258_v61  ;;  %v2097_v26 = vrot.slane %v8177_v40, 1 }
 0x110   : > { %7448 = vmatprep.subr.bf16.mxu1 %v8562_v1 }
 0x113   : > { %7456 = vmatpush3.bf16.msra.mxu1 %v8259_v6 }
 0x114   : > { %6928 = vmatmul.mubr.bf16.gmra.mrb[28].mxu0 %v8134_v3  ;;  %v1750_v3 = vshrl.u32 %v8145_v45, 16  ;;  %7449 = vmatprep.subr.bf16.mxu1 %v8562_v1 }
 0x115   : > { %6931 = vmatprep.mubr.msk.bf16.mxu0 %vm8563_vm0, %v8562_v1 }
 0x116   : > { %6800 = vmatmul.mubr.bf16.gmra.mrb[4].mxu1 %v741_v62  ;;  %v1752_v10 = vor.u32 %v1750_v3, %v1748_v58  ;;  %v1782_v62 = vshrl.u32 %v8161_v43, 16  ;;  %v8215_v3 = vld [vmem:[%s8757_s12 + $0x40] sm:$0xff]  }
 0x117   : > { %6803 = vmatprep.mubr.msk.bf16.mxu1 %vm8563_vm0, %v8562_v1  ;;  %7457 = vmatpush3.bf16.msra.mxu1 %v8260_v14  ;;  %v786_v8 = vshll.u32 %v8215_v3, 16  ;;  %v8218_v14 = vld [vmem:[%s8757_s12 + $0x48] ss:$0 sps:$4 sm:$0x11]  }
 0x118   : > { %7450 = vmatprep.subr.bf16.mxu1 %v8562_v1 }
 0x11b   : > { %7458 = vmatpush3.bf16.msra.mxu1 %v8261_v21  ;;  %v8168_v21 = vld [vmem:[#allocation6 + $0x180] sm:$0xff]  }
 0x11c   : > { %6932 = vmatmul.mubr.bf16.gmra.mrb[32].mxu0 %v8135_v11  ;;  %v1756_v11 = vrot.slane %v1754_v4, 1  ;;  %7451 = vmatprep.subr.bf16.mxu1 %v8562_v1 }
 0x11d   : > { %6951 = vmatprep.mubr.msk.bf16.mxu0 %vm8563_vm0, %v8562_v1 }
 0x11e   : > { %6804 = vmatmul.mubr.bf16.gmra.mrb[8].mxu1 %v749_v15  ;;  %v1760_v25 = vor.u32 %v1758_v19, %v1756_v11  ;;  %v794_v19 = vshll.u32 %v8218_v14, 16  ;;  %v8208_v14 = vld [vmem:[%s8757_s12 + $0x28] sm:$0xff]  }
 0x11f   : > { %6807 = vmatprep.mubr.msk.bf16.mxu1 %vm8563_vm0, %v8562_v1  ;;  %7459 = vmatpush3.bf16.msra.mxu1 %v8262_v29  ;;  %v8221_v29 = vld [vmem:[%s8757_s12 + $0x28] sm:$0xff]  }
 0x120   : > { %7452 = vmatprep.subr.bf16.mxu1 %v8562_v1 }
 0x123   : > { %7460 = vmatpush3.bf16.msra.mxu1 %v8263_v37 }
 0x124   : > { %6952 = vmatmul.mubr.bf16.vlgmr.msra.gmra.mrb[0].mxu0 %v1725_v24  ;;  %v8207_v24 = vld [vmem:[%s8757_s12 + $0x28] sm:$0xff]   ;;  %7453 = vmatprep.subr.bf16.mxu1 %v8562_v1 }
 0x125   : > { %6988 = vmatpush3.bf16.msra.mxu0 %v8139_v18  ;;  %6955 = vmatprep.mubr.msk.bf16.mxu0 %vm8563_vm0, %v8562_v1  ;;  %v1757_v18 = vsel %vm721_vm2, %v1752_v10, %v1756_v11  ;;  %v762_v33 = vshll.u32 %v8207_v24, 16  ;;  %v8166_v10 = vld [vmem:[%s8757_s12 + $0xc] sm:$0xfe]   ;;  %v8167_v11 = vld [vmem:[%s8757_s12 + $0x14] sm:$0xff]  }
 0x126   : > { %6989 = vmatprep.subr.bf16.mxu0 %v8562_v1  ;;  %v2090_v15 = vrot.slane %v8166_v10, 1  ;;  %v2091_v16 = vrot.slane %v8167_v11, 1  ;;  %v8206_v10 = vld [vmem:[#allocation6 + $0x1c8] sm:$0xff]   ;;  %v8205_v11 = vld [vmem:[%s8757_s12 + $0x20] sm:$0xff]  }
 0x127   : > { %7461 = vmatpush3.bf16.msra.mxu1 %v8264_v44  ;;  %v8227_v44 = vld [vmem:[%s8757_s12 + $0x38] sm:$0xff]  }
 0x128   : > { %7454 = vmatprep.subr.bf16.mxu1 %v8562_v1  ;;  %v2092_v20 = vsel %vm1098_vm1, %v2090_v15, %v2091_v16  ;;  %v8216_v15 = vld [vmem:[#allocation6 + $0x1e0] sm:$0xff]  }
 0x129   : > { %6990 = vmatpush3.bf16.msra.mxu0 %v8141_v31  ;;  %v757_v31 = vsel %vm721_vm2, %v752_v22, %v756_v23  ;;  %v8170_v22 = vld [vmem:[%s8757_s12 + $0x1c] sm:$0xff]  }
 0x12a   : > { %6991 = vmatprep.subr.bf16.mxu0 %v8562_v1  ;;  %6808 = vmatmul.mubr.bf16.gmra.mrb[12].mxu1 %v757_v31 }
 0x12b   : > { %6811 = vmatprep.mubr.msk.bf16.mxu1 %vm8563_vm0, %v8562_v1  ;;  %7462 = vmatpush3.bf16.msra.mxu1 %v8265_v51 }
 0x12c   : > { %6956 = vmatmul.mubr.bf16.gmra.mrb[4].mxu0 %v1733_v39  ;;  %v764_v39 = vrot.slane %v762_v33, 1  ;;  %v8174_v33 = vld [vmem:[#allocation6 + $0x190] sm:$0xff]  }
 0x12d   : > { %6959 = vmatprep.mubr.msk.bf16.mxu0 %vm8563_vm0, %v8562_v1  ;;  %6992 = vmatpush3.bf16.msra.mxu0 %v8143_v34  ;;  %v1765_v34 = vsel %vm721_vm2, %v1760_v25, %v1764_v27  ;;  %v2093_v25 = vrot.slane %v8170_v22, 1  ;;  %v8171_v27 = vld [vmem:[#allocation6 + $0x188] sm:$0xff]  }
 0x12e   : > { %6993 = vmatprep.subr.bf16.mxu0 %v8562_v1  ;;  %v765_v45 = vsel %vm721_vm2, %v760_v38, %v764_v39  ;;  %v8224_v38 = vld [vmem:[%s8757_s12 + $0x30] sm:$0xff]   ;;  %v8220_v22 = vld [vmem:[%s8757_s12 + $0x48] sm:$0xff]  }
 0x12f   : > { %v2094_v31 = vsel %vm1098_vm1, %v2091_v16, %v2093_v25  ;;  %v1110_v42 = vrot.slane %v8224_v38, 1  ;;  %v8219_v16 = vld [vmem:[#allocation6 + $0x1e8] sm:$0xff]  }
 0x131   : > { %6994 = vmatpush3.bf16.msra.mxu0 %v8147_v46  ;;  %v766_v46 = vshrl.u32 %v8207_v24, 16  ;;  %v796_v24 = vrot.slane %v794_v19, 1  ;;  %v8226_v19 = vld [vmem:[#allocation6 + $0x1f8] sm:$0xff]  }
 0x132   : > { %6995 = vmatprep.subr.bf16.mxu0 %v8562_v1  ;;  %6812 = vmatmul.mubr.bf16.gmra.mrb[16].mxu1 %v765_v45  ;;  %v2098_v45 = vsel %vm1098_vm1, %v2095_v35, %v2097_v26 }
 0x133   : > { %6815 = vmatprep.mubr.msk.bf16.mxu1 %vm8563_vm0, %v8562_v1  ;;  %v768_v52 = vor.u32 %v766_v46, %v764_v39  ;;  %v2096_v39 = vsel %vm1098_vm1, %v2093_v25, %v2095_v35  ;;  %v8182_v46 = vld [vmem:[%s8757_s12 + $0x34] sm:$0xff]   ;;  %v8229_v25 = vld [vmem:[%s8757_s12 + $0x20] sm:$0xff]   ;;  %v8232_v35 = vld [vmem:[%s8757_s12 + $0x28] sm:$0xff]  }
 0x134   : > { %6960 = vmatmul.mubr.bf16.gmra.mrb[8].mxu0 %v1741_v50  ;;  %v1778_v50 = vshll.u32 %v8161_v43, 16  ;;  %v2099_v49 = vrot.slane %v8182_v46, 1  ;;  %v2713_v32 = vshll.u32 %v8229_v25, 16  ;;  %v2717_v38 = vshrl.u32 %v8229_v25, 16 }
 0x135   : > { %6963 = vmatprep.mubr.msk.bf16.mxu0 %vm8563_vm0, %v8562_v1  ;;  %6996 = vmatpush3.bf16.msra.mxu0 %v8152_v53  ;;  %v772_v53 = vrot.slane %v770_v47, 1  ;;  %v8196_v47 = vld [vmem:[#allocation6 + $0x1b0] sm:$0xff]  }
 0x136   : > { %6997 = vmatprep.subr.bf16.mxu0 %v8562_v1  ;;  %v1780_v56 = vrot.slane %v1778_v50, 1  ;;  %v8200_v50 = vld [vmem:[#allocation6 + $0x1b8] sm:$0xff]  }
 0x137   : > { %v773_v58 = vsel %vm721_vm2, %v768_v52, %v772_v53  ;;  %v776_v0 = vor.u32 %v774_v59, %v772_v53  ;;  %v8231_v52 = vld [vmem:[%s8757_s12 + $0x40] sm:$0xff]   ;;  %v2100_v53 = vsel %vm1098_vm1, %v2097_v26, %v2099_v49  ;;  %v8235_v26 = vld [vmem:[%s8757_s12 + $0x30] sm:$0xff]  }
 0x138   : > { %v1781_v61 = vsel %vm721_vm2, %v1776_v55, %v1780_v56  ;;  %v1784_v4 = vor.u32 %v1782_v62, %v1780_v56  ;;  %v1114_v55 = vrot.slane %v8231_v52, 1 }
 0x139   : > { %6998 = vmatpush3.bf16.msra.mxu0 %v8156_v60  ;;  %v778_v60 = vshll.u32 %v8212_v54, 16  ;;  %v8187_v54 = vld [vmem:[%s8757_s12 + $0x3c] sm:$0xff]  }
 0x13a   : > { %6999 = vmatprep.subr.bf16.mxu0 %v8562_v1  ;;  %6816 = vmatmul.mubr.bf16.gmra.mrb[20].mxu1 %v773_v58  ;;  %v2101_v56 = vrot.slane %v8187_v54, 1  ;;  %v8234_v58 = vld [vmem:[%s8757_s12 + $0x48] ss:$0 sps:$4 sm:$0x11]   ;;  %v2733_v54 = vshrl.u32 %v8235_v26, 16 }
 0x13b   : > { %6819 = vmatprep.mubr.msk.bf16.mxu1 %vm8563_vm0, %v8562_v1 }
 0x13c   : > { %6964 = vmatmul.mubr.bf16.gmra.mrb[12].mxu0 %v1749_v2  ;;  %v780_v2 = vrot.slane %v778_v60, 1  ;;  %v2102_v59 = vsel %vm1098_vm1, %v2099_v49, %v2101_v56  ;;  %v8192_v60 = vld [vmem:[%s8757_s12 + $0x44] sm:$0xff]  }
 0x13d   : > { %6967 = vmatprep.mubr.msk.bf16.mxu0 %vm8563_vm0, %v8562_v1  ;;  %7000 = vmatpush3.bf16.msra.mxu0 %v8160_v5  ;;  %v1788_v5 = vrot.slane %v1786_v63, 1  ;;  %v2103_v62 = vrot.slane %v8192_v60, 1  ;;  %v8238_v49 = vld [vmem:[#allocation6 + $0x218] sm:$0xff]  }
 0x13e   : > { %7001 = vmatprep.subr.bf16.mxu0 %v8562_v1  ;;  %v781_v6 = vsel %vm721_vm2, %v776_v0, %v780_v2  ;;  %v784_v12 = vor.u32 %v782_v7, %v780_v2  ;;  %v8197_v2 = vld [vmem:[%s8757_s12 + $0x4c] sm:$0xff]   ;;  %v8239_v60 = vld [vmem:[%s8757_s12 + $0x40] sm:$0xff]  }
 0x13f   : > { %v1789_v9 = vsel %vm721_vm2, %v1784_v4, %v1788_v5  ;;  %v2104_v0 = vsel %vm1098_vm1, %v2101_v56, %v2103_v62  ;;  %v8199_v5 = vld [vmem:[%s8757_s12 + $0x54] ss:$0 sps:$4 sm:$0x11]   ;;  %v8240_v56 = vld [vmem:[#allocation6 + $0x220] sm:$0xff]  }
 0x141   : > { %7002 = vmatpush3.bf16.msra.mxu0 %v8164_v13  ;;  %v788_v13 = vrot.slane %v786_v8, 1  ;;  %v8202_v8 = vld [vmem:[%s8757_s12 + $0x18] sm:$0xff]  }
 0x142   : > { %7039 = vmatprep.subr.bf16.mxu0 %v8562_v1  ;;  %6820 = vmatmul.mubr.bf16.gmra.mrb[24].mxu1 %v781_v6  ;;  %v2107_v6 = vrot.slane %v8199_v5, 1  ;;  %v8244_v5 = vld [vmem:[#allocation6 + $0x230] sm:$0xff]  }
 0x143   : > { %6823 = vmatprep.mubr.msk.bf16.mxu1 %vm8563_vm0, %v8562_v1  ;;  %v789_v17 = vsel %vm721_vm2, %v784_v12, %v788_v13  ;;  %v8209_v12 = vld [vmem:[#allocation6 + $0x1d0] sm:$0xff]  }
 0x144   : > { %6968 = vmatmul.mubr.bf16.gmra.mrb[16].mxu0 %v1757_v18  ;;  %v790_v18 = vshrl.u32 %v8215_v3, 16  ;;  %v2105_v3 = vrot.slane %v8197_v2, 1 }
 0x145   : > { %6971 = vmatprep.mubr.msk.bf16.mxu0 %vm8563_vm0, %v8562_v1 }
 0x146   : > { %v792_v23 = vor.u32 %v790_v18, %v788_v13  ;;  %v2106_v4 = vsel %vm1098_vm1, %v2103_v62, %v2105_v3  ;;  %v2108_v7 = vsel %vm1098_vm1, %v2105_v3, %v2107_v6  ;;  %v8213_v13 = vld [vmem:[#allocation6 + $0x1d8] sm:$0xff]   ;;  %v8222_v18 = vld [vmem:[#allocation6 + $0x1f0] sm:$0xff]  }
 0x148   : > { %v797_v28 = vsel %vm721_vm2, %v792_v23, %v796_v24  ;;  %v8223_v23 = vld [vmem:[%s8757_s12 + $0x50] sm:$0xff]   ;;  %v8228_v24 = vld [vmem:[%s8757_s12 + $0x18] sm:$0xff]  }
 0x14a   : > { %6824 = vmatmul.mubr.bf16.gmra.mrb[28].mxu1 %v789_v17  ;;  %v8211_v17 = vld [vmem:[%s8757_s12 + $0x30] sm:$0xff]  }
 0x14b   : > { %6827 = vmatprep.mubr.msk.bf16.mxu1 %vm8563_vm0, %v8562_v1 }
 0x14c   : > { %6972 = vmatmul.mubr.bf16.gmra.mrb[20].mxu0 %v1765_v34  ;;  %v1108_v34 = vrot.slane %v8221_v29, 1  ;;  %v2706_v29 = vshrl.u32 %v8228_v24, 16 }
 0x14d   : > { %6975 = vmatprep.mubr.msk.bf16.mxu0 %vm8563_vm0, %v8562_v1 }
 0x14e   : > { %v1109_v37 = vsel %vm1098_vm1, %v1106_v30, %v1108_v34  ;;  %v8191_v30 = vld [vmem:[#allocation6 + $0x1a8] sm:$0xff]   ;;  %v1111_v43 = vsel %vm1098_vm1, %v1108_v34, %v1110_v42  ;;  %v2715_v34 = vrot.slane %v2713_v32, 1  ;;  %v8245_v32 = vld [vmem:[%s8757_s12 + $0x58] sm:$0xff]  }
 0x150   : > { %v2719_v40 = vor.u32 %v2717_v38, %v2715_v34  ;;  %v8246_v38 = vld [vmem:[%s8757_s12 + $0x60] ss:$0 sps:$4 sm:$0x11]  }
 0x152   : > { %6828 = vmatmul.mubr.bf16.gmra.mrb[32].mxu1 %v797_v28  ;;  %v8225_v28 = vld [vmem:[%s8757_s12 + $0x58] sm:$0xff]  }
 0x153   : > { %6863 = vmatprep.mubr.msk.bf16.mxu1 %vm8563_vm0, %v8562_v1 }
 0x154   : > { %6976 = vmatmul.mubr.bf16.gmra.mrb[24].mxu0 %v1773_v48  ;;  %v1112_v48 = vrot.slane %v8227_v44, 1  ;;  %v2729_v44 = vshll.u32 %v8235_v26, 16 }
 0x155   : > { %6979 = vmatprep.mubr.msk.bf16.mxu0 %vm8563_vm0, %v8562_v1 }
 0x156   : > { %v1113_v51 = vsel %vm1098_vm1, %v1110_v42, %v1112_v48  ;;  %v1115_v57 = vsel %vm1098_vm1, %v1112_v48, %v1114_v55  ;;  %v8233_v42 = vld [vmem:[#allocation6 + $0x208] sm:$0xff]   ;;  %v8237_v48 = vld [vmem:[%s8757_s12 + $0x38] sm:$0xff]  }
 0x157   : > { %v2741_v3 = vshrl.u32 %v8237_v48, 16 }
 0x15a   : > { %6864 = vmatmul.mubr.bf16.vlgmr.msra.gmra.mrb[16].mxu1 %v1109_v37  ;;  %v8230_v37 = vld [vmem:[#allocation6 + $0x200] sm:$0xff]  }
 0x15b   : > { %6867 = vmatprep.mubr.msk.bf16.mxu1 %vm8563_vm0, %v8562_v1 }
 0x15c   : > { %6980 = vmatmul.mubr.bf16.gmra.mrb[28].mxu0 %v1781_v61  ;;  %v1116_v61 = vrot.slane %v8234_v58, 1 }
 0x15d   : > { %6983 = vmatprep.mubr.msk.bf16.mxu0 %vm8563_vm0, %v8562_v1 }
 0x15e   : > { %v1117_v63 = vsel %vm1098_vm1, %v1114_v55, %v1116_v61  ;;  %v2737_v55 = vshll.u32 %v8237_v48, 16  ;;  %v8242_v61 = vld [vmem:[#allocation6 + $0x228] sm:$0xff]  }
 0x15f   : > { %v8250_v48 = vld [vmem:[%s8757_s12 + $0x28] sm:$0xff]  }
 0x162   : > { %6868 = vmatmul.mubr.bf16.gmra.mrb[20].mxu1 %v1111_v43  ;;  %v2725_v43 = vshrl.u32 %v8232_v35, 16 }
 0x163   : > { %6871 = vmatprep.mubr.msk.bf16.mxu1 %vm8563_vm0, %v8562_v1 }
 0x164   : > { %6984 = vmatmul.mubr.bf16.gmra.mrb[32].mxu0 %v1789_v9  ;;  %v8203_v9 = vld [vmem:[#allocation6 + $0x1c0] sm:$0xff]  }
 0x165   : > { %7003 = vmatprep.mubr.msk.bf16.mxu0 %vm8563_vm0, %v8562_v1 }
 0x16a   : > { %6872 = vmatmul.mubr.bf16.gmra.mrb[24].mxu1 %v1113_v51 }
 0x16b   : > { %6875 = vmatprep.mubr.msk.bf16.mxu1 %vm8563_vm0, %v8562_v1 }
 0x16c   : > { %7004 = vmatmul.mubr.bf16.vlgmr.msra.gmra.mrb[0].mxu0 %v2092_v20  ;;  %v8214_v20 = vld [vmem:[%s8757_s12 + $0x38] sm:$0xff]  }
 0x16d   : > { %7040 = vmatpush3.bf16.msra.mxu0 %v8168_v21  ;;  %7007 = vmatprep.mubr.msk.bf16.mxu0 %vm8563_vm0, %v8562_v1  ;;  %v8217_v21 = vld [vmem:[%s8757_s12 + $0x40] sm:$0xff]  }
 0x16e   : > { %7041 = vmatprep.subr.bf16.mxu0 %v8562_v1 }
 0x171   : > { %7042 = vmatpush3.bf16.msra.mxu0 %v8171_v27  ;;  %v2708_v27 = vshll.u32 %v8228_v24, 16 }
 0x172   : > { %7043 = vmatprep.subr.bf16.mxu0 %v8562_v1  ;;  %6876 = vmatmul.mubr.bf16.gmra.mrb[28].mxu1 %v1115_v57 }
 0x173   : > { %6879 = vmatprep.mubr.msk.bf16.mxu1 %vm8563_vm0, %v8562_v1 }
 0x174   : > { %7008 = vmatmul.mubr.bf16.gmra.mrb[4].mxu0 %v2094_v31  ;;  %v2710_v31 = vrot.slane %v2708_v27, 1 }
 0x175   : > { %7011 = vmatprep.mubr.msk.bf16.mxu0 %vm8563_vm0, %v8562_v1  ;;  %7044 = vmatpush3.bf16.msra.mxu0 %v8174_v33 }
 0x176   : > { %7045 = vmatprep.subr.bf16.mxu0 %v8562_v1  ;;  %v2711_v33 = vor.u32 %v2710_v31, %v2706_v29 }
 0x179   : > { %7046 = vmatpush3.bf16.msra.mxu0 %v8180_v36  ;;  %v2716_v36 = vsel %vm721_vm2, %v2711_v33, %v2715_v34 }
 0x17a   : > { %7047 = vmatprep.subr.bf16.mxu0 %v8562_v1  ;;  %6880 = vmatmul.mubr.bf16.gmra.mrb[32].mxu1 %v1117_v63 }
 0x17c   : > { %7012 = vmatmul.mubr.bf16.gmra.mrb[8].mxu0 %v2096_v39  ;;  %v2721_v39 = vshll.u32 %v8232_v35, 16  ;;  %v2769_v35 = vshll.u32 %v8245_v32, 16 }
 0x17d   : > { %7015 = vmatprep.mubr.msk.bf16.mxu0 %vm8563_vm0, %v8562_v1  ;;  %7048 = vmatpush3.bf16.msra.mxu0 %v8186_v41 }
 0x17e   : > { %7049 = vmatprep.subr.bf16.mxu0 %v8562_v1  ;;  %v2723_v41 = vrot.slane %v2721_v39, 1 }
 0x180   : > { %v2727_v46 = vor.u32 %v2725_v43, %v2723_v41  ;;  %v8248_v43 = vld [vmem:[%s8757_s12 + $0x18] sm:$0xfe]  }
 0x181   : > { %7050 = vmatpush3.bf16.msra.mxu0 %v8191_v30  ;;  %v2724_v30 = vsel %vm721_vm2, %v2719_v40, %v2723_v41  ;;  %v2773_v40 = vshrl.u32 %v8245_v32, 16  ;;  %v2777_v41 = vshll.u32 %v8246_v38, 16  ;;  %v8256_v32 = vld [vmem:[%s8757_s12 + $0x58] sm:$0xff]  }
 0x182   : > { %7051 = vmatprep.subr.bf16.mxu0 %v8562_v1 }
 0x183   : > { %v2779_v26 = vrot.slane %v2777_v41, 1 }
 0x184   : > { %7016 = vmatmul.mubr.bf16.gmra.mrb[12].mxu0 %v2098_v45  ;;  %v8236_v45 = vld [vmem:[#allocation6 + $0x210] sm:$0xff]  }
 0x185   : > { %7019 = vmatprep.mubr.msk.bf16.mxu0 %vm8563_vm0, %v8562_v1  ;;  %7052 = vmatpush3.bf16.msra.mxu0 %v8196_v47  ;;  %v2731_v47 = vrot.slane %v2729_v44, 1  ;;  %v8249_v44 = vld [vmem:[%s8757_s12 + $0x20] sm:$0xff]  }
 0x186   : > { %7053 = vmatprep.subr.bf16.mxu0 %v8562_v1 }
 0x187   : > { %v2735_v58 = vor.u32 %v2733_v54, %v2731_v47 }
 0x189   : > { %7054 = vmatpush3.bf16.msra.mxu0 %v8200_v50 }
 0x18a   : > { %7091 = vmatprep.subr.bf16.mxu0 %v8562_v1 }
 0x18c   : > { %7020 = vmatmul.mubr.bf16.gmra.mrb[16].mxu0 %v2100_v53  ;;  %v2732_v53 = vsel %vm721_vm2, %v2727_v46, %v2731_v47  ;;  %v3082_v46 = vrot.slane %v8249_v44, 1 }
 0x18d   : > { %7023 = vmatprep.mubr.msk.bf16.mxu0 %vm8563_vm0, %v8562_v1 }
 0x194   : > { %7024 = vmatmul.mubr.bf16.gmra.mrb[20].mxu0 %v2102_v59  ;;  %v2739_v59 = vrot.slane %v2737_v55, 1 }
 0x195   : > { %7027 = vmatprep.mubr.msk.bf16.mxu0 %vm8563_vm0, %v8562_v1 }
 0x196   : > { %v2740_v2 = vsel %vm721_vm2, %v2735_v58, %v2739_v59 }
 0x19c   : > { %7028 = vmatmul.mubr.bf16.gmra.mrb[24].mxu0 %v2104_v0 }
 0x19d   : > { %7031 = vmatprep.mubr.msk.bf16.mxu0 %vm8563_vm0, %v8562_v1 }
 0x1a4   : > { %7032 = vmatmul.mubr.bf16.gmra.mrb[28].mxu0 %v2106_v4  ;;  %v2745_v4 = vshll.u32 %v8239_v60, 16 }
 0x1a5   : > { %7035 = vmatprep.mubr.msk.bf16.mxu0 %vm8563_vm0, %v8562_v1 }
 0x1ac   : > { %7036 = vmatmul.mubr.bf16.gmra.mrb[32].mxu0 %v2108_v7  ;;  %v2743_v7 = vor.u32 %v2741_v3, %v2739_v59  ;;  %v8252_v59 = vld [vmem:[%s8757_s12 + $0x38] sm:$0xff]  }
 0x1ad   : > { %7055 = vmatprep.mubr.msk.bf16.mxu0 %vm8563_vm0, %v8562_v1 }
 0x1b4   : > { %7056 = vmatmul.mubr.bf16.vlgmr.msra.gmra.mrb[0].mxu0 %v8202_v8  ;;  %v2747_v8 = vrot.slane %v2745_v4, 1 }
 0x1b5   : > { %7092 = vmatpush3.bf16.msra.mxu0 %v8203_v9  ;;  %7059 = vmatprep.mubr.msk.bf16.mxu0 %vm8563_vm0, %v8562_v1  ;;  %v8241_v9 = vld [vmem:[%s8757_s12 + $0x48] sm:$0xff]  }
 0x1b6   : > { %7093 = vmatprep.subr.bf16.mxu0 %v8562_v1  ;;  %v2757_v25 = vshrl.u32 %v8241_v9, 16 }
 0x1b9   : > { %7094 = vmatpush3.bf16.msra.mxu0 %v8206_v10  ;;  %v8247_v10 = vld [vmem:[#allocation6 + $0x238] sm:$0xff]  }
 0x1ba   : > { %7095 = vmatprep.subr.bf16.mxu0 %v8562_v1 }
 0x1bc   : > { %7060 = vmatmul.mubr.bf16.gmra.mrb[4].mxu0 %v8205_v11 }
 0x1bd   : > { %7063 = vmatprep.mubr.msk.bf16.mxu0 %vm8563_vm0, %v8562_v1  ;;  %7096 = vmatpush3.bf16.msra.mxu0 %v8209_v12 }
 0x1be   : > { %7097 = vmatprep.subr.bf16.mxu0 %v8562_v1 }
 0x1c1   : > { %7098 = vmatpush3.bf16.msra.mxu0 %v8213_v13 }
 0x1c2   : > { %7099 = vmatprep.subr.bf16.mxu0 %v8562_v1 }
 0x1c4   : > { %7064 = vmatmul.mubr.bf16.gmra.mrb[8].mxu0 %v8208_v14  ;;  %v2748_v14 = vsel %vm721_vm2, %v2743_v7, %v2747_v8 }
 0x1c5   : > { %7067 = vmatprep.mubr.msk.bf16.mxu0 %vm8563_vm0, %v8562_v1  ;;  %7100 = vmatpush3.bf16.msra.mxu0 %v8216_v15  ;;  %v2749_v15 = vshrl.u32 %v8239_v60, 16 }
 0x1c6   : > { %7101 = vmatprep.subr.bf16.mxu0 %v8562_v1 }
 0x1c9   : > { %7102 = vmatpush3.bf16.msra.mxu0 %v8219_v16  ;;  %v2753_v16 = vshll.u32 %v8241_v9, 16 }
 0x1ca   : > { %7103 = vmatprep.subr.bf16.mxu0 %v8562_v1 }
 0x1cc   : > { %7068 = vmatmul.mubr.bf16.gmra.mrb[12].mxu0 %v8211_v17 }
 0x1cd   : > { %7071 = vmatprep.mubr.msk.bf16.mxu0 %vm8563_vm0, %v8562_v1  ;;  %7104 = vmatpush3.bf16.msra.mxu0 %v8222_v18  ;;  %v2751_v18 = vor.u32 %v2749_v15, %v2747_v8 }
 0x1ce   : > { %7105 = vmatprep.subr.bf16.mxu0 %v8562_v1 }
 0x1d1   : > { %7106 = vmatpush3.bf16.msra.mxu0 %v8226_v19  ;;  %v2755_v19 = vrot.slane %v2753_v16, 1 }
 0x1d2   : > { %7143 = vmatprep.subr.bf16.mxu0 %v8562_v1 }
 0x1d3   : > { %v2756_v24 = vsel %vm721_vm2, %v2751_v18, %v2755_v19  ;;  %v2759_v29 = vor.u32 %v2757_v25, %v2755_v19 }
 0x1d4   : > { %7072 = vmatmul.mubr.bf16.gmra.mrb[16].mxu0 %v8214_v20  ;;  %v8243_v20 = vld [vmem:[%s8757_s12 + $0x50] sm:$0xff]  }
 0x1d5   : > { %7075 = vmatprep.mubr.msk.bf16.mxu0 %vm8563_vm0, %v8562_v1  ;;  %v2761_v27 = vshll.u32 %v8243_v20, 16  ;;  %v2765_v34 = vshrl.u32 %v8243_v20, 16 }
 0x1d7   : > { %v2763_v31 = vrot.slane %v2761_v27, 1 }
 0x1d9   : > { %v2764_v33 = vsel %vm721_vm2, %v2759_v29, %v2763_v31 }
 0x1dc   : > { %7076 = vmatmul.mubr.bf16.gmra.mrb[20].mxu0 %v8217_v21 }
 0x1dd   : > { %7079 = vmatprep.mubr.msk.bf16.mxu0 %vm8563_vm0, %v8562_v1 }
 0x1e1   : > { %v9142_v50 = vpop.f32.mrb[0].mxu1 }
 0x1e2   : > { %v6797_v51 = vpop.f32.mrb[1].mxu1 }
 0x1e3   : > { %v9144_v52 = vpop.f32.mrb[2].mxu1 }
 0x1e4   : > { %7080 = vmatmul.mubr.bf16.gmra.mrb[24].mxu0 %v8220_v22  ;;  %v6798_v57 = vpop.f32.mrb[3].mxu1 }
 0x1e5   : > { %7083 = vmatprep.mubr.msk.bf16.mxu0 %vm8563_vm0, %v8562_v1 }
 0x1e9   : > { %v9152_v62 = vpop.f32.mrb[4].mxu1 }
 0x1ea   : > { %v6801_v63 = vpop.f32.mrb[5].mxu1 }
 0x1eb   : > { %v9154_v0 = vpop.f32.mrb[6].mxu1 }
 0x1ec   : > { %7084 = vmatmul.mubr.bf16.gmra.mrb[28].mxu0 %v8223_v23  ;;  %v6802_v6 = vpop.f32.mrb[7].mxu1 }
 0x1ed   : > { %7087 = vmatprep.mubr.msk.bf16.mxu0 %vm8563_vm0, %v8562_v1 }
 0x1f1   : > { %v9162_v11 = vpop.f32.mrb[8].mxu1 }
 0x1f2   : > { %v6805_v12 = vpop.f32.mrb[9].mxu1 }
 0x1f3   : > { %v9164_v13 = vpop.f32.mrb[10].mxu1 }
 0x1f4   : > { %7088 = vmatmul.mubr.bf16.gmra.mrb[32].mxu0 %v8225_v28  ;;  %v6806_v17 = vpop.f32.mrb[11].mxu1 }
 0x1f5   : > { %7107 = vmatprep.mubr.msk.bf16.mxu0 %vm8563_vm0, %v8562_v1 }
 0x1fc   : > { %7108 = vmatmul.mubr.bf16.vlgmr.msra.gmra.mrb[0].mxu0 %v2716_v36  ;;  %v2767_v36 = vor.u32 %v2765_v34, %v2763_v31  ;;  %v3096_v34 = vrot.slane %v8256_v32, 1 }
 0x1fd   : > { %7144 = vmatpush3.bf16.msra.mxu0 %v8230_v37  ;;  %7111 = vmatprep.mubr.msk.bf16.mxu0 %vm8563_vm0, %v8562_v1  ;;  %v9170_v21 = vpop.f32.mrb[12].mxu1  ;;  %v2771_v37 = vrot.slane %v2769_v35, 1 }
 0x1fe   : > { %7145 = vmatprep.subr.bf16.mxu0 %v8562_v1  ;;  %v6809_v22 = vpop.f32.mrb[13].mxu1 }
 0x1ff   : > { %v9172_v23 = vpop.f32.mrb[14].mxu1  ;;  %v2772_v39 = vsel %vm721_vm2, %v2767_v36, %v2771_v37  ;;  %v8255_v22 = vld [vmem:[%s8757_s12 + $0x50] sm:$0xff]   ;;  %v8257_v36 = vld [vmem:[%s8757_s12 + $0x60] ss:$0 sps:$4 sm:$0x11]  }
 0x200   : > { %v6810_v28 = vpop.f32.mrb[15].mxu1  ;;  %v3094_v25 = vrot.slane %v8255_v22, 1 }
 0x201   : > { %7146 = vmatpush3.bf16.msra.mxu0 %v8233_v42  ;;  %v2775_v42 = vor.u32 %v2773_v40, %v2771_v37  ;;  %v3098_v37 = vrot.slane %v8257_v36, 1 }
 0x202   : > { %7147 = vmatprep.subr.bf16.mxu0 %v8562_v1  ;;  %v3097_v35 = vsel %vm1098_vm1, %v3094_v25, %v3096_v34 }
 0x203   : > { %v3099_v38 = vsel %vm1098_vm1, %v3096_v34, %v3098_v37 }
 0x204   : > { %7112 = vmatmul.mubr.bf16.gmra.mrb[4].mxu0 %v2724_v30  ;;  %v2780_v30 = vsel %vm721_vm2, %v2775_v42, %v2779_v26 }
 0x205   : > { %7115 = vmatprep.mubr.msk.bf16.mxu0 %vm8563_vm0, %v8562_v1  ;;  %7148 = vmatpush3.bf16.msra.mxu0 %v8236_v45  ;;  %v3081_v45 = vrot.slane %v8248_v43, 1 }
 0x206   : > { %7149 = vmatprep.subr.bf16.mxu0 %v8562_v1 }
 0x207   : > { %v3083_v47 = vsel %vm1098_vm1, %v3081_v45, %v3082_v46 }
 0x209   : > { %7150 = vmatpush3.bf16.msra.mxu0 %v8238_v49  ;;  %v3084_v49 = vrot.slane %v8250_v48, 1 }
 0x20a   : > { %7151 = vmatprep.subr.bf16.mxu0 %v8562_v1 }
 0x20b   : > { %v3085_v51 = vsel %vm1098_vm1, %v3082_v46, %v3084_v49 }
 0x20c   : > { %7116 = vmatmul.mubr.bf16.gmra.mrb[8].mxu0 %v2732_v53  ;;  %v8251_v53 = vld [vmem:[%s8757_s12 + $0x30] sm:$0xff]  }
 0x20d   : > { %7119 = vmatprep.mubr.msk.bf16.mxu0 %vm8563_vm0, %v8562_v1  ;;  %7152 = vmatpush3.bf16.msra.mxu0 %v8240_v56  ;;  %v3086_v54 = vrot.slane %v8251_v53, 1 }
 0x20e   : > { %7153 = vmatprep.subr.bf16.mxu0 %v8562_v1 }
 0x20f   : > { %v3087_v58 = vsel %vm1098_vm1, %v3084_v49, %v3086_v54 }
 0x211   : > { %7154 = vmatpush3.bf16.msra.mxu0 %v8242_v61  ;;  %v3088_v61 = vrot.slane %v8252_v59, 1 }
 0x212   : > { %7155 = vmatprep.subr.bf16.mxu0 %v8562_v1 }
 0x213   : > { %v3089_v4 = vsel %vm1098_vm1, %v3086_v54, %v3088_v61 }
 0x214   : > { %7120 = vmatmul.mubr.bf16.gmra.mrb[12].mxu0 %v2740_v2 }
 0x215   : > { %7123 = vmatprep.mubr.msk.bf16.mxu0 %vm8563_vm0, %v8562_v1  ;;  %7156 = vmatpush3.bf16.msra.mxu0 %v8244_v5  ;;  %v8253_v5 = vld [vmem:[%s8757_s12 + $0x40] sm:$0xff]  }
 0x216   : > { %7157 = vmatprep.subr.bf16.mxu0 %v8562_v1  ;;  %v3090_v7 = vrot.slane %v8253_v5, 1 }
 0x218   : > { %v3091_v12 = vsel %vm1098_vm1, %v3088_v61, %v3090_v7 }
 0x219   : > { %7158 = vmatpush3.bf16.msra.mxu0 %v8247_v10 }
 0x21c   : > { %7124 = vmatmul.mubr.bf16.gmra.mrb[16].mxu0 %v2748_v14  ;;  %v8254_v14 = vld [vmem:[%s8757_s12 + $0x48] sm:$0xff]  }
 0x21d   : > { %7127 = vmatprep.mubr.msk.bf16.mxu0 %vm8563_vm0, %v8562_v1  ;;  %v3092_v16 = vrot.slane %v8254_v14, 1 }
 0x21f   : > { %v3093_v20 = vsel %vm1098_vm1, %v3090_v7, %v3092_v16  ;;  %v3095_v31 = vsel %vm1098_vm1, %v3092_v16, %v3094_v25 }
 0x224   : > { %7128 = vmatmul.mubr.bf16.gmra.mrb[20].mxu0 %v2756_v24 }
 0x225   : > { %7131 = vmatprep.mubr.msk.bf16.mxu0 %vm8563_vm0, %v8562_v1 }
 0x22c   : > { %7132 = vmatmul.mubr.bf16.gmra.mrb[24].mxu0 %v2764_v33 }
 0x22d   : > { %7135 = vmatprep.mubr.msk.bf16.mxu0 %vm8563_vm0, %v8562_v1  ;;  %v9198_v55 = vpop.f32.mrb[16].mxu1 }
 0x22e   : > { %v6865_v56 = vpop.f32.mrb[17].mxu1 }
 0x22f   : > { %v9200_v57 = vpop.f32.mrb[18].mxu1 }
 0x230   : > { %v6866_v60 = vpop.f32.mrb[19].mxu1 }
 0x234   : > { %7136 = vmatmul.mubr.bf16.gmra.mrb[28].mxu0 %v2772_v39  ;;  %v3298_v39 = vlaneseq }
 0x235   : > { %7139 = vmatprep.mubr.msk.bf16.mxu0 %vm8563_vm0, %v8562_v1  ;;  %v9206_v63 = vpop.f32.mrb[20].mxu1 }
 0x236   : > { %v6869_v2 = vpop.f32.mrb[21].mxu1  ;;  %v9243_v40 = vshrl.u32 %v3298_v39, 7 }
 0x237   : > { %v9208_v3 = vpop.f32.mrb[22].mxu1 }
 0x238   : > { %v6870_v6 = vpop.f32.mrb[23].mxu1  ;;  %v3300_v41 = vadd.s32 8, %v9243_v40  ;;  %v9247_v42 = vmul.u32.u64.low 2863311531, %v9243_v40  ;;  %v9248_v26 = vmul.u32.u64.high 2863311531, %v9243_v40, %v9247_v42  ;;  %v3302_v43 = vadd.s32 24, %v9243_v40 }
 0x239   : > { %v3303_v53 = vadd.s32 32, %v9243_v40  ;;  %v3304_v54 = vadd.s32 40, %v9243_v40 }
 0x23a   : > { %v9252_v44 = vmul.u32.u64.low 2863311531, %v3300_v41  ;;  %v9253_v45 = vmul.u32.u64.high 2863311531, %v3300_v41, %v9252_v44  ;;  %v9258_v48 = vmul.u32.u64.low 2863311531, %v3302_v43  ;;  %v9259_v49 = vmul.u32.u64.high 2863311531, %v3302_v43, %v9258_v48 }
 0x23b   : > { %v9266_v60 = vmul.u32.u64.low 2863311531, %v3303_v53  ;;  %v9267_v61 = vmul.u32.u64.high 2863311531, %v3303_v53, %v9266_v60  ;;  %v9409_v48 = vadd.s32 88, %v9243_v40 }
 0x23c   : > { %7140 = vmatmul.mubr.bf16.gmra.mrb[32].mxu0 %v2780_v30  ;;  %v3301_v30 = vadd.s32 16, %v9243_v40  ;;  %v3334_v56 = vshrl.u32 %v9253_v45, 4  ;;  %v3356_v2 = vshrl.u32 %v9259_v49, 4 }
 0x23d   : > { %7159 = vmatprep.mubr.msk.bf16.mxu0 %vm8563_vm0, %v8562_v1  ;;  %v9214_v8 = vpop.f32.mrb[24].mxu1 }
 0x23e   : > { %v6873_v9 = vpop.f32.mrb[25].mxu1  ;;  %v3335_v6 = vmul.u32 24, %v3334_v56  ;;  %v3357_v14 = vmul.u32 24, %v3356_v2 }
 0x23f   : > { %v9216_v10 = vpop.f32.mrb[26].mxu1 }
 0x240   : > { %v6874_v15 = vpop.f32.mrb[27].mxu1  ;;  %v3336_v16 = vsub.s32 %v3300_v41, %v3335_v6  ;;  %v3358_v25 = vsub.s32 %v3302_v43, %v3357_v14  ;;  %v9302_v41 = vadd.s32 72, %v9243_v40 }
 0x241   : > { %v9278_v15 = vadd.s32 56, %v9243_v40 }
 0x242   : > { %vm3516_vm5 = vcmp.ne.s32.totalorder %v3336_v16, 0  ;;  %vm3534_vm6 = vcmp.lt.s32.totalorder %v3336_v16, 0  ;;  %v3570_v36 = vadd.s32 24, %v3336_v16  ;;  %vm3518_vm11 = vcmp.ne.s32.totalorder %v3358_v25, 0 }
 0x243   : > { %vm9297_vm10 = vmand %vm3534_vm6, %vm3516_vm5  ;;  %vm3536_vm12 = vcmp.lt.s32.totalorder %v3358_v25, 0  ;;  %v3572_v44 = vadd.s32 24, %v3358_v25 }
 0x244   : > { %7160 = vmatmul.mubr.bf16.vlgmr.msra.gmra.mrb[0].mxu0 %v3083_v47  ;;  %v9255_v46 = vmul.u32.u64.low 2863311531, %v3301_v30  ;;  %v9256_v47 = vmul.u32.u64.high 2863311531, %v3301_v30, %v9255_v46  ;;  %vm9321_vm14 = vmand %vm3536_vm12, %vm3518_vm11 }
 0x245   : > { %7163 = vmatprep.mubr.msk.bf16.mxu0 %vm8563_vm0, %v8562_v1  ;;  %v9222_v17 = vpop.f32.mrb[28].mxu1 }
 0x246   : > { %v6877_v18 = vpop.f32.mrb[29].mxu1  ;;  %v3345_v59 = vshrl.u32 %v9256_v47, 4  ;;  %v3588_v47 = vsel %vm9297_vm10, %v3570_v36, %v3336_v16 }
 0x247   : > { %v9224_v19 = vpop.f32.mrb[30].mxu1 }
 0x248   : > { %v6878_v24 = vpop.f32.mrb[31].mxu1  ;;  %v3346_v9 = vmul.u32 24, %v3345_v59  ;;  %v9332_v59 = vmul.u32.u64.low 2863311531, %v9302_v41  ;;  %v9333_v60 = vmul.u32.u64.high 2863311531, %v9302_v41, %v9332_v59 }
 0x24a   : > { %v3347_v18 = vsub.s32 %v3301_v30, %v3346_v9  ;;  %v9394_v30 = vadd.s32 80, %v9243_v40 }
 0x24c   : > { %7164 = vmatmul.mubr.bf16.gmra.mrb[4].mxu0 %v3085_v51  ;;  %v3323_v51 = vshrl.u32 %v9248_v26, 4  ;;  %vm3517_vm8 = vcmp.ne.s32.totalorder %v3347_v18, 0  ;;  %vm3535_vm9 = vcmp.lt.s32.totalorder %v3347_v18, 0  ;;  %v9309_v26 = vld [vmem:[%s10043_s2] ss:$0 sm:$0xff]  ;;  %v3571_v43 = vadd.s32 24, %v3347_v18 }
 0x24d   : > { %7167 = vmatprep.mubr.msk.bf16.mxu0 %vm8563_vm0, %v8562_v1  ;;  %v9230_v27 = vpop.f32.mrb[32].mxu1  ;;  %vm9311_vm13 = vmand %vm3535_vm9, %vm3517_vm8  ;;  %v7471_v2 = vadd.f32 %v9309_v26, %v9144_v52  ;;  %v7477_v34 = vadd.f32 %v9309_v26, %v9152_v62  ;;  %v3422_v62 = vshrl.u32 %v9333_v60, 4 }
 0x24e   : > { %v6881_v28 = vpop.f32.mrb[33].mxu1 }
 0x24f   : > { %v9232_v29 = vpop.f32.mrb[34].mxu1 }
 0x250   : > { %v6882_v33 = vpop.f32.mrb[35].mxu1 }
 0x254   : > { %7168 = vmatmul.mubr.bf16.gmra.mrb[8].mxu0 %v3087_v58  ;;  %v3324_v58 = vmul.u32 24, %v3323_v51 }
 0x255   : > { %7171 = vmatprep.mubr.msk.bf16.mxu0 %vm8563_vm0, %v8562_v1 }
 0x256   : > { %v3325_v7 = vsub.s32 %v9243_v40, %v3324_v58 }
 0x258   : > { %vm3515_vm3 = vcmp.ne.s32.totalorder %v3325_v7, 0  ;;  %vm3533_vm4 = vcmp.lt.s32.totalorder %v3325_v7, 0  ;;  %v3569_v33 = vadd.s32 24, %v3325_v7 }
 0x259   : > { %vm9290_vm7 = vmand %vm3533_vm4, %vm3515_vm3 }
 0x25a   : > { %v3587_v42 = vsel %vm9290_vm7, %v3569_v33, %v3325_v7 }
 0x25b   : > { %vm3605_vm15 = vcmp.lt.s32.totalorder %v3587_v42, 16 }
 0x25c   : > { %7172 = vmatmul.mubr.bf16.gmra.mrb[12].mxu0 %v3089_v4  ;;  %v9270_v4 = vmul.u32.u64.low 2863311531, %v3304_v54  ;;  %v9271_v5 = vmul.u32.u64.high 2863311531, %v3304_v54, %v9270_v4  ;;  %v6314_v52 = vsel %vm3605_vm15, 1.0, %v8562_v1 }
 0x25d   : > { %7175 = vmatprep.mubr.msk.bf16.mxu0 %vm8563_vm0, %v8562_v1 }
 0x25e   : > { %v3378_v28 = vshrl.u32 %v9271_v5, 4  ;;  %v3590_v5 = vsel %vm9321_vm14, %v3572_v44, %v3358_v25 }
 0x25f   : > { %vm9359_vm7 = vcmp.lt.s32.totalorder %v3590_v5, 16 }
 0x260   : > { %v3379_v39 = vmul.u32 24, %v3378_v28 }
 0x262   : > { %v9328_v56 = vsub.s32 %v3304_v54, %v3379_v39  ;;  %v3589_v54 = vsel %vm9311_vm13, %v3571_v43, %v3347_v18  ;;  %v7483_v39 = vadd.f32 %v9309_v26, %v9154_v0 }
 0x263   : > { %vm9355_vm6 = vcmp.lt.s32.totalorder %v3589_v54, 16 }
 0x264   : > { %7176 = vmatmul.mubr.bf16.gmra.mrb[16].mxu0 %v3091_v12  ;;  %v9275_v12 = vadd.s32 48, %v9243_v40  ;;  %vm3520_vm4 = vcmp.ne.s32.totalorder %v9328_v56, 0  ;;  %vm3538_vm5 = vcmp.lt.s32.totalorder %v9328_v56, 0 }
 0x265   : > { %7179 = vmatprep.mubr.msk.bf16.mxu0 %vm8563_vm0, %v8562_v1  ;;  %vm9380_vm9 = vmand %vm3538_vm5, %vm3520_vm4 }
 0x266   : > { %v9282_v22 = vmul.u32.u64.low 2863311531, %v9275_v12  ;;  %v9283_v24 = vmul.u32.u64.high 2863311531, %v9275_v12, %v9282_v22 }
 0x268   : > { %v3389_v51 = vshrl.u32 %v9283_v24, 4  ;;  %v9454_v24 = vadd.s32 96, %v9243_v40 }
 0x26c   : > { %7180 = vmatmul.mubr.bf16.gmra.mrb[20].mxu0 %v3093_v20  ;;  %v3367_v20 = vshrl.u32 %v9267_v61, 4  ;;  %v7465_v61 = vadd.f32 %v9309_v26, %v9142_v50  ;;  %v3390_v50 = vmul.u32 24, %v3389_v51 }
 0x26d   : > { %7183 = vmatprep.mubr.msk.bf16.mxu0 %vm8563_vm0, %v8562_v1 }
 0x26e   : > { %v3368_v37 = vmul.u32 24, %v3367_v20 }
 0x270   : > { %v9325_v49 = vsub.s32 %v3303_v53, %v3368_v37 }
 0x272   : > { %vm3519_vm1 = vcmp.ne.s32.totalorder %v9325_v49, 0  ;;  %vm3537_vm3 = vcmp.lt.s32.totalorder %v9325_v49, 0 }
 0x273   : > { %vm9367_vm8 = vmand %vm3537_vm3, %vm3519_vm1  ;;  %vm3731_vm3 = vcmask 1043456  }
 0x274   : > { %7184 = vmatmul.mubr.bf16.gmra.mrb[24].mxu0 %v3095_v31  ;;  %v9287_v31 = vmul.u32.u64.low 2863311531, %v9278_v15  ;;  %v9288_v32 = vmul.u32.u64.high 2863311531, %v9278_v15, %v9287_v31 }
 0x275   : > { %7187 = vmatprep.mubr.msk.bf16.mxu0 %vm8563_vm0, %v8562_v1  ;;  %v3573_v31 = vadd.s32 24, %v9325_v49 }
 0x276   : > { %v3400_v58 = vshrl.u32 %v9288_v32, 4  ;;  %v3574_v32 = vadd.s32 24, %v9328_v56 }
 0x277   : > { %v3591_v0 = vsel %vm9367_vm8, %v3573_v31, %v9325_v49 }
 0x278   : > { %v3401_v14 = vmul.u32 24, %v3400_v58  ;;  %vm9419_vm14 = vcmp.lt.s32.totalorder %v3591_v0, 16 }
 0x27a   : > { %v9390_v42 = vsub.s32 %v9278_v15, %v3401_v14  ;;  %v3592_v15 = vsel %vm9380_vm9, %v3574_v32, %v9328_v56 }
 0x27b   : > { %vm3610_vm15 = vcmp.lt.s32.totalorder %v3592_v15, 16 }
 0x27c   : > { %7188 = vmatmul.mubr.bf16.gmra.mrb[28].mxu0 %v3097_v35  ;;  %v9295_v35 = vadd.s32 64, %v9243_v40  ;;  %vm3522_vm12 = vcmp.ne.s32.totalorder %v9390_v42, 0  ;;  %vm3540_vm13 = vcmp.lt.s32.totalorder %v9390_v42, 0  ;;  %v6319_v31 = vsel %vm3610_vm15, 1.0, %v8562_v1 }
 0x27d   : > { %7191 = vmatprep.mubr.msk.bf16.mxu0 %vm8563_vm0, %v8562_v1  ;;  %vm9339_vm0 = vcmp.lt.s32.totalorder %v3588_v47, 16  ;;  %vm9446_vm1 = vmand %vm3540_vm13, %vm3522_vm12 }
 0x27e   : > { %v9316_v45 = vmul.u32.u64.low 2863311531, %v9295_v35  ;;  %v9317_v46 = vmul.u32.u64.high 2863311531, %v9295_v35, %v9316_v45  ;;  %v6315_v20 = vsel %vm9339_vm0, 1.0, %v8562_v1 }
 0x27f   : > { %v6316_v45 = vsel %vm9355_vm6, 1.0, %v8562_v1 }
 0x280   : > { %v3411_v33 = vshrl.u32 %v9317_v46, 4 }
 0x282   : > { %v3412_v47 = vmul.u32 24, %v3411_v33 }
 0x284   : > { %7192 = vmatmul.mubr.bf16.gmra.mrb[32].mxu0 %v3099_v38  ;;  %v9385_v38 = vsub.s32 %v9275_v12, %v3390_v50  ;;  %v6317_v12 = vsel %vm9359_vm7, 1.0, %v8562_v1 }
 0x286   : > { %vm3521_vm10 = vcmp.ne.s32.totalorder %v9385_v38, 0  ;;  %vm3539_vm11 = vcmp.lt.s32.totalorder %v9385_v38, 0  ;;  %v3575_v14 = vadd.s32 24, %v9385_v38 }
 0x287   : > { %vm9434_vm0 = vmand %vm3539_vm11, %vm3521_vm10 }
 0x317   : > { %v3191_v4 = vpop.f32.mrb[0].mxu0 }
 0x318   : > { %v7468_v6 = vadd.f32 %v7465_v61, %v3191_v4  ;;  %v7161_v7 = vpop.f32.mrb[1].mxu0  ;;  %v3423_v61 = vmul.u32 24, %v3422_v62 }
 0x319   : > { %v3194_v9 = vpop.f32.mrb[2].mxu0  ;;  %v9427_v7 = vmul.u32.u64.low 2863311531, %v9409_v48  ;;  %v9428_v50 = vmul.u32.u64.high 2863311531, %v9409_v48, %v9427_v7 }
 0x31a   : > { %3280 = vst [vmem:[#allocation4] sm:$0xff] %v7468_v6  ;;  %v3677_v16 = vmax.f32 %v7468_v6, 0.0  ;;  %v7474_v18 = vadd.f32 %v7471_v2, %v3194_v9  ;;  %v7162_v22 = vpop.f32.mrb[3].mxu0  ;;  %v9415_v49 = vmul.u32.u64.low 2863311531, %v9394_v30  ;;  %v9416_v2 = vmul.u32.u64.high 2863311531, %v9394_v30, %v9415_v49 }
 0x31b   : > { %v9424_v6 = vsub.s32 %v9295_v35, %v3412_v47  ;;  %v3576_v35 = vadd.s32 24, %v9390_v42  ;;  %v9451_v22 = vsub.s32 %v9302_v41, %v3423_v61  ;;  %v9463_v41 = vadd.s32 104, %v9243_v40 }
 0x31c   : > { %3281 = vst [vmem:[#allocation4 + $0x8] sm:$0xff] %v7474_v18  ;;  %v3678_v36 = vmax.f32 %v7474_v18, 0.0  ;;  %v3695_v43 = vmul.f32 %v6314_v52, %v3677_v16  ;;  %v7489_v16 = vadd.f32 %v9309_v26, %v9162_v11  ;;  %v7495_v18 = vadd.f32 %v9309_v26, %v9164_v13 }
 0x31d   : > { %v6318_v11 = vsel %vm9419_vm14, 1.0, %v8562_v1  ;;  %vm3523_vm4 = vcmp.ne.s32.totalorder %v9424_v6, 0  ;;  %vm3541_vm5 = vcmp.lt.s32.totalorder %v9424_v6, 0  ;;  %v3594_v37 = vsel %vm9446_vm1, %v3576_v35, %v9390_v42 }
 0x31e   : > { %v3696_v44 = vmul.f32 %v6315_v20, %v3678_v36  ;;  %v3593_v36 = vsel %vm9434_vm0, %v3575_v14, %v9385_v38  ;;  %v3577_v62 = vadd.s32 24, %v9424_v6  ;;  %vm3524_vm6 = vcmp.ne.s32.totalorder %v9451_v22, 0  ;;  %vm9481_vm7 = vmand %vm3541_vm5, %vm3523_vm4 }
 0x31f   : > { %v3199_v46 = vpop.f32.mrb[4].mxu0  ;;  %v3433_v42 = vshrl.u32 %v9416_v2, 4  ;;  %vm3542_vm8 = vcmp.lt.s32.totalorder %v9451_v22, 0  ;;  %v3444_v15 = vshrl.u32 %v9428_v50, 4  ;;  %vm3611_vm9 = vcmp.lt.s32.totalorder %v3593_v36, 16 }
 0x320   : > { %v3713_v51 = vpack.c.bf16 %v3696_v44, %v3695_v43  ;;  %v7480_v58 = vadd.f32 %v7477_v34, %v3199_v46  ;;  %v7165_v59 = vpop.f32.mrb[5].mxu0  ;;  %v9474_v43 = vmul.u32.u64.low 2863311531, %v9454_v24  ;;  %v9475_v44 = vmul.u32.u64.high 2863311531, %v9454_v24, %v9474_v43  ;;  %vm9510_vm11 = vmand %vm3542_vm8, %vm3524_vm6 }
 0x321   : > { %v3202_v60 = vpop.f32.mrb[6].mxu0  ;;  %vm9493_vm10 = vcmp.lt.s32.totalorder %v3594_v37, 16  ;;  %v3595_v61 = vsel %vm9481_vm7, %v3577_v62, %v9424_v6  ;;  %v3578_v49 = vadd.s32 24, %v9451_v22  ;;  %v9502_v2 = vadd.s32 112, %v9243_v40 }
 0x322   : > { %v3732_v56 = vrot.slane %v3713_v51, 4  ;;  %3282 = vst [vmem:[#allocation4 + $0x10] sm:$0xff] %v7480_v58  ;;  %v3679_v4 = vmax.f32 %v7480_v58, 0.0  ;;  %v7486_v53 = vadd.f32 %v7483_v39, %v3202_v60  ;;  %v7166_v54 = vpop.f32.mrb[7].mxu0  ;;  %v3434_v5 = vmul.u32 24, %v3433_v42 }
 0x323   : > { %v9489_v47 = vmul.u32.u64.low 2863311531, %v9463_v41  ;;  %v9490_v51 = vmul.u32.u64.high 2863311531, %v9463_v41, %v9489_v47  ;;  %v7507_v6 = vadd.f32 %v9309_v26, %v9172_v23  ;;  %v6320_v50 = vsel %vm3611_vm9, 1.0, %v8562_v1 }
 0x324   : > { %3759 = vst [vmem:[#allocation3] sm:$0xf0] %v3732_v56  ;;  %3283 = vst [vmem:[#allocation4 + $0x18] sm:$0xff] %v7486_v53  ;;  %v3680_v52 = vmax.f32 %v7486_v53, 0.0  ;;  %v3697_v25 = vmul.f32 %v6316_v45, %v3679_v4  ;;  %vm9523_vm12 = vcmp.lt.s32.totalorder %v3595_v61, 16  ;;  %v3596_v23 = vsel %vm9510_vm11, %v3578_v49, %v9451_v22 }
 0x325   : > { %v3466_v37 = vshrl.u32 %v9490_v51, 4  ;;  %v7513_v62 = vadd.f32 %v9309_v26, %v9198_v55  ;;  %v7519_v43 = vadd.f32 %v9309_v26, %v9200_v57  ;;  %vm9554_vm13 = vcmp.lt.s32.totalorder %v3596_v23, 16 }
 0x326   : > { %v3698_v28 = vmul.f32 %v6317_v12, %v3680_v52  ;;  %v3445_v52 = vmul.u32 24, %v3444_v15  ;;  %v9566_v42 = vadd.s32 136, %v9243_v40 }
 0x327   : > { %v3207_v13 = vpop.f32.mrb[8].mxu0 }
 0x328   : > { %v3714_v32 = vpack.c.bf16 %v3698_v28, %v3697_v25  ;;  %v7492_v33 = vadd.f32 %v7489_v16, %v3207_v13  ;;  %v7169_v34 = vpop.f32.mrb[9].mxu0  ;;  %v6321_v16 = vsel %vm9493_vm10, 1.0, %v8562_v1  ;;  %v3455_v25 = vshrl.u32 %v9475_v44, 4 }
 0x329   : > { %v3210_v39 = vpop.f32.mrb[10].mxu0  ;;  %v9536_v34 = vsub.s32 %v9394_v30, %v3434_v5  ;;  %v9539_v36 = vsub.s32 %v9409_v48, %v3445_v52  ;;  %v6322_v48 = vsel %vm9523_vm12, 1.0, %v8562_v1 }
 0x32a   : > { %v3733_v45 = vrot.slane %v3714_v32, 4  ;;  %3284 = vst [vmem:[#allocation4 + $0x20] sm:$0xff] %v7492_v33  ;;  %v3681_v12 = vmax.f32 %v7492_v33, 0.0  ;;  %v7498_v46 = vadd.f32 %v7495_v18, %v3210_v39  ;;  %v7170_v0 = vpop.f32.mrb[11].mxu0  ;;  %v7525_v18 = vadd.f32 %v9309_v26, %v9206_v63 }
 0x32b   : > { %v9559_v0 = vadd.s32 128, %v9243_v40  ;;  %vm3525_vm14 = vcmp.ne.s32.totalorder %v9536_v34, 0  ;;  %vm3543_vm15 = vcmp.lt.s32.totalorder %v9536_v34, 0  ;;  %vm3526_vm0 = vcmp.ne.s32.totalorder %v9539_v36, 0 }
 0x32c   : > { %v3734_v58 = vsel %vm3731_vm3, %v3732_v56, %v3733_v45  ;;  %3285 = vst [vmem:[#allocation4 + $0x28] sm:$0xff] %v7498_v46  ;;  %v3682_v59 = vmax.f32 %v7498_v46, 0.0  ;;  %v7501_v56 = vadd.f32 %v9309_v26, %v9170_v21  ;;  %v3699_v4 = vmul.f32 %v6318_v11, %v3681_v12  ;;  %vm9574_vm4 = vmand %vm3543_vm15, %vm3525_vm14 }
 0x32d   : > { %3760 = vst [vmem:[#allocation3 + $0x8] sm:$0xff] %v3734_v58  ;;  %v9518_v21 = vadd.s32 120, %v9243_v40  ;;  %v9532_v28 = vmul.u32.u64.low 2863311531, %v9502_v2  ;;  %v9533_v11 = vmul.u32.u64.high 2863311531, %v9502_v2, %v9532_v28  ;;  %v3456_v46 = vmul.u32 24, %v3455_v25 }
 0x32e   : > { %v3700_v53 = vmul.f32 %v6319_v31, %v3682_v59  ;;  %vm3544_vm1 = vcmp.lt.s32.totalorder %v9539_v36, 0  ;;  %v6323_v58 = vsel %vm9554_vm13, 1.0, %v8562_v1  ;;  %v3579_v59 = vadd.s32 24, %v9536_v34 }
 0x32f   : > { %v3215_v7 = vpop.f32.mrb[12].mxu0  ;;  %v9543_v22 = vmul.u32.u64.low 2863311531, %v9518_v21  ;;  %v9544_v39 = vmul.u32.u64.high 2863311531, %v9518_v21, %v9543_v22  ;;  %v3580_v49 = vadd.s32 24, %v9539_v36  ;;  %v9580_v40 = vsub.s32 %v9454_v24, %v3456_v46  ;;  %vm9590_vm5 = vmand %vm3544_vm1, %vm3526_vm0 }
 0x330   : > { %v3715_v9 = vpack.c.bf16 %v3700_v53, %v3699_v4  ;;  %v7504_v14 = vadd.f32 %v7501_v56, %v3215_v7  ;;  %v7173_v35 = vpop.f32.mrb[13].mxu0  ;;  %v9583_v56 = vmul.u32.u64.low 2863311531, %v9559_v0  ;;  %v9584_v4 = vmul.u32.u64.high 2863311531, %v9559_v0, %v9583_v56 }
 0x331   : > { %v3218_v20 = vpop.f32.mrb[14].mxu0  ;;  %v3477_v24 = vshrl.u32 %v9533_v11, 4  ;;  %v3488_v52 = vshrl.u32 %v9544_v39, 4  ;;  %vm3527_vm6 = vcmp.ne.s32.totalorder %v9580_v40, 0  ;;  %vm3545_vm7 = vcmp.lt.s32.totalorder %v9580_v40, 0 }
 0x332   : > { %v3735_v13 = vrot.slane %v3715_v9, 4  ;;  %3286 = vst [vmem:[#allocation4 + $0x30] sm:$0xff] %v7504_v14  ;;  %v3683_v31 = vmax.f32 %v7504_v14, 0.0  ;;  %v7510_v32 = vadd.f32 %v7507_v6, %v3218_v20  ;;  %v7174_v33 = vpop.f32.mrb[15].mxu0  ;;  %v3597_v20 = vsel %vm9574_vm4, %v3579_v59, %v9536_v34  ;;  %vm9620_vm12 = vmand %vm3545_vm7, %vm3527_vm6 }
 0x333   : > { %v9600_v9 = vmul.u32.u64.low 2863311531, %v9566_v42  ;;  %v9601_v14 = vmul.u32.u64.high 2863311531, %v9566_v42, %v9600_v9  ;;  %v3478_v28 = vmul.u32 24, %v3477_v24  ;;  %v7531_v11 = vadd.f32 %v9309_v26, %v9208_v3 }
 0x334   : > { %v3736_v44 = vsel %vm3731_vm3, %v3733_v45, %v3735_v13  ;;  %3287 = vst [vmem:[#allocation4 + $0x38] sm:$0xff] %v7510_v32  ;;  %v3684_v30 = vmax.f32 %v7510_v32, 0.0  ;;  %v3701_v55 = vmul.f32 %v6320_v50, %v3683_v31  ;;  %v3467_v45 = vmul.u32 24, %v3466_v37 }
 0x335   : > { %3761 = vst [vmem:[#allocation3 + $0x10] sm:$0xff] %v3736_v44  ;;  %vm3615_vm10 = vcmp.lt.s32.totalorder %v3597_v20, 16  ;;  %v3581_v3 = vadd.s32 24, %v9580_v40  ;;  %v3499_v22 = vshrl.u32 %v9584_v4, 4  ;;  %v7543_v59 = vadd.f32 %v9309_v26, %v9216_v10 }
 0x336   : > { %v3702_v38 = vmul.f32 %v6321_v16, %v3684_v30  ;;  %v9596_v50 = vsub.s32 %v9463_v41, %v3467_v45  ;;  %v3598_v41 = vsel %vm9590_vm5, %v3580_v49, %v9539_v36  ;;  %v6324_v12 = vsel %vm3615_vm10, 1.0, %v8562_v1 }
 0x337   : > { %v3223_v57 = vpop.f32.mrb[16].mxu0  ;;  %vm3616_vm11 = vcmp.lt.s32.totalorder %v3598_v41, 16  ;;  %v7549_v20 = vadd.f32 %v9309_v26, %v9222_v17  ;;  %v7561_v30 = vadd.f32 %v9309_v26, %v9230_v27 }
 0x338   : > { %v3716_v15 = vpack.c.bf16 %v3702_v38, %v3701_v55  ;;  %v7516_v47 = vadd.f32 %v7513_v62, %v3223_v57  ;;  %v7177_v51 = vpop.f32.mrb[17].mxu0  ;;  %vm3528_vm8 = vcmp.ne.s32.totalorder %v9596_v50, 0  ;;  %vm3546_vm9 = vcmp.lt.s32.totalorder %v9596_v50, 0 }
 0x339   : > { %v3226_v60 = vpop.f32.mrb[18].mxu0  ;;  %v3582_v37 = vadd.s32 24, %v9596_v50  ;;  %vm9631_vm13 = vmand %vm3546_vm9, %vm3528_vm8  ;;  %v6325_v46 = vsel %vm3616_vm11, 1.0, %v8562_v1  ;;  %v3510_v38 = vshrl.u32 %v9601_v14, 4  ;;  %v3500_v51 = vmul.u32 24, %v3499_v22 }
 0x33a   : > { %v3737_v53 = vrot.slane %v3716_v15, 4  ;;  %3288 = vst [vmem:[#allocation4 + $0x40] sm:$0xff] %v7516_v47  ;;  %v3685_v54 = vmax.f32 %v7516_v47, 0.0  ;;  %v7522_v5 = vadd.f32 %v7519_v43, %v3226_v60  ;;  %v7178_v6 = vpop.f32.mrb[19].mxu0  ;;  %v7537_v15 = vadd.f32 %v9309_v26, %v9214_v8 }
 0x33b   : > { %v3600_v47 = vsel %vm9631_vm13, %v3582_v37, %v9596_v50  ;;  %v3511_v8 = vmul.u32 24, %v3510_v38 }
 0x33c   : > { %v3738_v35 = vsel %vm3731_vm3, %v3735_v13, %v3737_v53  ;;  %3289 = vst [vmem:[#allocation4 + $0x48] sm:$0xff] %v7522_v5  ;;  %v3686_v16 = vmax.f32 %v7522_v5, 0.0  ;;  %v3703_v23 = vmul.f32 %v6322_v48, %v3685_v54  ;;  %v3489_v13 = vmul.u32 24, %v3488_v52 }
 0x33d   : > { %3762 = vst [vmem:[#allocation3 + $0x18] sm:$0xff] %v3738_v35  ;;  %v3479_v48 = vsub.s32 %v9502_v2, %v3478_v28  ;;  %v3599_v2 = vsel %vm9620_vm12, %v3581_v3, %v9580_v40  ;;  %vm3618_vm5 = vcmp.lt.s32.totalorder %v3600_v47, 16  ;;  %v3501_v5 = vsub.s32 %v9559_v0, %v3500_v51 }
 0x33e   : > { %v3704_v25 = vmul.f32 %v6323_v58, %v3686_v16  ;;  %v3490_v55 = vsub.s32 %v9518_v21, %v3489_v13  ;;  %vm3617_vm4 = vcmp.lt.s32.totalorder %v3599_v2, 16  ;;  %v6327_v9 = vsel %vm3618_vm5, 1.0, %v8562_v1 }
 0x33f   : > { %v3231_v63 = vpop.f32.mrb[20].mxu0  ;;  %vm3529_vm14 = vcmp.ne.s32.totalorder %v3479_v48, 0  ;;  %vm3547_vm15 = vcmp.lt.s32.totalorder %v3479_v48, 0  ;;  %v6326_v52 = vsel %vm3617_vm4, 1.0, %v8562_v1  ;;  %v3512_v14 = vsub.s32 %v9566_v42, %v3511_v8 }
 0x340   : > { %v3717_v31 = vpack.c.bf16 %v3704_v25, %v3703_v23  ;;  %v7528_v32 = vadd.f32 %v7525_v18, %v3231_v63  ;;  %v7181_v33 = vpop.f32.mrb[21].mxu0  ;;  %vm3530_vm0 = vcmp.ne.s32.totalorder %v3490_v55, 0  ;;  %vm3548_vm1 = vcmp.lt.s32.totalorder %v3490_v55, 0  ;;  %vm9651_vm6 = vmand %vm3547_vm15, %vm3529_vm14 }
 0x341   : > { %v3234_v34 = vpop.f32.mrb[22].mxu0  ;;  %v3584_v54 = vadd.s32 24, %v3490_v55  ;;  %vm9658_vm7 = vmand %vm3548_vm1, %vm3530_vm0  ;;  %vm3531_vm8 = vcmp.ne.s32.totalorder %v3501_v5, 0  ;;  %vm3549_vm9 = vcmp.lt.s32.totalorder %v3501_v5, 0  ;;  %v7555_v42 = vadd.f32 %v9309_v26, %v9224_v19 }
 0x342   : > { %v3739_v39 = vrot.slane %v3717_v31, 4  ;;  %3290 = vst [vmem:[#allocation4 + $0x50] sm:$0xff] %v7528_v32  ;;  %v3687_v62 = vmax.f32 %v7528_v32, 0.0  ;;  %v7534_v43 = vadd.f32 %v7531_v11, %v3234_v34  ;;  %v7182_v44 = vpop.f32.mrb[23].mxu0  ;;  %v3585_v28 = vadd.s32 24, %v3501_v5  ;;  %vm9675_vm14 = vmand %vm3549_vm9, %vm3531_vm8 }
 0x343   : > { %v3602_v18 = vsel %vm9658_vm7, %v3584_v54, %v3490_v55  ;;  %vm3532_vm10 = vcmp.ne.s32.totalorder %v3512_v14, 0  ;;  %vm3550_vm11 = vcmp.lt.s32.totalorder %v3512_v14, 0  ;;  %v3586_v32 = vadd.s32 24, %v3512_v14 }
 0x344   : > { %v3740_v57 = vsel %vm3731_vm3, %v3737_v53, %v3739_v39  ;;  %3291 = vst [vmem:[#allocation4 + $0x58] sm:$0xff] %v7534_v43  ;;  %v3688_v45 = vmax.f32 %v7534_v43, 0.0  ;;  %v3705_v21 = vmul.f32 %v6324_v12, %v3687_v62  ;;  %v3583_v53 = vadd.s32 24, %v3479_v48  ;;  %vm9679_vm15 = vmand %vm3550_vm11, %vm3532_vm10 }
 0x345   : > { %3763 = vst [vmem:[#allocation3 + $0x20] sm:$0xff] %v3740_v57  ;;  %vm3620_vm13 = vcmp.lt.s32.totalorder %v3602_v18, 16  ;;  %v3604_v44 = vsel %vm9679_vm15, %v3586_v32, %v3512_v14  ;;  %v7567_v55 = vadd.f32 %v9309_v26, %v9232_v29 }
 0x346   : > { %v3706_v58 = vmul.f32 %v6325_v46, %v3688_v45  ;;  %v3601_v0 = vsel %vm9651_vm6, %v3583_v53, %v3479_v48  ;;  %v6329_v22 = vsel %vm3620_vm13, 1.0, %v8562_v1  ;;  %vm3622_vm1 = vcmp.lt.s32.totalorder %v3604_v44, 16 }
 0x347   : > { %v3239_v60 = vpop.f32.mrb[24].mxu0  ;;  %vm3619_vm12 = vcmp.lt.s32.totalorder %v3601_v0, 16  ;;  %v6331_v27 = vsel %vm3622_vm1, 1.0, %v8562_v1 }
 0x348   : > { %v3718_v61 = vpack.c.bf16 %v3706_v58, %v3705_v21  ;;  %v7540_v49 = vadd.f32 %v7537_v15, %v3239_v60  ;;  %v7185_v40 = vpop.f32.mrb[25].mxu0  ;;  %v6328_v37 = vsel %vm3619_vm12, 1.0, %v8562_v1 }
 0x349   : > { %v3242_v56 = vpop.f32.mrb[26].mxu0  ;;  %v8564_v40 = vmov (!%p10127_p2), 0  }
 0x34a   : > { %v3741_v6 = vrot.slane %v3718_v61, 4  ;;  %v3689_v10 = vmax.f32 %v7540_v49, 0.0  ;;  %v7546_v7 = vadd.f32 %v7543_v59, %v3242_v56  ;;  %v7186_v24 = vpop.f32.mrb[27].mxu0  ;;  %3772 = vst [vmem:[#allocation3] sm:$0xf0] (!%p10127_p2), %v8564_v40  ;;  %3773 = vst [vmem:[#allocation3 + $0x8] sm:$0xff] (!%p10127_p2), %v8564_v40 }
 0x34c   : > { %v3742_v35 = vsel %vm3731_vm3, %v3739_v39, %v3741_v6  ;;  %v3690_v16 = vmax.f32 %v7546_v7, 0.0  ;;  %v3707_v41 = vmul.f32 %v6326_v52, %v3689_v10  ;;  %v3603_v39 = vsel %vm9675_vm14, %v3585_v28, %v3501_v5 }
 0x34d   : > { %3764 = vst [vmem:[#allocation3 + $0x28] sm:$0xff] %v3742_v35  ;;  %vm3621_vm0 = vcmp.lt.s32.totalorder %v3603_v39, 16 }
 0x34e   : > { %v3708_v23 = vmul.f32 %v6327_v9, %v3690_v16  ;;  %v6330_v15 = vsel %vm3621_vm0, 1.0, %v8562_v1 }
 0x34f   : > { %v3247_v25 = vpop.f32.mrb[28].mxu0 }
 0x350   : > { %v3719_v11 = vpack.c.bf16 %v3708_v23, %v3707_v41  ;;  %v7552_v63 = vadd.f32 %v7549_v20, %v3247_v25  ;;  %v7189_v13 = vpop.f32.mrb[29].mxu0 }
 0x351   : > { %v3250_v17 = vpop.f32.mrb[30].mxu0 }
 0x352   : > { %v3743_v33 = vrot.slane %v3719_v11, 4  ;;  %v3691_v34 = vmax.f32 %v7552_v63, 0.0  ;;  %v7558_v36 = vadd.f32 %v7555_v42, %v3250_v17  ;;  %v7190_v19 = vpop.f32.mrb[31].mxu0 }
 0x354   : > { %v3744_v62 = vsel %vm3731_vm3, %v3741_v6, %v3743_v33  ;;  %v3692_v43 = vmax.f32 %v7558_v36, 0.0  ;;  %v3709_v48 = vmul.f32 %v6328_v37, %v3691_v34 }
 0x355   : > { %3765 = vst [vmem:[#allocation3 + $0x30] sm:$0xff] %v3744_v62 }
 0x356   : > { %v3710_v12 = vmul.f32 %v6329_v22, %v3692_v43 }
 0x357   : > { %v3255_v46 = vpop.f32.mrb[32].mxu0 }
 0x358   : > { %v3720_v38 = vpack.c.bf16 %v3710_v12, %v3709_v48  ;;  %v7564_v57 = vadd.f32 %v7561_v30, %v3255_v46  ;;  %v7193_v45 = vpop.f32.mrb[33].mxu0 }
 0x359   : > { %v3258_v2 = vpop.f32.mrb[34].mxu0 }
 0x35a   : > { %v3745_v47 = vrot.slane %v3720_v38, 4  ;;  %v3693_v51 = vmax.f32 %v7564_v57, 0.0  ;;  %v7570_v21 = vadd.f32 %v7567_v55, %v3258_v2  ;;  %v7194_v58 = vpop.f32.mrb[35].mxu0 }
 0x35c   : > { %v3746_v59 = vsel %vm3731_vm3, %v3743_v33, %v3745_v47  ;;  %v3711_v60 = vmul.f32 %v6330_v15, %v3693_v51  ;;  %v3694_v8 = vmax.f32 %v7570_v21, 0.0 }
 0x35d   : > { %3766 = vst [vmem:[#allocation3 + $0x38] sm:$0xff] %v3746_v59 }
 0x35e   : > { %v3712_v61 = vmul.f32 %v6331_v27, %v3694_v8 }
 0x35f   : > { %3771 = sbr.rel (%p10127_p2) target bundleno = 870 (0x366), region = 64 }
 0x360   : > { %v3721_v29 = vpack.c.bf16 %v3712_v61, %v3711_v60 }
 0x362   : > { %v3747_v26 = vrot.slane %v3721_v29, 4 }
 0x364   : > { %v3748_v49 = vsel %vm3731_vm3, %v3745_v47, %v3747_v26  ;;  %3768 = vst [vmem:[#allocation3 + $0x48] sm:$0xf] %v3747_v26 }
 0x365   : > { %3767 = vst [vmem:[#allocation3 + $0x40] sm:$0xff] %v3748_v49 }
 0x366 PF: > { %p6333_p12 = scmp.ne.s32.totalorder %s8538_s21, 3 }
 0x367   : > { %v8565_v1 = vmov (!%p6333_p12), 0  }
 0x368   : > { %3777 = sbr.rel (%p6333_p12) target bundleno = 879 (0x36f), region = 68  ;;  %3778 = vst [vmem:[#allocation3 + $0x40] sm:$0xff] (!%p6333_p12), %v8565_v1  ;;  %3779 = vst [vmem:[#allocation3 + $0x48] sm:$0xf] (!%p6333_p12), %v8565_v1 }
 0x36f PF: > { %v8266_v56 = vld [vmem:[#allocation9] sm:$0xff]   ;;  %v8267_v4 = vld [vmem:[#allocation9 + $0x8] sm:$0xff]   ;;  %v8268_v53 = vld [vmem:[#allocation9 + $0x10] sm:$0xff]   ;;  %vm3874_vm4 = vsmask.f32 4352  ;;  %s10128_s10 = sand.u32 1, %s8530_s19  }
 0x370   : > { %7195 = vmatprep.subr.bf16.mxu1 %v8266_v56  ;;  %v8269_v54 = vld [vmem:[#allocation9 + $0x18] sm:$0xff]   ;;  %v3851_v5 = vld [vmem:[#allocation3] sm:$0xf8]  ;;  %v9701_v6 = vld [vmem:[#allocation3 + $0x8] sm:$0xff]  ;;  %vm4347_vm5 = vsmask.f32 3328 }
 0x371   : > { %7196 = vmatpush3.bf16.msra.mxu1 %v8266_v56  ;;  %v3876_v10 = vshrl.u32 %v3851_v5, 16  ;;  %v3879_v7 = vshll.u32 %v3851_v5, 16  ;;  %v3884_v24 = vshrl.u32 %v9701_v6, 16  ;;  %v3887_v50 = vshll.u32 %v9701_v6, 16  ;;  %v8270_v16 = vld [vmem:[#allocation9 + $0x20] sm:$0xff]   ;;  %v9706_v41 = vld [vmem:[#allocation3 + $0x10] sm:$0xff] }
 0x372   : > { %7197 = vmatprep.subr.bf16.mxu1 %v8267_v4  ;;  %v9708_v23 = vld [vmem:[#allocation3 + $0x18] sm:$0xff]  ;;  %v8271_v42 = vld [vmem:[#allocation9 + $0x28] sm:$0xff]   ;;  %v9711_v25 = vshrl.u32 %v9706_v41, 16  ;;  %v9714_v28 = vshll.u32 %v9706_v41, 16  ;;  %v8272_v63 = vld [vmem:[#allocation9 + $0x30] sm:$0xff]   ;;  %s9989_s11 = scalar_lea.sflag [#allocation8], %s10128_s10 }
 0x373   : > { %v3878_v52 = vrot.slane %v3876_v10, 3  ;;  %v3881_v9 = vrot.slane %v3879_v7, 4  ;;  %v3886_v14 = vrot.slane %v3884_v24, 3  ;;  %v3889_v35 = vrot.slane %v3887_v50, 4  ;;  %v8273_v31 = vld [vmem:[#allocation9 + $0x38] sm:$0xff]   ;;  %v9725_v34 = vld [vmem:[#allocation3 + $0x20] sm:$0xff] }
 0x374   : > { %v9717_v11 = vshrl.u32 %v9708_v23, 16  ;;  %v9720_v13 = vshll.u32 %v9708_v23, 16  ;;  %v3895_v17 = vrot.slane %v9711_v25, 3  ;;  %v3898_v32 = vrot.slane %v9714_v28, 4  ;;  %v9728_v19 = vld [vmem:[#allocation3 + $0x28] sm:$0xff]  ;;  %v8274_v43 = vld [vmem:[#allocation9 + $0x40] sm:$0xff]  }
 0x375   : > { %7198 = vmatpush3.bf16.msra.mxu1 %v8267_v4  ;;  %v3882_v0 = vor.u32 %v3881_v9, %v3878_v52  ;;  %v3890_v18 = vor.u32 %v3889_v35, %v3886_v14  ;;  %v9731_v3 = vshrl.u32 %v9725_v34, 16  ;;  %v9734_v37 = vshll.u32 %v9725_v34, 16  ;;  %v8275_v12 = vld [vmem:[#allocation9 + $0x48] sm:$0xff]   ;;  %v3857_v15 = vld [vmem:[#allocation3 + $0x30] sm:$0xf]  ;;  %v8277_v14 = vld [vmem:[#allocation9 + $0x58] sm:$0xff]  }
 0x376   : > { %7199 = vmatprep.subr.bf16.mxu1 %v8268_v53  ;;  %v3904_v33 = vrot.slane %v9717_v11, 3  ;;  %v3907_v36 = vrot.slane %v9720_v13, 4  ;;  %v3899_v22 = vor.u32 %v3898_v32, %v3895_v17  ;;  %v9737_v39 = vshrl.u32 %v9728_v19, 16  ;;  %v8276_v29 = vld [vmem:[#allocation9 + $0x50] sm:$0xff]   ;;  %v4108_v5 = vld [vmem:[#allocation3] sm:$0xf0] }
 0x377   : > { %v3891_v20 = vsel %vm3874_vm4, %v3882_v0, %v3890_v18  ;;  %v4359_v62 = vrot.slane %v3884_v24, 4  ;;  %v9740_v30 = vshll.u32 %v9728_v19, 16  ;;  %v4362_v48 = vrot.slane %v3887_v50, 5  ;;  %p10129_p13 = scmp.ne.s32.totalorder %s10063_s8, 0  ;;  %s8566_s7 = smov [#allocation11]  }
 0x378   : > { %7211 = vmatprep.mubr.bf16.mxu1 %v3891_v20  ;;  %v3908_v44 = vor.u32 %v3907_v36, %v3904_v33  ;;  %v3913_v46 = vrot.slane %v9731_v3, 3  ;;  %v3916_v55 = vrot.slane %v9734_v37, 4  ;;  %v3900_v57 = vsel %vm3874_vm4, %v3890_v18, %v3899_v22  ;;  %s8454_s16 = sshll.u32 %s8566_s7, 4  ;;  %s8455_s16 = int_to_ptr.vmem [resolvable:$false] %s8454_s16 }
 0x379   : > { %7200 = vmatpush3.bf16.msra.mxu1 %v8268_v53  ;;  %v9744_v38 = vor.u32 %v4362_v48, %v4359_v62  ;;  %v3922_v45 = vrot.slane %v9737_v39, 3  ;;  %v4368_v2 = vrot.slane %v9711_v25, 4  ;;  %v3925_v51 = vrot.slane %v9740_v30, 4  ;;  %s8456_s17 = scalar_lea.vmem %s8455_s16, 3072 }
 0x37a   : > { %7201 = vmatprep.subr.bf16.mxu1 %v8269_v54  ;;  %v3909_v47 = vsel %vm3874_vm4, %v3899_v22, %v3908_v44  ;;  %v4371_v21 = vrot.slane %v9714_v28, 5  ;;  %v9752_v58 = vor.u32 %v3916_v55, %v3913_v46  ;;  %v3929_v27 = vshrl.u32 %v3857_v15, 16  ;;  %v8280_v55 = vld [vmem:[#allocation9 + $0x70] sm:$0xff]  }
 0x37b   : > { %v4377_v60 = vrot.slane %v9717_v11, 4  ;;  %v3932_v8 = vshll.u32 %v3857_v15, 16  ;;  %v4380_v61 = vrot.slane %v9720_v13, 5  ;;  %v9756_v26 = vor.u32 %v3925_v51, %v3922_v45  ;;  %v8282_v45 = vld [vmem:[#allocation9 + $0x80] sm:$0xff]   ;;  %v8283_v51 = vld [vmem:[#allocation9 + $0x88] sm:$0xff]  }
 0x37c   : > { %v4372_v59 = vor.u32 %v4371_v21, %v4368_v2  ;;  %v4386_v40 = vrot.slane %v9731_v3, 4  ;;  %v4389_v1 = vrot.slane %v9734_v37, 5  ;;  %v4395_v4 = vrot.slane %v9737_v39, 4 }
 0x37d   : > { %7202 = vmatpush3.bf16.msra.mxu1 %v8269_v54  ;;  %v4381_v56 = vor.u32 %v4380_v61, %v4377_v60  ;;  %v4398_v53 = vrot.slane %v9740_v30, 5  ;;  %v3918_v54 = vsel %vm3874_vm4, %v3908_v44, %v9752_v58  ;;  %v4613_v7 = vrot.slane %v9711_v25, 7  ;;  %v4323_v60 = vld [vmem:[#allocation3] sm:$0xf0] }
 0x37e   : > { %7203 = vmatprep.subr.bf16.mxu1 %v8270_v16  ;;  %v9760_v49 = vsel %vm4347_vm5, %v9744_v38, %v4372_v59  ;;  %v4390_v10 = vor.u32 %v4389_v1, %v4386_v40  ;;  %v3931_v24 = vrot.slane %v3929_v27, 3  ;;  %v3934_v50 = vrot.slane %v3932_v8, 4 }
 0x37f   : > { %v9770_v52 = vsel %vm4347_vm5, %v4372_v59, %v4381_v56  ;;  %v9772_v9 = vor.u32 %v4398_v53, %v4395_v4  ;;  %v9777_v35 = vsel %vm3874_vm4, %v9752_v58, %v9756_v26  ;;  %v9783_v0 = vor.u32 %v4613_v7, %v9714_v28  ;;  %v8285_v53 = vld [vmem:[#allocation9 + $0x98] sm:$0xff]  }
 0x380   : > { %v4140_v18 = vrot.slane %v9701_v6, 4  ;;  %v3935_v17 = vor.u32 %v3934_v50, %v3931_v24  ;;  %vm4605_vm6 = vsmask.f32 256  ;;  %v4629_v33 = vrot.slane %v9731_v3, 7  ;;  %v8286_v24 = vld [vmem:[#allocation9 + $0xa0] sm:$0xff]  }
 0x381   : > { %7204 = vmatpush3.bf16.msra.mxu1 %v8270_v16  ;;  %v9780_v16 = vsel %vm4347_vm5, %v4381_v56, %v4390_v10  ;;  %v9788_v20 = vsel %vm4347_vm5, %v4390_v10, %v9772_v9  ;;  %v4637_v36 = vrot.slane %v9737_v39, 7  ;;  %v4142_v15 = vrot.slane %v9706_v41, 4 }
 0x382   : > { %7205 = vmatprep.subr.bf16.mxu1 %v8271_v42  ;;  %v3936_v22 = vsel %vm3874_vm4, %v9756_v26, %v3935_v17  ;;  %v4632_v62 = vor.u32 %v4629_v33, %v9734_v37  ;;  %v4144_v2 = vrot.slane %v9708_v23, 4  ;;  %v4146_v21 = vrot.slane %v9725_v34, 4 }
 0x383   : > { %v4640_v48 = vor.u32 %v4637_v36, %v9740_v30  ;;  %v5051_v27 = vrot.slane %v9720_v13, 1  ;;  %v4143_v59 = vsel %vm3731_vm3, %v4140_v18, %v4142_v15  ;;  %v4352_v4 = vshll.u32 %v4323_v60, 16 }
 0x384   : > { %v4145_v61 = vsel %vm3731_vm3, %v4142_v15, %v4144_v2 }
 0x385   : > { %7206 = vmatpush3.bf16.msra.mxu1 %v8271_v42  ;;  %v8278_v42 = vld [vmem:[#allocation9 + $0x60] sm:$0xff]   ;;  %v9809_v46 = vsel %vm4605_vm6, %v4629_v33, %v4640_v48  ;;  %v5055_v40 = vor.u32 %v5051_v27, %v9717_v11  ;;  %v8289_v33 = vld [vmem:[#allocation9 + $0xb8] sm:$0xff]   ;;  %v4581_v48 = vld [vmem:[#allocation3 + $0x8] sm:$0x80] }
 0x386   : > { %7207 = vmatprep.subr.bf16.mxu1 %v8272_v63  ;;  %v4607_v15 = vshrl.u32 %v4581_v48, 16 }
 0x389   : > { %7208 = vmatpush3.bf16.msra.mxu1 %v8272_v63  ;;  %v4139_v63 = vrot.slane %v4108_v5, 4 }
 0x38a   : > { %7209 = vmatprep.subr.bf16.mxu1 %v8273_v31 }
 0x38b   : > { %v4141_v44 = vsel %vm3731_vm3, %v4139_v63, %v4140_v18  ;;  %v8287_v63 = vld [vmem:[#allocation9 + $0xa8] sm:$0xff]  }
 0x38d   : > { %7210 = vmatpush3.bf16.msra.mxu1 %v8273_v31  ;;  %v4621_v31 = vrot.slane %v9717_v11, 7  ;;  %v4147_v11 = vsel %vm3731_vm3, %v4144_v2, %v4146_v21  ;;  %v8294_v2 = vld [vmem:[#allocation9 + $0xe0] sm:$0xff]  }
 0x38e   : > { %7223 = vmatprep.subr.bf16.mxu1 %v8274_v43 }
 0x38f   : > { %v4624_v32 = vor.u32 %v4621_v31, %v9720_v13  ;;  %v8284_v13 = vld [vmem:[#allocation9 + $0x90] sm:$0xff]  }
 0x390   : > { %7212 = vmatmul.mubr.bf16.vlgmr.msra.gmra.mrb[36].mxu1 %v3900_v57  ;;  %v8281_v57 = vld [vmem:[#allocation9 + $0x78] sm:$0xff]  }
 0x391   : > { %7224 = vmatpush3.bf16.msra.mxu1 %v8274_v43  ;;  %7215 = vmatprep.mubr.bf16.mxu1 %v3909_v47  ;;  %v9795_v6 = vsel %vm4605_vm6, %v4613_v7, %v4624_v32  ;;  %v8279_v43 = vld [vmem:[#allocation9 + $0x68] sm:$0xff]   ;;  %v5046_v47 = vrot.slane %v9714_v28, 1  ;;  %v5059_v28 = vrot.slane %v9734_v37, 1  ;;  %v4354_v37 = vrot.slane %v4352_v4, 5  ;;  %v8301_v4 = vld [vmem:[#allocation9 + $0x118] sm:$0xff]  }
 0x392   : > { %7225 = vmatprep.subr.bf16.mxu1 %v8275_v12 }
 0x393   : > { %v5047_v8 = vor.u32 %v5046_v47, %v9711_v25  ;;  %v9826_v56 = vsel %vm721_vm2, %v5055_v40, %v5059_v28  ;;  %v4349_v25 = vshrl.u32 %v4323_v60, 16  ;;  %v8299_v60 = vld [vmem:[#allocation9 + $0x108] sm:$0xff]   ;;  %v8300_v40 = vld [vmem:[#allocation9 + $0x110] sm:$0xff]  }
 0x395   : > { %7226 = vmatpush3.bf16.msra.mxu1 %v8275_v12  ;;  %v9806_v12 = vsel %vm4605_vm6, %v4621_v31, %v4632_v62  ;;  %v9823_v1 = vsel %vm721_vm2, %v5047_v8, %v5051_v27  ;;  %v4351_v5 = vrot.slane %v4349_v25, 4  ;;  %v9849_v27 = vld [vmem:[#allocation3 + $0x30] sm:$0xff] }
 0x396   : > { %7227 = vmatprep.subr.bf16.mxu1 %v8276_v29  ;;  %v9856_v8 = vshll.u32 %v9849_v27, 16 }
 0x397   : > { %v4355_v50 = vor.u32 %v4354_v37, %v4351_v5  ;;  %v8307_v5 = vld [vmem:[#allocation9 + $0x148] sm:$0xff]   ;;  %v8308_v37 = vld [vmem:[#allocation9 + $0x150] sm:$0xff]  }
 0x398   : > { %7216 = vmatmul.mubr.bf16.gmra.mrb[40].mxu1 %v3918_v54  ;;  %v4114_v54 = vld [vmem:[#allocation3 + $0x30] sm:$0xf] }
 0x399   : > { %7228 = vmatpush3.bf16.msra.mxu1 %v8276_v29  ;;  %7219 = vmatprep.mubr.bf16.mxu1 %v9777_v35  ;;  %v4148_v29 = vrot.slane %v9728_v19, 4  ;;  %v4150_v7 = vrot.slane %v4114_v54, 4  ;;  %v4364_v31 = vsel %vm4347_vm5, %v4355_v50, %v9744_v38  ;;  %v8291_v38 = vld [vmem:[#allocation9 + $0xc8] sm:$0xff]   ;;  %v8310_v50 = vld [vmem:[#allocation9 + $0x160] sm:$0xff]  }
 0x39a   : > { %7229 = vmatprep.subr.bf16.mxu1 %v8277_v14 }
 0x39b   : > { %v4149_v10 = vsel %vm3731_vm3, %v4146_v21, %v4148_v29  ;;  %v4151_v18 = vsel %vm3731_vm3, %v4148_v29, %v4150_v7 }
 0x39d   : > { %7230 = vmatpush3.bf16.msra.mxu1 %v8277_v14  ;;  %v5067_v14 = vrot.slane %v9740_v30, 1  ;;  %v8288_v30 = vld [vmem:[#allocation9 + $0xb0] sm:$0xff]  }
 0x39e   : > { %7231 = vmatprep.subr.bf16.mxu1 %v8278_v42 }
 0x39f   : > { %v9836_v17 = vor.u32 %v5067_v14, %v9737_v39  ;;  %v8304_v39 = vld [vmem:[#allocation9 + $0x130] sm:$0xff]  }
 0x3a0   : > { %7220 = vmatmul.mubr.bf16.gmra.mrb[44].mxu1 %v3936_v22  ;;  %v4329_v22 = vld [vmem:[#allocation3 + $0x30] sm:$0x1f] }
 0x3a1   : > { %7232 = vmatpush3.bf16.msra.mxu1 %v8278_v42  ;;  %7239 = vmatprep.mubr.bf16.mxu1 %v4141_v44  ;;  %v5063_v42 = vor.u32 %v5059_v28, %v9731_v3  ;;  %v8290_v3 = vld [vmem:[#allocation9 + $0xc0] sm:$0xff]   ;;  %v4402_v62 = vshrl.u32 %v4329_v22, 16  ;;  %v8292_v44 = vld [vmem:[#allocation9 + $0xd0] sm:$0xff]  }
 0x3a2   : > { %7233 = vmatprep.subr.bf16.mxu1 %v8279_v43 }
 0x3a3   : > { %v9839_v32 = vsel %vm721_vm2, %v5063_v42, %v5067_v14  ;;  %v6443_v42 = vld [vmem:[%s8757_s12 + $0x20] sm:$0xff]  }
 0x3a5   : > { %7234 = vmatpush3.bf16.msra.mxu1 %v8279_v43  ;;  %v4405_v43 = vshll.u32 %v4329_v22, 16  ;;  %v8314_v22 = vld [vmem:[#allocation9 + $0x180] sm:$0xff]  }
 0x3a6   : > { %7235 = vmatprep.subr.bf16.mxu1 %v8280_v55 }
 0x3a9   : > { %7236 = vmatpush3.bf16.msra.mxu1 %v8280_v55  ;;  %v4404_v55 = vrot.slane %v4402_v62, 4  ;;  %v8315_v62 = vld [vmem:[#allocation9 + $0x188] sm:$0xff]  }
 0x3aa   : > { %7237 = vmatprep.subr.bf16.mxu1 %v8281_v57 }
 0x3ad   : > { %7238 = vmatpush3.bf16.msra.mxu1 %v8281_v57  ;;  %v4407_v57 = vrot.slane %v4405_v43, 5  ;;  %v5075_v43 = vrot.slane %v9856_v8, 1 }
 0x3ae   : > { %7251 = vmatprep.subr.bf16.mxu1 %v8282_v45 }
 0x3b0   : > { %7240 = vmatmul.mubr.bf16.vlgmr.msra.gmra.mrb[36].mxu1 %v4143_v59  ;;  %v8298_v59 = vld [vmem:[#allocation9 + $0x100] sm:$0xff]  }
 0x3b1   : > { %7252 = vmatpush3.bf16.msra.mxu1 %v8282_v45  ;;  %7243 = vmatprep.mubr.bf16.mxu1 %v4145_v61  ;;  %v8293_v45 = vld [vmem:[#allocation9 + $0xd8] sm:$0xff]  }
 0x3b2   : > { %7253 = vmatprep.subr.bf16.mxu1 %v8283_v51  ;;  %v9858_v61 = vld [vmem:[#allocation3 + $0x38] sm:$0xff] }
 0x3b3   : > { %v9863_v29 = vshrl.u32 %v9858_v61, 16  ;;  %v9868_v25 = vshll.u32 %v9858_v61, 16 }
 0x3b5   : > { %7254 = vmatpush3.bf16.msra.mxu1 %v8283_v51  ;;  %v8295_v51 = vld [vmem:[#allocation9 + $0xe8] sm:$0xff]  }
 0x3b6   : > { %7255 = vmatprep.subr.bf16.mxu1 %v8284_v13 }
 0x3b8   : > { %7244 = vmatmul.mubr.bf16.gmra.mrb[40].mxu1 %v4147_v11  ;;  %v8303_v11 = vld [vmem:[#allocation9 + $0x128] sm:$0xff]  }
 0x3b9   : > { %7256 = vmatpush3.bf16.msra.mxu1 %v8284_v13  ;;  %7247 = vmatprep.mubr.bf16.mxu1 %v4149_v10  ;;  %v4653_v13 = vrot.slane %v9863_v29, 7  ;;  %v9879_v10 = vld [vmem:[#allocation3 + $0x40] sm:$0xff] }
 0x3ba   : > { %7257 = vmatprep.subr.bf16.mxu1 %v8285_v53  ;;  %v5333_v7 = vshrl.u32 %v9879_v10, 16 }
 0x3bd   : > { %7258 = vmatpush3.bf16.msra.mxu1 %v8285_v53  ;;  %v8302_v53 = vld [vmem:[#allocation9 + $0x120] sm:$0xff]  }
 0x3be   : > { %7259 = vmatprep.subr.bf16.mxu1 %v8286_v24 }
 0x3c0   : > { %7248 = vmatmul.mubr.bf16.gmra.mrb[44].mxu1 %v4151_v18  ;;  %v8311_v18 = vld [vmem:[#allocation9 + $0x168] sm:$0xff]  }
 0x3c1   : > { %7260 = vmatpush3.bf16.msra.mxu1 %v8286_v24  ;;  %7267 = vmatprep.mubr.bf16.mxu1 %v4364_v31  ;;  %v5336_v24 = vshll.u32 %v9879_v10, 16  ;;  %v6425_v31 = vunpack.c.h.bf16 %v6443_v42 }
 0x3c2   : > { %7261 = vmatprep.subr.bf16.mxu1 %v8287_v63 }
 0x3c5   : > { %7262 = vmatpush3.bf16.msra.mxu1 %v8287_v63  ;;  %v6424_v63 = vunpack.c.l.bf16 %v6443_v42  ;;  %v5522_v42 = vld [vmem:[#allocation3 + $0x20] sm:$0xff] }
 0x3c6   : > { %7263 = vmatprep.subr.bf16.mxu1 %v8288_v30 }
 0x3c9   : > { %7264 = vmatpush3.bf16.msra.mxu1 %v8288_v30  ;;  %v8312_v30 = vld [vmem:[#allocation9 + $0x170] sm:$0xff]  }
 0x3ca   : > { %7265 = vmatprep.subr.bf16.mxu1 %v8289_v33 }
 0x3cd   : > { %7266 = vmatpush3.bf16.msra.mxu1 %v8289_v33 }
 0x3ce   : > { %7279 = vmatprep.subr.bf16.mxu1 %v8290_v3 }
 0x3d0   : > { %7268 = vmatmul.mubr.bf16.vlgmr.msra.gmra.mrb[36].mxu1 %v9760_v49  ;;  %v4408_v49 = vor.u32 %v4407_v57, %v4404_v55  ;;  %v5083_v55 = vrot.slane %v9868_v25, 1  ;;  %v5023_v57 = vld [vmem:[#allocation3 + $0x40] sm:$0x1] }
 0x3d1   : > { %7280 = vmatpush3.bf16.msra.mxu1 %v8290_v3  ;;  %7271 = vmatprep.mubr.bf16.mxu1 %v9770_v52  ;;  %v4609_v52 = vrot.slane %v4607_v15, 7 }
 0x3d2   : > { %7281 = vmatprep.subr.bf16.mxu1 %v8291_v38  ;;  %v4409_v47 = vsel %vm4347_vm5, %v9772_v9, %v4408_v49  ;;  %v9852_v9 = vshrl.u32 %v9849_v27, 16  ;;  %v5076_v49 = vsel %vm721_vm2, %v9836_v17, %v5075_v43  ;;  %v8319_v17 = vld [vmem:[#allocation9 + $0x1a8] sm:$0xff]  }
 0x3d3   : > { %v4617_v21 = vsel %vm4605_vm6, %v4609_v52, %v9783_v0 }
 0x3d4   : > { %v4645_v0 = vrot.slane %v9852_v9, 7  ;;  %v5079_v48 = vor.u32 %v5075_v43, %v9852_v9 }
 0x3d5   : > { %7282 = vmatpush3.bf16.msra.mxu1 %v8291_v38  ;;  %v8313_v38 = vld [vmem:[#allocation9 + $0x178] sm:$0xff]  }
 0x3d6   : > { %7283 = vmatprep.subr.bf16.mxu1 %v8292_v44  ;;  %v4648_v28 = vor.u32 %v9856_v8, %v4645_v0  ;;  %v5084_v52 = vsel %vm721_vm2, %v5079_v48, %v5083_v55  ;;  %v5557_v48 = vrot.slane %v9849_v27, 4 }
 0x3d8   : > { %7272 = vmatmul.mubr.bf16.gmra.mrb[40].mxu1 %v9780_v16  ;;  %v8296_v16 = vld [vmem:[#allocation9 + $0xf0] sm:$0xff]  }
 0x3d9   : > { %7284 = vmatpush3.bf16.msra.mxu1 %v8292_v44  ;;  %7275 = vmatprep.mubr.bf16.mxu1 %v9788_v20  ;;  %v8297_v20 = vld [vmem:[#allocation9 + $0xf8] sm:$0xff]   ;;  %v8316_v44 = vld [vmem:[#allocation9 + $0x190] sm:$0xff]  }
 0x3da   : > { %7285 = vmatprep.subr.bf16.mxu1 %v8293_v45 }
 0x3dd   : > { %7286 = vmatpush3.bf16.msra.mxu1 %v8293_v45 }
 0x3de   : > { %7287 = vmatprep.subr.bf16.mxu1 %v8294_v2 }
 0x3e0   : > { %7276 = vmatmul.mubr.bf16.gmra.mrb[44].mxu1 %v4409_v47 }
 0x3e1   : > { %7288 = vmatpush3.bf16.msra.mxu1 %v8294_v2  ;;  %7295 = vmatprep.mubr.bf16.mxu1 %v4617_v21  ;;  %v5089_v2 = vshll.u32 %v5023_v57, 16  ;;  %v8331_v57 = vld [vmem:[#allocation9 + $0x208] sm:$0xff]  }
 0x3e2   : > { %7289 = vmatprep.subr.bf16.mxu1 %v8295_v51 }
 0x3e3   : > { %v5091_v21 = vrot.slane %v5089_v2, 1  ;;  %v5561_v2 = vrot.slane %v9879_v10, 4 }
 0x3e5   : > { %7290 = vmatpush3.bf16.msra.mxu1 %v8295_v51  ;;  %v5087_v51 = vor.u32 %v5083_v55, %v9863_v29 }
 0x3e6   : > { %7291 = vmatprep.subr.bf16.mxu1 %v8296_v16 }
 0x3e9   : > { %7292 = vmatpush3.bf16.msra.mxu1 %v8296_v16  ;;  %v8318_v16 = vld [vmem:[#allocation9 + $0x1a0] sm:$0xff]  }
 0x3ea   : > { %7293 = vmatprep.subr.bf16.mxu1 %v8297_v20 }
 0x3ed   : > { %7294 = vmatpush3.bf16.msra.mxu1 %v8297_v20 }
 0x3ee   : > { %7307 = vmatprep.subr.bf16.mxu1 %v8298_v59 }
 0x3f0   : > { %7296 = vmatmul.mubr.bf16.vlgmr.msra.gmra.mrb[36].mxu1 %v9795_v6  ;;  %v4649_v6 = vsel %vm4605_vm6, %v4637_v36, %v4648_v28  ;;  %v8305_v36 = vld [vmem:[#allocation9 + $0x138] sm:$0xff]   ;;  %v5317_v28 = vrot.slane %v9852_v9, 3 }
 0x3f1   : > { %7308 = vmatpush3.bf16.msra.mxu1 %v8298_v59  ;;  %7299 = vmatprep.mubr.bf16.mxu1 %v9806_v12  ;;  %v4656_v12 = vor.u32 %v9868_v25, %v4653_v13  ;;  %v5092_v59 = vsel %vm721_vm2, %v5087_v51, %v5091_v21  ;;  %v5320_v13 = vrot.slane %v9856_v8, 4  ;;  %v8333_v51 = vld [vmem:[#allocation9 + $0x218] sm:$0xff]  }
 0x3f2   : > { %7309 = vmatprep.subr.bf16.mxu1 %v8299_v60 }
 0x3f3   : > { %v4657_v54 = vsel %vm4605_vm6, %v4645_v0, %v4656_v12  ;;  %v8320_v0 = vld [vmem:[#allocation9 + $0x1b0] sm:$0xff]   ;;  %v5326_v12 = vrot.slane %v9863_v29, 3 }
 0x3f5   : > { %7310 = vmatpush3.bf16.msra.mxu1 %v8299_v60 }
 0x3f6   : > { %7311 = vmatprep.subr.bf16.mxu1 %v8300_v40 }
 0x3f8   : > { %7300 = vmatmul.mubr.bf16.gmra.mrb[40].mxu1 %v9809_v46  ;;  %v8306_v46 = vld [vmem:[#allocation9 + $0x140] sm:$0xff]  }
 0x3f9   : > { %7312 = vmatpush3.bf16.msra.mxu1 %v8300_v40  ;;  %7303 = vmatprep.mubr.bf16.mxu1 %v4649_v6  ;;  %v8321_v40 = vld [vmem:[#allocation9 + $0x1b8] sm:$0xff]   ;;  %v5321_v6 = vor.u32 %v5320_v13, %v5317_v28 }
 0x3fa   : > { %7313 = vmatprep.subr.bf16.mxu1 %v8301_v4 }
 0x3fd   : > { %7314 = vmatpush3.bf16.msra.mxu1 %v8301_v4  ;;  %v8322_v4 = vld [vmem:[#allocation9 + $0x1c0] sm:$0xff]  }
 0x3fe   : > { %7315 = vmatprep.subr.bf16.mxu1 %v8302_v53 }
 0x400   : > { %7304 = vmatmul.mubr.bf16.gmra.mrb[44].mxu1 %v4657_v54  ;;  %v5322_v54 = vsel %vm3874_vm4, %v9756_v26, %v5321_v6 }
 0x401   : > { %7316 = vmatpush3.bf16.msra.mxu1 %v8302_v53  ;;  %7323 = vmatprep.mubr.bf16.mxu1 %v9706_v41  ;;  %v8309_v41 = vld [vmem:[#allocation9 + $0x158] sm:$0xff]   ;;  %v8323_v53 = vld [vmem:[#allocation9 + $0x1c8] sm:$0xff]  }
 0x402   : > { %7317 = vmatprep.subr.bf16.mxu1 %v8303_v11 }
 0x405   : > { %7318 = vmatpush3.bf16.msra.mxu1 %v8303_v11  ;;  %v5335_v11 = vrot.slane %v5333_v7, 3 }
 0x406   : > { %7319 = vmatprep.subr.bf16.mxu1 %v8304_v39 }
 0x409   : > { %7320 = vmatpush3.bf16.msra.mxu1 %v8304_v39  ;;  %v5338_v39 = vrot.slane %v5336_v24, 4 }
 0x40a   : > { %7321 = vmatprep.subr.bf16.mxu1 %v8305_v36 }
 0x40d   : > { %7322 = vmatpush3.bf16.msra.mxu1 %v8305_v36  ;;  %v5270_v36 = vld [vmem:[#allocation3 + $0x48] sm:$0xf] }
 0x40e   : > { %7335 = vmatprep.subr.bf16.mxu1 %v8306_v46 }
 0x410   : > { %7324 = vmatmul.mubr.bf16.vlgmr.msra.gmra.mrb[36].mxu1 %v9708_v23  ;;  %v5807_v23 = vrot.slane %v5333_v7, 4  ;;  %v8325_v7 = vld [vmem:[#allocation9 + $0x1d8] sm:$0xff]  }
 0x411   : > { %7336 = vmatpush3.bf16.msra.mxu1 %v8306_v46  ;;  %7327 = vmatprep.mubr.bf16.mxu1 %v9725_v34  ;;  %v5810_v34 = vrot.slane %v5336_v24, 5 }
 0x412   : > { %7337 = vmatprep.subr.bf16.mxu1 %v8307_v5 }
 0x413   : > { %v9889_v14 = vor.u32 %v5810_v34, %v5807_v23  ;;  %v5339_v23 = vor.u32 %v5338_v39, %v5335_v11  ;;  %v8337_v39 = vld [vmem:[#allocation9 + $0x238] sm:$0xff]  }
 0x415   : > { %7338 = vmatpush3.bf16.msra.mxu1 %v8307_v5  ;;  %v5342_v5 = vshrl.u32 %v5270_v36, 16 }
 0x416   : > { %7339 = vmatprep.subr.bf16.mxu1 %v8308_v37 }
 0x417   : > { %v5344_v34 = vrot.slane %v5342_v5, 3 }
 0x418   : > { %7328 = vmatmul.mubr.bf16.gmra.mrb[40].mxu1 %v9728_v19  ;;  %v9896_v19 = vld [vmem:[%s10045_s4] ss:$0 sm:$0xff] }
 0x419   : > { %7340 = vmatpush3.bf16.msra.mxu1 %v8308_v37  ;;  %7331 = vmatprep.mubr.bf16.mxu1 %v9849_v27  ;;  %v3815_v33 = vadd.f32 %v6424_v63, %v9896_v19  ;;  %v3816_v3 = vadd.f32 %v6425_v31, %v9896_v19  ;;  %v5345_v37 = vshll.u32 %v5270_v36, 16  ;;  %v8326_v63 = vld [vmem:[#allocation9 + $0x1e0] sm:$0xff]   ;;  %v5769_v27 = vshrl.u32 %v5522_v42, 16 }
 0x41a   : > { %7341 = vmatprep.subr.bf16.mxu1 %v8309_v41  ;;  %v5789_v36 = vrot.slane %v9852_v9, 4 }
 0x41b   : > { %3828 = vst [vmem:[#allocation4 + $0xf] sm:$0xff] %v3815_v33  ;;  %3829 = vst [vmem:[#allocation4 + $0x17] sm:$0xff] %v3816_v3  ;;  %v8327_v3 = vld [vmem:[#allocation9 + $0x1e8] sm:$0xff]  }
 0x41d   : > { %7342 = vmatpush3.bf16.msra.mxu1 %v8309_v41  ;;  %v8324_v41 = vld [vmem:[#allocation9 + $0x1d0] sm:$0xff]  }
 0x41e   : > { %7343 = vmatprep.subr.bf16.mxu1 %v8310_v50 }
 0x420   : > { %7332 = vmatmul.mubr.bf16.gmra.mrb[44].mxu1 %v9858_v61 }
 0x421   : > { %7344 = vmatpush3.bf16.msra.mxu1 %v8310_v50  ;;  %7351 = vmatprep.mubr.bf16.mxu1 %v9823_v1  ;;  %v5264_v1 = vld [vmem:[#allocation3 + $0x18] sm:$0xf8]  ;;  %v5347_v50 = vrot.slane %v5345_v37, 4 }
 0x422   : > { %7345 = vmatprep.subr.bf16.mxu1 %v8311_v18  ;;  %v5289_v45 = vshrl.u32 %v5264_v1, 16  ;;  %v5292_v15 = vshll.u32 %v5264_v1, 16  ;;  %v5523_v1 = vld [vmem:[#allocation3 + $0x28] sm:$0xff] }
 0x423   : > { %v5555_v43 = vrot.slane %v5523_v1, 4 }
 0x424   : > { %v5291_v47 = vrot.slane %v5289_v45, 3 }
 0x425   : > { %7346 = vmatpush3.bf16.msra.mxu1 %v8311_v18  ;;  %v5521_v18 = vld [vmem:[#allocation3 + $0x18] sm:$0xf0]  ;;  %v5558_v45 = vsel %vm3731_vm3, %v5555_v43, %v5557_v48 }
 0x426   : > { %7347 = vmatprep.subr.bf16.mxu1 %v8312_v30  ;;  %v5552_v31 = vrot.slane %v5521_v18, 4 }
 0x429   : > { %7348 = vmatpush3.bf16.msra.mxu1 %v8312_v30  ;;  %v5553_v30 = vrot.slane %v5522_v42, 4 }
 0x42a   : > { %7349 = vmatprep.subr.bf16.mxu1 %v8313_v38 }
 0x42b   : > { %v5556_v55 = vsel %vm3731_vm3, %v5553_v30, %v5555_v43 }
 0x42d   : > { %7350 = vmatpush3.bf16.msra.mxu1 %v8313_v38  ;;  %v5554_v38 = vsel %vm3731_vm3, %v5552_v31, %v5553_v30 }
 0x42e   : > { %7363 = vmatprep.subr.bf16.mxu1 %v8314_v22 }
 0x430   : > { %7352 = vmatmul.mubr.bf16.vlgmr.msra.gmra.mrb[36].mxu1 %v9826_v56  ;;  %v8317_v56 = vld [vmem:[#allocation9 + $0x198] sm:$0xff]  }
 0x431   : > { %7364 = vmatpush3.bf16.msra.mxu1 %v8314_v22  ;;  %7355 = vmatprep.mubr.bf16.mxu1 %v9839_v32  ;;  %v5294_v32 = vrot.slane %v5292_v15, 4  ;;  %v8328_v22 = vld [vmem:[#allocation9 + $0x1f0] sm:$0xff]   ;;  %v5736_v15 = vld [vmem:[#allocation3 + $0x18] sm:$0xf0] }
 0x432   : > { %7365 = vmatprep.subr.bf16.mxu1 %v8315_v62 }
 0x433   : > { %v5295_v20 = vor.u32 %v5294_v32, %v5291_v47  ;;  %v5764_v47 = vshll.u32 %v5736_v15, 16  ;;  %v5772_v32 = vshll.u32 %v5522_v42, 16 }
 0x435   : > { %7366 = vmatpush3.bf16.msra.mxu1 %v8315_v62  ;;  %v5304_v60 = vsel %vm3874_vm4, %v5295_v20, %v9752_v58  ;;  %v5329_v58 = vrot.slane %v9868_v25, 4  ;;  %v8329_v62 = vld [vmem:[#allocation9 + $0x1f8] sm:$0xff]   ;;  %v5527_v20 = vld [vmem:[#allocation3 + $0x48] sm:$0xf] }
 0x436   : > { %7367 = vmatprep.subr.bf16.mxu1 %v8316_v44  ;;  %v5563_v10 = vrot.slane %v5527_v20, 4 }
 0x437   : > { %v5330_v46 = vor.u32 %v5329_v58, %v5326_v12  ;;  %v5778_v12 = vshrl.u32 %v5523_v1, 16  ;;  %v5781_v58 = vshll.u32 %v5523_v1, 16  ;;  %v6445_v1 = vld [vmem:[%s8757_s12 + $0x30] sm:$0xff]  }
 0x438   : > { %7356 = vmatmul.mubr.bf16.gmra.mrb[40].mxu1 %v5076_v49  ;;  %v5559_v49 = vrot.slane %v9858_v61, 4  ;;  %v5774_v61 = vrot.slane %v5772_v32, 5  ;;  %v5564_v13 = vsel %vm3731_vm3, %v5561_v2, %v5563_v10  ;;  %v6432_v43 = vunpack.c.l.bf16 %v6445_v1 }
 0x439   : > { %7368 = vmatpush3.bf16.msra.mxu1 %v8316_v44  ;;  %7359 = vmatprep.mubr.bf16.mxu1 %v5084_v52  ;;  %v5331_v26 = vsel %vm3874_vm4, %v5321_v6, %v5330_v46  ;;  %v5340_v24 = vsel %vm3874_vm4, %v5330_v46, %v5339_v23  ;;  %v8330_v44 = vld [vmem:[#allocation9 + $0x200] sm:$0xff]   ;;  %v5761_v52 = vshrl.u32 %v5736_v15, 16  ;;  %v5783_v11 = vrot.slane %v5781_v58, 5 }
 0x43a   : > { %7369 = vmatprep.subr.bf16.mxu1 %v8317_v56  ;;  %v5560_v21 = vsel %vm3731_vm3, %v5557_v48, %v5559_v49  ;;  %v5792_v46 = vrot.slane %v9856_v8, 5  ;;  %v6446_v48 = vld [vmem:[%s8757_s12 + $0x38] sm:$0xff]  }
 0x43c   : > { %v5793_v37 = vor.u32 %v5792_v46, %v5789_v36 }
 0x43d   : > { %7370 = vmatpush3.bf16.msra.mxu1 %v8317_v56  ;;  %v8332_v56 = vld [vmem:[#allocation9 + $0x210] sm:$0xff]  }
 0x43e   : > { %7371 = vmatprep.subr.bf16.mxu1 %v8318_v16 }
 0x440   : > { %7360 = vmatmul.mubr.bf16.gmra.mrb[44].mxu1 %v5092_v59  ;;  %v5763_v59 = vrot.slane %v5761_v52, 4 }
 0x441   : > { %7372 = vmatpush3.bf16.msra.mxu1 %v8318_v16  ;;  %7379 = vmatprep.mubr.bf16.mxu1 %v5304_v60  ;;  %v5562_v16 = vsel %vm3731_vm3, %v5559_v49, %v5561_v2  ;;  %v5771_v60 = vrot.slane %v5769_v27, 4  ;;  %v6447_v2 = vld [vmem:[%s8757_s12 + $0x40] sm:$0xff]   ;;  %v3792_v27 = vld [vmem:[%s8757_s12 + $0x48] sm:$0x1] }
 0x442   : > { %7373 = vmatprep.subr.bf16.mxu1 %v8319_v17  ;;  %v6441_v52 = vunpack.c.h.bf16 %v6447_v2 }
 0x443   : > { %v5775_v28 = vor.u32 %v5774_v61, %v5771_v60 }
 0x445   : > { %7374 = vmatpush3.bf16.msra.mxu1 %v8319_v17  ;;  %v5766_v17 = vrot.slane %v5764_v47, 5  ;;  %v6437_v47 = vunpack.c.h.bf16 %v6446_v48 }
 0x446   : > { %7375 = vmatprep.subr.bf16.mxu1 %v8320_v0 }
 0x449   : > { %7376 = vmatpush3.bf16.msra.mxu1 %v8320_v0  ;;  %v8334_v0 = vld [vmem:[#allocation9 + $0x220] sm:$0xff]  }
 0x44a   : > { %7377 = vmatprep.subr.bf16.mxu1 %v8321_v40 }
 0x44d   : > { %7378 = vmatpush3.bf16.msra.mxu1 %v8321_v40  ;;  %v5767_v40 = vor.u32 %v5766_v17, %v5763_v59  ;;  %v3841_v59 = vld [vmem:[#allocation4 + $0x10] sm:$0xff] }
 0x44e   : > { %7391 = vmatprep.subr.bf16.mxu1 %v8322_v4 }
 0x44f   : > { %v5776_v6 = vsel %vm4347_vm5, %v5767_v40, %v5775_v28 }
 0x450   : > { %7380 = vmatmul.mubr.bf16.vlgmr.msra.gmra.mrb[36].mxu1 %v9777_v35  ;;  %v5348_v35 = vor.u32 %v5347_v50, %v5344_v34  ;;  %v5742_v50 = vld [vmem:[#allocation3 + $0x48] sm:$0x1f] }
 0x451   : > { %7392 = vmatpush3.bf16.msra.mxu1 %v8322_v4  ;;  %7383 = vmatprep.mubr.bf16.mxu1 %v5322_v54  ;;  %v8335_v4 = vld [vmem:[#allocation9 + $0x228] sm:$0xff]   ;;  %v5780_v54 = vrot.slane %v5778_v12, 4  ;;  %v5814_v8 = vshrl.u32 %v5742_v50, 16 }
 0x452   : > { %7393 = vmatprep.subr.bf16.mxu1 %v8323_v53  ;;  %v5349_v33 = vsel %vm3874_vm4, %v5339_v23, %v5348_v35  ;;  %v5798_v23 = vrot.slane %v9863_v29, 4 }
 0x453   : > { %v5784_v5 = vor.u32 %v5783_v11, %v5780_v54  ;;  %v5816_v18 = vrot.slane %v5814_v8, 4 }
 0x455   : > { %7394 = vmatpush3.bf16.msra.mxu1 %v8323_v53  ;;  %v8336_v53 = vld [vmem:[#allocation9 + $0x230] sm:$0xff]   ;;  %v5794_v34 = vsel %vm4347_vm5, %v5784_v5, %v5793_v37 }
 0x456   : > { %7395 = vmatprep.subr.bf16.mxu1 %v8324_v41 }
 0x458   : > { %7384 = vmatmul.mubr.bf16.gmra.mrb[40].mxu1 %v5331_v26  ;;  %v5801_v26 = vrot.slane %v9868_v25, 5 }
 0x459   : > { %7396 = vmatpush3.bf16.msra.mxu1 %v8324_v41  ;;  %7387 = vmatprep.mubr.bf16.mxu1 %v5340_v24  ;;  %v5785_v41 = vsel %vm4347_vm5, %v5775_v28, %v5784_v5 }
 0x45a   : > { %7397 = vmatprep.subr.bf16.mxu1 %v8325_v7  ;;  %v5802_v9 = vor.u32 %v5801_v26, %v5798_v23 }
 0x45c   : > { %v5803_v24 = vsel %vm4347_vm5, %v5793_v37, %v5802_v9  ;;  %v5812_v35 = vsel %vm4347_vm5, %v5802_v9, %v9889_v14 }
 0x45d   : > { %7398 = vmatpush3.bf16.msra.mxu1 %v8325_v7  ;;  %v5817_v7 = vshll.u32 %v5742_v50, 16 }
 0x45e   : > { %7399 = vmatprep.subr.bf16.mxu1 %v8326_v63 }
 0x45f   : > { %v5819_v42 = vrot.slane %v5817_v7, 5 }
 0x460   : > { %7388 = vmatmul.mubr.bf16.gmra.mrb[44].mxu1 %v5349_v33  ;;  %v6444_v33 = vld [vmem:[%s8757_s12 + $0x28] sm:$0xff]  }
 0x461   : > { %7400 = vmatpush3.bf16.msra.mxu1 %v8326_v63  ;;  %7407 = vmatprep.mubr.bf16.mxu1 %v5554_v38  ;;  %v5820_v29 = vor.u32 %v5819_v42, %v5816_v18  ;;  %v6442_v63 = vld [vmem:[%s8757_s12 + $0x18] sm:$0xff]   ;;  %s6407_s12 = sshll.u32 %s8542_s22, 2  ;;  %s6021_s22 = sshll.u32 %s8789_s24, 4  ;;  %s9982_s22 = int_to_ptr.vmem [resolvable:$true] %s6021_s22 }
 0x462   : > { %7401 = vmatprep.subr.bf16.mxu1 %v8327_v3  ;;  %v6420_v31 = vunpack.c.l.bf16 %v6442_v63  ;;  %v6421_v30 = vunpack.c.h.bf16 %v6442_v63  ;;  %s6014_s14 = sadd.s32 %s8538_s21, %s6407_s12  ;;  %s8450_s27 = scalar_lea.vmem %s9982_s22, 1536 }
 0x463   : > { %v5821_v25 = vsel %vm4347_vm5, %v9889_v14, %v5820_v29  ;;  %v6433_v14 = vunpack.c.h.bf16 %v6445_v1  ;;  %s6417_s28 = smul.u32 1536, %s6014_s14  ;;  %p8451_p11 = scmp.ne.s32.totalorder %s9982_s22, %s8450_s27 }
 0x464   : > { %v3813_v38 = vadd.f32 %v6420_v31, %v9896_v19  ;;  %p8457_p10 = scmp.lt.s32.totalorder %s9982_s22, %s8455_s16  ;;  %p8458_p1 = scmp.lt.s32.totalorder %s8456_s17, %s8450_s27 }
 0x465   : > { %7402 = vmatpush3.bf16.msra.mxu1 %v8327_v3  ;;  %v6428_v3 = vunpack.c.l.bf16 %v6444_v33  ;;  %s9980_s30 = scalar_lea.hbm %s10046_s5, %s6417_s28  ;;  %p8452_p7 = pnand %p8451_p11, %p10129_p13 }
 0x466   : > { %7403 = vmatprep.subr.bf16.mxu1 %v8328_v22  ;;  %3826 = vst [vmem:[#allocation4 - $0x1] sm:$0xfe] %v3813_v38  ;;  %p8459_p3 = por %p8458_p1, %p8457_p10 }
 0x467   : > { %p8453_p0 = pneg %p8452_p7 }
 0x469   : > { %7404 = vmatpush3.bf16.msra.mxu1 %v8328_v22  ;;  %v3814_v22 = vadd.f32 %v6421_v30, %v9896_v19  ;;  %p8460_p6 = pnand %p8459_p3, %p8453_p0 }
 0x46a   : > { %7405 = vmatprep.subr.bf16.mxu1 %v8329_v62 }
 0x46b   : > { %3827 = vst [vmem:[#allocation4 + $0x7] sm:$0xff] %v3814_v22 }
 0x46d   : > { %7406 = vmatpush3.bf16.msra.mxu1 %v8329_v62  ;;  %v3817_v62 = vadd.f32 %v6428_v3, %v9896_v19 }
 0x46e   : > { %7419 = vmatprep.subr.bf16.mxu1 %v8330_v44 }
 0x46f   : > { %3830 = vst [vmem:[#allocation4 + $0x1f] sm:$0xff] %v3817_v62 }
 0x470   : > { %7408 = vmatmul.mubr.bf16.vlgmr.msra.gmra.mrb[36].mxu1 %v5556_v55  ;;  %v3819_v55 = vadd.f32 %v6432_v43, %v9896_v19 }
 0x471   : > { %7420 = vmatpush3.bf16.msra.mxu1 %v8330_v44  ;;  %7411 = vmatprep.mubr.bf16.mxu1 %v5558_v45  ;;  %v6429_v44 = vunpack.c.h.bf16 %v6444_v33  ;;  %v6436_v45 = vunpack.c.l.bf16 %v6446_v48 }
 0x472   : > { %7421 = vmatprep.subr.bf16.mxu1 %v8331_v57  ;;  %3832 = vst [vmem:[#allocation4 + $0x2f] sm:$0xff] %v3819_v55  ;;  %v3839_v17 = vld [vmem:[#allocation4] sm:$0xff]  ;;  %v3840_v40 = vld [vmem:[#allocation4 + $0x8] sm:$0xff] }
 0x473   : > { %v3818_v15 = vadd.f32 %v6429_v44, %v9896_v19  ;;  %v3821_v49 = vadd.f32 %v6436_v45, %v9896_v19 }
 0x475   : > { %7422 = vmatpush3.bf16.msra.mxu1 %v8331_v57  ;;  %v3820_v57 = vadd.f32 %v6433_v14, %v9896_v19  ;;  %3831 = vst [vmem:[#allocation4 + $0x27] sm:$0xff] %v3818_v15  ;;  %3834 = vst [vmem:[#allocation4 + $0x3f] sm:$0xff] %v3821_v49 }
 0x476   : > { %7423 = vmatprep.subr.bf16.mxu1 %v8332_v56  ;;  %v3842_v61 = vld [vmem:[#allocation4 + $0x18] sm:$0xff] }
 0x477   : > { %3833 = vst [vmem:[#allocation4 + $0x37] sm:$0xff] %v3820_v57 }
 0x478   : > { %7412 = vmatmul.mubr.bf16.gmra.mrb[40].mxu1 %v5560_v21  ;;  %v3805_v21 = vunpack.c.l.bf16 %v3792_v27 }
 0x479   : > { %7424 = vmatpush3.bf16.msra.mxu1 %v8332_v56  ;;  %7415 = vmatprep.mubr.bf16.mxu1 %v5562_v16  ;;  %v6440_v56 = vunpack.c.l.bf16 %v6447_v2  ;;  %v3822_v16 = vadd.f32 %v6437_v47, %v9896_v19 }
 0x47a   : > { %7425 = vmatprep.subr.bf16.mxu1 %v8333_v51  ;;  %v3825_v20 = vadd.f32 %v9896_v19, %v3805_v21 }
 0x47b   : > { %v3823_v32 = vadd.f32 %v6440_v56, %v9896_v19  ;;  %3835 = vst [vmem:[#allocation4 + $0x47] sm:$0xff] %v3822_v16 }
 0x47c   : > { %3838 = vst [vmem:[#allocation4 + $0x5f] sm:$0x1] %v3825_v20  ;;  %v3843_v58 = vld [vmem:[#allocation4 + $0x20] sm:$0xff]  ;;  %v3844_v36 = vld [vmem:[#allocation4 + $0x28] sm:$0xff] }
 0x47d   : > { %7426 = vmatpush3.bf16.msra.mxu1 %v8333_v51  ;;  %v3824_v51 = vadd.f32 %v6441_v52, %v9896_v19  ;;  %3836 = vst [vmem:[#allocation4 + $0x4f] sm:$0xff] %v3823_v32 }
 0x47e   : > { %7427 = vmatprep.subr.bf16.mxu1 %v8334_v0  ;;  %v3845_v12 = vld [vmem:[#allocation4 + $0x30] sm:$0xff]  ;;  %v3846_v54 = vld [vmem:[#allocation4 + $0x38] sm:$0xff] }
 0x47f   : > { %3837 = vst [vmem:[#allocation4 + $0x57] sm:$0xff] %v3824_v51 }
 0x480   : > { %7416 = vmatmul.mubr.bf16.gmra.mrb[44].mxu1 %v5564_v13 }
 0x481   : > { %7428 = vmatpush3.bf16.msra.mxu1 %v8334_v0  ;;  %7435 = vmatprep.mubr.bf16.mxu1 %v5776_v6 }
 0x482   : > { %7429 = vmatprep.subr.bf16.mxu1 %v8335_v4 }
 0x485   : > { %7430 = vmatpush3.bf16.msra.mxu1 %v8335_v4 }
 0x486   : > { %7431 = vmatprep.subr.bf16.mxu1 %v8336_v53  ;;  %v3849_v26 = vld [vmem:[#allocation4 + $0x50] sm:$0xff]  ;;  %v3850_v9 = vld [vmem:[#allocation4 + $0x58] sm:$0xff] }
 0x489   : > { %7432 = vmatpush3.bf16.msra.mxu1 %v8336_v53 }
 0x48a   : > { %7433 = vmatprep.subr.bf16.mxu1 %v8337_v39 }
 0x48d   : > { %7434 = vmatpush3.bf16.msra.mxu1 %v8337_v39 }
 0x490   : > { %7436 = vmatmul.mubr.bf16.vlgmr.msra.gmra.mrb[36].mxu1 %v5785_v41 }
 0x491   : > { %7439 = vmatprep.mubr.bf16.mxu1 %v5794_v34  ;;  %v3847_v34 = vld [vmem:[#allocation4 + $0x40] sm:$0xff] }
 0x498   : > { %7440 = vmatmul.mubr.bf16.gmra.mrb[40].mxu1 %v5803_v24  ;;  %v3848_v24 = vld [vmem:[#allocation4 + $0x48] sm:$0xff] }
 0x499   : > { %7443 = vmatprep.mubr.bf16.mxu1 %v5812_v35 }
 0x4a0   : > { %7444 = vmatmul.mubr.bf16.gmra.mrb[44].mxu1 %v5821_v25 }
 0x563   : > { %v7437_v60 = vpop.f32.mrb[36].mxu1 }
 0x564   : > { %v7573_v10 = vadd.f32 %v7437_v60, %v3841_v59  ;;  %v5910_v0 = vpop.f32.mrb[37].mxu1 }
 0x565   : > { %v7576_v28 = vadd.f32 %v5910_v0, %v3839_v17  ;;  %v7438_v13 = vpop.f32.mrb[38].mxu1 }
 0x566   : > { %5971 = vst [vmem:[#allocation4 + $0x10] sm:$0xff] %v7573_v10  ;;  %5995 = vst [vmem:[%s8789_s24 + $0x10] sm:$0xff] %v7573_v10  ;;  %v7579_v4 = vadd.f32 %v7438_v13, %v3842_v61  ;;  %v5913_v6 = vpop.f32.mrb[39].mxu1 }
 0x567   : > { %5969 = vst [vmem:[#allocation4] sm:$0xff] %v7576_v28  ;;  %5993 = vst [vmem:[%s8789_s24] sm:$0xff] %v7576_v28  ;;  %v7582_v19 = vadd.f32 %v5913_v6, %v3840_v40 }
 0x568   : > { %5972 = vst [vmem:[#allocation4 + $0x18] sm:$0xff] %v7579_v4  ;;  %5996 = vst [vmem:[%s8789_s24 + $0x18] sm:$0xff] %v7579_v4 }
 0x569   : > { %5970 = vst [vmem:[#allocation4 + $0x8] sm:$0xff] %v7582_v19  ;;  %5994 = vst [vmem:[%s8789_s24 + $0x8] sm:$0xff] %v7582_v19 }
 0x56b   : > { %v7441_v53 = vpop.f32.mrb[40].mxu1 }
 0x56c   : > { %v7585_v11 = vadd.f32 %v7441_v53, %v3845_v12  ;;  %v5926_v39 = vpop.f32.mrb[41].mxu1 }
 0x56d   : > { %v7588_v46 = vadd.f32 %v5926_v39, %v3843_v58  ;;  %v7442_v5 = vpop.f32.mrb[42].mxu1 }
 0x56e   : > { %5975 = vst [vmem:[#allocation4 + $0x30] sm:$0xff] %v7585_v11  ;;  %5999 = vst [vmem:[%s8789_s24 + $0x30] sm:$0xff] %v7585_v11  ;;  %v7591_v37 = vadd.f32 %v7442_v5, %v3846_v54  ;;  %v5929_v41 = vpop.f32.mrb[43].mxu1 }
 0x56f   : > { %5973 = vst [vmem:[#allocation4 + $0x20] sm:$0xff] %v7588_v46  ;;  %5997 = vst [vmem:[%s8789_s24 + $0x20] sm:$0xff] %v7588_v46  ;;  %v7594_v23 = vadd.f32 %v5929_v41, %v3844_v36 }
 0x570   : > { %5976 = vst [vmem:[#allocation4 + $0x38] sm:$0xff] %v7591_v37  ;;  %6000 = vst [vmem:[%s8789_s24 + $0x38] sm:$0xff] %v7591_v37 }
 0x571   : > { %5974 = vst [vmem:[#allocation4 + $0x28] sm:$0xff] %v7594_v23  ;;  %5998 = vst [vmem:[%s8789_s24 + $0x28] sm:$0xff] %v7594_v23 }
 0x573   : > { %v7445_v50 = vpop.f32.mrb[44].mxu1 }
 0x574   : > { %v7597_v8 = vadd.f32 %v7445_v50, %v3849_v26  ;;  %v5942_v7 = vpop.f32.mrb[45].mxu1 }
 0x575   : > { %v7600_v18 = vadd.f32 %v5942_v7, %v3847_v34  ;;  %v7446_v42 = vpop.f32.mrb[46].mxu1 }
 0x576   : > { %5979 = vst [vmem:[#allocation4 + $0x50] sm:$0xff] %v7597_v8  ;;  %6003 = vst [vmem:[%s8789_s24 + $0x50] sm:$0xff] %v7597_v8  ;;  %v7603_v35 = vadd.f32 %v7446_v42, %v3850_v9  ;;  %v5945_v29 = vpop.f32.mrb[47].mxu1 }
 0x577   : > { %5977 = vst [vmem:[#allocation4 + $0x40] sm:$0xff] %v7600_v18  ;;  %6001 = vst [vmem:[%s8789_s24 + $0x40] sm:$0xff] %v7600_v18  ;;  %v7606_v25 = vadd.f32 %v5945_v29, %v3848_v24 }
 0x578   : > { %5980 = vst [vmem:[#allocation4 + $0x58] sm:$0xff] %v7603_v35  ;;  %6004 = vst [vmem:[%s8789_s24 + $0x58] sm:$0xff] %v7603_v35 }
 0x579   : > { %5978 = vst [vmem:[#allocation4 + $0x48] sm:$0xff] %v7606_v25  ;;  %6002 = vst [vmem:[%s8789_s24 + $0x48] sm:$0xff] %v7606_v25 }
 0x57a   : > { %8463 = shalt.err (!%p8460_p6)
}
 0x57b   : > { %s8464_s24 = scalar_lea.hbm %s9980_s30, 1536  ;;  %s8468_s3 = scalar_lea.hbm %s10046_s5, 12288 }
 0x57c   : > { %p8465_p4 = scmp.ne.s32.totalorder %s9980_s30, %s8464_s24  ;;  %p8469_p5 = scmp.lt.u32.totalorder %s9980_s30, %s10046_s5 }
 0x57d   : > { %p8470_p2 = scmp.lt.u32.totalorder %s8468_s3, %s8464_s24  ;;  %p8472_p11 = scmp.lt.u32.totalorder %s8464_s24, %s9980_s30 }
 0x57e   : > { %p8466_p8 = pnand %p8465_p4, %p10129_p13 }
 0x57f   : > { %p8471_p12 = por %p8470_p2, %p8469_p5 }
 0x580   : > { %p8467_p9 = pneg %p8466_p8 }
 0x581   : > { %p8473_p7 = por %p8472_p11, %p8471_p12 }
 0x583   : > { %p8474_p0 = pnand %p8473_p7, %p8467_p9 }
 0x585   : > { %8477 = shalt.err (!%p8474_p0)
}
 0x586   : > { %s8567_s15 = smov 128   ;;  %s8568_s29 = smov 8  }
 0x587   : > { %8004 = dma.vmem_to_hbm [thread:$0]  (%p10129_p13), %s9982_s22, 1536, %s9980_s30, %s9989_s11, %s8567_s15, %s8567_s15, %s8568_s29  }
 0x588 PF: > { %p8023_p10 = scmp.ge.s32.totalorder %s8554_s25, 2  ;;  %s6036_s12 = sand.u32 1, %s8526_s18  }
 0x589   : > { %p10130_p1 = scmp.ne.s32.totalorder %s10065_s9, 0  ;;  %s6037_s14 = scalar_lea.sflag [#allocation8], %s6036_s12 }
 0x58b   : > { %p8014_p3 = pnand %p8023_p10, %p10130_p1 }
 0x58d   : > { %8521 = dma.done.wait (!%p8014_p3), %s6037_s14, 1536  }
 0x58e   : > { %8523 = vsyncadd (!%p8014_p3), %s6037_s14, 4294965760  ;;  %s20_s25 = sadd.s32 1, %s8554_s25   ;;  %s10131_s28 = sld [smem:[#allocation26_spill]] }
 0x58f   : > { %p17_p6 = scmp.ge.s32.totalorder %s20_s25, 10   ;;  %s10132_s21 = sld [smem:[#allocation22_spill]] }
 0x590   : > { %s10133_s22 = sld [smem:[#allocation23_spill]]  ;;  %s10134_s23 = sld [smem:[#allocation24_spill]] }
 0x591   : > { %s10135_s24 = sld [smem:[#allocation25_spill]]  ;;  %s10136_s18 = smov %s8530_s19 }
 0x592   : > { %s10137_s19 = smov %s8534_s20  ;;  %19 = sbr.rel (!%p17_p6) target bundleno = 10 (0xa), region = 126 }
 0x594   : > { %s10138_s20 = smov %s10131_s28 }
 0x599   :  { %6042 = vsyncpa [#allocation7], 1 }
 0x59a   :  { %6044 = vsyncpa [#allocation7 + $0x1], 1 }
 0x59b   :  { %6045 = vsyncpa [#allocation10], 1 }
 0x59c   :  { %6046 = vsyncpa [#allocation8], 1 }
 0x59d   :  { %6048 = vsyncpa [#allocation8 + $0x1], 1 }
 0x59e   :  { %6049 = vsyncmov [#allocation5] }
 0x5a1   :  { %s6050_s8 = vpop.sfrf %6049 }
 0x5a2   :  { %p6411_p13 = scmp.ne.s32.totalorder %s6050_s8, 0 }
 0x5a4   :  { %6054 = shalt.err (%p6411_p13)  }
 0x5a5   :  { %6056 = vsyncmov [#allocation5 + $0x1] }
 0x5a8   :  { %s6057_s9 = vpop.sfrf %6056 }
 0x5a9   :  { %p6412_p4 = scmp.ne.s32.totalorder %s6057_s9, 0 }
 0x5ab   :  { %6061 = shalt.err (%p6412_p4)  }

</bundles_post_ra>
